<compile_context>
chip_gen: v6e
topology: v6e:2x2x1
jax: 0.10.0
libtpu: 0.0.40
codegen_flags: <defaults>
</compile_context>

<pallas_src>
import functools

import jax
import jax.numpy as jnp
from jax import lax
from jax.experimental import pallas as pl
from jax.experimental.pallas import tpu as pltpu


# ----------------------------------------------------------------------------
# Fused Pallas kernel: all GRU layers + last-timestep Linear
# ----------------------------------------------------------------------------
def gru_model_kernel(*refs, num_layers, T, Tc, Bt, Hp):
    """refs layout (all VMEM, one batch tile of Bt rows):
      x_ref                            [T, Bt, Dp]   bf16 time-major input tile
      per layer l: wih [Din_p, 3Hp] bf16, whh [Hp, 3Hp] bf16,
                   bih [1, 3Hp] f32,     bhh [1, 3Hp] f32
      fcw_ref [Hp, Op] bf16, fcb_ref [1, Op] f32
      out_ref [Bt, Op] f32
      scratch: gi_ref [Tc, Bt, 3Hp] f32 (chunked GI), seq_ref [T, Bt, Hp] bf16
    Gate order is PyTorch's (r, z, n); each gate block is padded to Hp lanes.
    """
    x_ref = refs[0]
    lrefs = refs[1:1 + 4 * num_layers]
    fcw_ref, fcb_ref, out_ref, gi_ref, seq_ref = refs[1 + 4 * num_layers:]

    H3 = 3 * Hp
    cur_in = x_ref
    h = jnp.zeros((Bt, Hp), jnp.float32)

    for l in range(num_layers):                       # static layer unroll
        wih = lrefs[4 * l + 0][...]                   # bf16 [Din_p, 3Hp]
        whh = lrefs[4 * l + 1][...]                   # bf16 [Hp, 3Hp]
        bih = lrefs[4 * l + 2][...]                   # f32  [1, 3Hp]
        # hoisted bias broadcast (JAX does not CSE broadcast_in_dim)
        bhh_b = jnp.broadcast_to(lrefs[4 * l + 3][...], (Bt, H3))
        din = wih.shape[0]
        is_last = (l == num_layers - 1)

        h = jnp.zeros((Bt, Hp), jnp.float32)          # h0 = 0 per layer

        # ---- T-chunked hoisted input projection + recurrence ---------------
        for c0 in range(0, T, Tc):                    # static chunk loop
            clen = min(Tc, T - c0)

            # one big MXU matmul for `clen` timesteps (bf16 ops, f32 acc)
            xin = cur_in[c0:c0 + clen].reshape(clen * Bt, din)
            gi_all = jnp.dot(xin, wih,
                             preferred_element_type=jnp.float32) + bih
            gi_ref[0:clen] = gi_all.reshape(clen, Bt, H3)

            def step(t, h, c0=c0, whh=whh, bhh_b=bhh_b, is_last=is_last):
                gi = gi_ref[t]                                    # f32 [Bt,3Hp]
                gh = jnp.dot(h.astype(jnp.bfloat16), whh,
                             preferred_element_type=jnp.float32) + bhh_b
                r = jax.nn.sigmoid(gi[:, 0:Hp] + gh[:, 0:Hp])
                z = jax.nn.sigmoid(gi[:, Hp:2 * Hp] + gh[:, Hp:2 * Hp])
                n = jnp.tanh(gi[:, 2 * Hp:3 * Hp] + r * gh[:, 2 * Hp:3 * Hp])
                h_new = (1.0 - z) * n + z * h                     # f32 carry
                if not is_last:
                    # feed next layer; stays in VMEM (bf16: matmul operand only)
                    seq_ref[c0 + t] = h_new.astype(jnp.bfloat16)
                return h_new

            h = lax.fori_loop(0, clen, step, h, unroll=min(clen, 8))

        cur_in = seq_ref

    # ---- fused final Linear on the last timestep only (no [T,B,H] HBM write)
    out_ref[...] = (
        jnp.dot(h.astype(jnp.bfloat16), fcw_ref[...],
                preferred_element_type=jnp.float32)
        + fcb_ref[...]
    )


# ----------------------------------------------------------------------------
# Padding / preparation helpers
# ----------------------------------------------------------------------------
_B_QUANT = 16          # sublane quantum for bf16-packed batch tiles


def _round_up(x, m):
    return (x + m - 1) // m * m


def _pad_gate_mat(w_t, rows_p, hp):
    """w_t: [rows, 3H] (gates r,z,n concatenated) -> [rows_p, 3*hp]."""
    rows, h3 = w_t.shape
    h = h3 // 3
    blocks = []
    for g in range(3):
        blk = w_t[:, g * h:(g + 1) * h]
        blocks.append(jnp.pad(blk, ((0, rows_p - rows), (0, hp - h))))
    return jnp.concatenate(blocks, axis=1)


def _pad_gate_bias(b, hp):
    """b: [1, 3H] -> [1, 3*hp]."""
    h = b.shape[1] // 3
    blocks = [jnp.pad(b[:, g * h:(g + 1) * h], ((0, 0), (0, hp - h)))
              for g in range(3)]
    return jnp.concatenate(blocks, axis=1)


def prepare_params(params):
    """Pad (per-gate) + cast weights ONCE, outside the jitted forward."""
    D = params["gru_layers"][0]["w_ih_t"].shape[0]
    H = params["gru_layers"][0]["w_hh_t"].shape[0]
    O = params["fc_w_t"].shape[1]
    Dp = _round_up(D, 128)
    Hp = _round_up(H, 128)
    Op = _round_up(O, 128)

    layers = []
    for l, layer in enumerate(params["gru_layers"]):
        din_p = Dp if l == 0 else Hp
        layers.append(dict(
            wih=_pad_gate_mat(layer["w_ih_t"], din_p, Hp).astype(jnp.bfloat16),
            whh=_pad_gate_mat(layer["w_hh_t"], Hp, Hp).astype(jnp.bfloat16),
            bih=_pad_gate_bias(layer["b_ih"], Hp).astype(jnp.float32),
            bhh=_pad_gate_bias(layer["b_hh"], Hp).astype(jnp.float32),
        ))
    fc_w = jnp.pad(params["fc_w_t"],
                   ((0, Hp - H), (0, Op - O))).astype(jnp.bfloat16)
    fc_b = jnp.pad(params["fc_b"], ((0, 0), (0, Op - O))).astype(jnp.float32)
    return {"layers": layers, "fc_w": fc_w, "fc_b": fc_b}


@functools.lru_cache(maxsize=None)
def _vmem_limit_bytes():
    """Generation-aware VMEM limit: ~80% of capacity, capped at 112 MiB."""
    cap = 64 * 1024 * 1024
    try:
        cap = int(pltpu.get_tpu_info().vmem_capacity_bytes)
    except Exception:
        pass
    return max(32 * 1024 * 1024, min(int(cap * 0.8), 112 * 1024 * 1024))


# ----------------------------------------------------------------------------
# Wrapper
# ----------------------------------------------------------------------------
@functools.partial(jax.jit, static_argnames=("out_dim",))
def gru_model_forward(x_btd, prep, out_dim):
    """Pallas implementation of GRUModel.forward (eval mode)."""
    B, T, D = x_btd.shape
    layers = prep["layers"]
    L = len(layers)
    Dp = layers[0]["wih"].shape[0]
    Hp = layers[0]["whh"].shape[0]
    Op = prep["fc_w"].shape[1]

    Bp = _round_up(B, _B_QUANT)
    Bt = Bp if Bp <= 256 else 256          # batch tile (MXU-friendly rows)
    Bp = _round_up(Bp, Bt)
    Tc = min(T, 32)                        # GI chunk length over time

    # batch_first [B,T,D] -> time-major bf16 [T,Bp,Dp]
    x_tbd = jnp.transpose(x_btd, (1, 0, 2)).astype(jnp.bfloat16)
    x_pad = jnp.pad(x_tbd, ((0, 0), (0, Bp - B), (0, Dp - D)))

    args = [x_pad]
    in_specs = [pl.BlockSpec((T, Bt, Dp), lambda i: (0, i, 0))]
    for lyr in layers:
        for name in ("wih", "whh", "bih", "bhh"):
            arr = lyr[name]
            args.append(arr)
            in_specs.append(pl.BlockSpec(arr.shape, lambda i: (0, 0)))
    for name in ("fc_w", "fc_b"):
        arr = prep[name]
        args.append(arr)
        in_specs.append(pl.BlockSpec(arr.shape, lambda i: (0, 0)))

    kernel = functools.partial(
        gru_model_kernel, num_layers=L, T=T, Tc=Tc, Bt=Bt, Hp=Hp)

    out_pad = pl.pallas_call(
        kernel,
        grid=(Bp // Bt,),                                  # batch tiles
        out_shape=jax.ShapeDtypeStruct((Bp, Op), jnp.float32),
        in_specs=in_specs,
        out_specs=pl.BlockSpec((Bt, Op), lambda i: (i, 0)),
        scratch_shapes=[
            pltpu.VMEM((Tc, Bt, 3 * Hp), jnp.float32),     # chunked GI
            pltpu.VMEM((T, Bt, Hp), jnp.bfloat16),         # inter-layer seq
        ],
        compiler_params=pltpu.CompilerParams(
            dimension_semantics=("parallel",),             # v7x megacore
            vmem_limit_bytes=_vmem_limit_bytes()),
    )(*args)

    return out_pad[:B, :out_dim]


# ----------------------------------------------------------------------------
# Pure-JAX references (f32 exact, and bf16-operand quantized like the kernel)
# ----------------------------------------------------------------------------
def gru_model_reference(x_btd, params, mxu_dtype=jnp.float32):
    cast = lambda a: a.astype(mxu_dtype)
    h_seq = jnp.transpose(x_btd, (1, 0, 2)).astype(jnp.float32)
    for layer in params["gru_layers"]:
        H = layer["w_hh_t"].shape[0]
        T, B, _ = h_seq.shape
        w_ih = cast(layer["w_ih_t"])
        w_hh = cast(layer["w_hh_t"])

        def step(h, x_t, w_ih=w_ih, w_hh=w_hh, layer=layer, H=H):
            gi = jnp.dot(cast(x_t), w_ih,
                         preferred_element_type=jnp.float32) + layer["b_ih"]
            gh = jnp.dot(cast(h), w_hh,
                         preferred_element_type=jnp.float32) + layer["b_hh"]
            r = jax.nn.sigmoid(gi[:, :H] + gh[:, :H])
            z = jax.nn.sigmoid(gi[:, H:2 * H] + gh[:, H:2 * H])
            n = jnp.tanh(gi[:, 2 * H:] + r * gh[:, 2 * H:])
            h_new = (1.0 - z) * n + z * h
            return h_new, h_new

        _, h_seq = lax.scan(step, jnp.zeros((B, H), jnp.float32), h_seq)
    return (jnp.dot(cast(h_seq[-1]), cast(params["fc_w_t"]),
                    preferred_element_type=jnp.float32) + params["fc_b"])


# ----------------------------------------------------------------------------
# Deterministic parameter construction (matches nn.GRU / nn.Linear shapes)
# ----------------------------------------------------------------------------
def init_params(key, input_dim, hidden_dim, num_layers, output_dim):
    params = {"gru_layers": []}
    scale = 1.0 / jnp.sqrt(hidden_dim)
    for l in range(num_layers):
        d_in = input_dim if l == 0 else hidden_dim
        key, k1, k2, k3, k4 = jax.random.split(key, 5)
        # PyTorch stores weight_ih_l{l}: [3H, d_in]; we keep the transpose.
        w_ih_t = jax.random.uniform(k1, (d_in, 3 * hidden_dim),
                                    jnp.float32, -scale, scale)
        w_hh_t = jax.random.uniform(k2, (hidden_dim, 3 * hidden_dim),
                                    jnp.float32, -scale, scale)
        b_ih = jax.random.uniform(k3, (1, 3 * hidden_dim),
                                  jnp.float32, -scale, scale)
        b_hh = jax.random.uniform(k4, (1, 3 * hidden_dim),
                                  jnp.float32, -scale, scale)
        params["gru_layers"].append(
            dict(w_ih_t=w_ih_t, w_hh_t=w_hh_t, b_ih=b_ih, b_hh=b_hh))
    key, k5, k6 = jax.random.split(key, 3)
    fc_scale = 1.0 / jnp.sqrt(hidden_dim)
    params["fc_w_t"] = jax.random.uniform(k5, (hidden_dim, output_dim),
                                          jnp.float32, -fc_scale, fc_scale)
    params["fc_b"] = jax.random.uniform(k6, (1, output_dim),
                                        jnp.float32, -fc_scale, fc_scale)
    return params


# ----------------------------------------------------------------------------
if __name__ == "__main__":
    B, T = 2, 8
    INPUT_DIM, HIDDEN_DIM, NUM_LAYERS, OUTPUT_DIM = 16, 32, 2, 4

    key = jax.random.PRNGKey(0)
    key, kx, kp = jax.random.split(key, 3)

    x = jax.random.normal(kx, (B, T, INPUT_DIM), jnp.float32)
    params = init_params(kp, INPUT_DIM, HIDDEN_DIM, NUM_LAYERS, OUTPUT_DIM)

    prep = prepare_params(params)        # pad + bf16-cast ONCE, outside jit

    out = gru_model_forward(x, prep, out_dim=OUTPUT_DIM)
    out = jax.block_until_ready(out)
    assert out.shape == (B, OUTPUT_DIM), out.shape

    # Tight check vs a reference that uses the same bf16 MXU-operand
    # quantization (f32 accumulation / carry) as the kernel.
    ref_bf16 = gru_model_reference(x, params, mxu_dtype=jnp.bfloat16)
    assert jnp.allclose(out, ref_bf16, rtol=1e-3, atol=1e-3), (out, ref_bf16)

    # Semantic check vs the exact f32 reference; tolerance reflects bf16
    # operand rounding in the MXU matmuls.
    ref_f32 = gru_model_reference(x, params, mxu_dtype=jnp.float32)
    assert jnp.allclose(out, ref_f32, rtol=5e-2, atol=5e-2), (out, ref_f32)

    print("KERNEL_OK")
</pallas_src>

<mosaic_0001>
module attributes {stable_mosaic.version = 11 : i64} {
  func.func @gru_model_kernel(%arg0: i32, %arg1: memref<8x16x128xbf16, #tpu.memory_space<vmem>>, %arg2: memref<128x384xbf16, #tpu.memory_space<vmem>>, %arg3: memref<128x384xbf16, #tpu.memory_space<vmem>>, %arg4: memref<1x384xf32, #tpu.memory_space<vmem>>, %arg5: memref<1x384xf32, #tpu.memory_space<vmem>>, %arg6: memref<128x384xbf16, #tpu.memory_space<vmem>>, %arg7: memref<128x384xbf16, #tpu.memory_space<vmem>>, %arg8: memref<1x384xf32, #tpu.memory_space<vmem>>, %arg9: memref<1x384xf32, #tpu.memory_space<vmem>>, %arg10: memref<128x128xbf16, #tpu.memory_space<vmem>>, %arg11: memref<1x128xf32, #tpu.memory_space<vmem>>, %arg12: memref<16x128xf32, #tpu.memory_space<vmem>>, %arg13: memref<8x16x384xf32, #tpu.memory_space<vmem>>, %arg14: memref<8x16x128xbf16, #tpu.memory_space<vmem>>) attributes {dimension_semantics = [#tpu.dimension_semantics<parallel>], iteration_bounds = array<i64: 1>, scalar_prefetch = 0 : i64, scratch_operands = 2 : i64, tpu.core_type = #tpu.core_type<tc>, window_params = [{transform_indices = @transform_0, window_bounds = array<i64: 8, 16, 128>}, {pipeline_mode = #tpu.pipeline_mode<synchronous>, transform_indices = @transform_1, window_bounds = array<i64: 128, 384>}, {pipeline_mode = #tpu.pipeline_mode<synchronous>, transform_indices = @transform_2, window_bounds = array<i64: 128, 384>}, {pipeline_mode = #tpu.pipeline_mode<synchronous>, transform_indices = @transform_3, window_bounds = array<i64: 1, 384>}, {pipeline_mode = #tpu.pipeline_mode<synchronous>, transform_indices = @transform_4, window_bounds = array<i64: 1, 384>}, {pipeline_mode = #tpu.pipeline_mode<synchronous>, transform_indices = @transform_5, window_bounds = array<i64: 128, 384>}, {pipeline_mode = #tpu.pipeline_mode<synchronous>, transform_indices = @transform_6, window_bounds = array<i64: 128, 384>}, {pipeline_mode = #tpu.pipeline_mode<synchronous>, transform_indices = @transform_7, window_bounds = array<i64: 1, 384>}, {pipeline_mode = #tpu.pipeline_mode<synchronous>, transform_indices = @transform_8, window_bounds = array<i64: 1, 384>}, {pipeline_mode = #tpu.pipeline_mode<synchronous>, transform_indices = @transform_9, window_bounds = array<i64: 128, 128>}, {pipeline_mode = #tpu.pipeline_mode<synchronous>, transform_indices = @transform_10, window_bounds = array<i64: 1, 128>}, {transform_indices = @transform_11, window_bounds = array<i64: 16, 128>}]} {
    %c0 = arith.constant 0 : index
    %c0_0 = arith.constant 0 : index
    %0 = vector.load %arg2[%c0, %c0_0] : memref<128x384xbf16, #tpu.memory_space<vmem>>, vector<128x384xbf16>
    %c0_1 = arith.constant 0 : index
    %c0_2 = arith.constant 0 : index
    %1 = vector.load %arg3[%c0_1, %c0_2] : memref<128x384xbf16, #tpu.memory_space<vmem>>, vector<128x384xbf16>
    %c0_3 = arith.constant 0 : index
    %c0_4 = arith.constant 0 : index
    %2 = vector.load %arg4[%c0_3, %c0_4] : memref<1x384xf32, #tpu.memory_space<vmem>>, vector<1x384xf32>
    %c0_5 = arith.constant 0 : index
    %c0_6 = arith.constant 0 : index
    %3 = vector.load %arg5[%c0_5, %c0_6] : memref<1x384xf32, #tpu.memory_space<vmem>>, vector<1x384xf32>
    %4 = vector.shape_cast %3 : vector<1x384xf32> to vector<1x384xf32>
    %5 = vector.broadcast %4 : vector<1x384xf32> to vector<16x384xf32>
    %cst = arith.constant 0.000000e+00 : f32
    %6 = vector.broadcast %cst : f32 to vector<16x128xf32>
    %c0_7 = arith.constant 0 : index
    %c0_8 = arith.constant 0 : index
    %c0_9 = arith.constant 0 : index
    %7 = vector.load %arg1[%c0_7, %c0_8, %c0_9] : memref<8x16x128xbf16, #tpu.memory_space<vmem>>, vector<8x16x128xbf16>
    %8 = vector.shape_cast %7 : vector<8x16x128xbf16> to vector<128x128xbf16>
    %cst_10 = arith.constant dense<0.000000e+00> : vector<128x384xf32>
    %9 = tpu.matmul %8, %0, %cst_10 {dimension_numbers = #tpu.dot_dimension_numbers<[1], [0], [0], [1], [0, 0, 1, 1], [], []>} : vector<128x128xbf16>, vector<128x384xbf16>, vector<128x384xf32> -> vector<128x384xf32>
    %10 = vector.broadcast %2 : vector<1x384xf32> to vector<128x384xf32>
    %11 = arith.addf %9, %10 : vector<128x384xf32>
    %12 = vector.shape_cast %11 : vector<128x384xf32> to vector<8x16x384xf32>
    %c0_11 = arith.constant 0 : index
    %c0_12 = arith.constant 0 : index
    %c0_13 = arith.constant 0 : index
    %13 = vector.load %arg13[%c0_11, %c0_12, %c0_13] : memref<8x16x384xf32, #tpu.memory_space<vmem>>, vector<8x16x384xf32>
    tpu.vector_store %arg13[%c0_11, %c0_12, %c0_13], %12 {strides = array<i32>} : memref<8x16x384xf32, #tpu.memory_space<vmem>>, vector<8x16x384xf32>,
    %c0_i32 = arith.constant 0 : i32
    %14 = arith.index_cast %c0_i32 : i32 to index
    %c0_14 = arith.constant 0 : index
    %c0_15 = arith.constant 0 : index
    %15 = vector.load %arg13[%14, %c0_14, %c0_15] : memref<8x16x384xf32, #tpu.memory_space<vmem>>, vector<1x16x384xf32>
    %16 = vector.shape_cast %15 : vector<1x16x384xf32> to vector<16x384xf32>
    %17 = arith.truncf %6 : vector<16x128xf32> to vector<16x128xbf16>
    %cst_16 = arith.constant dense<0.000000e+00> : vector<16x384xf32>
    %18 = tpu.matmul %17, %1, %cst_16 {dimension_numbers = #tpu.dot_dimension_numbers<[1], [0], [0], [1], [0, 0, 1, 1], [], []>} : vector<16x128xbf16>, vector<128x384xbf16>, vector<16x384xf32> -> vector<16x384xf32>
    %19 = arith.addf %18, %5 : vector<16x384xf32>
    %20 = vector.extract_strided_slice %16 {offsets = [0, 0], sizes = [16, 128], strides = [1, 1]} : vector<16x384xf32> to vector<16x128xf32>
    %21 = vector.extract_strided_slice %19 {offsets = [0, 0], sizes = [16, 128], strides = [1, 1]} : vector<16x384xf32> to vector<16x128xf32>
    %22 = arith.addf %20, %21 : vector<16x128xf32>
    %23 = arith.negf %22 : vector<16x128xf32>
    %24 = math.exp %23 : vector<16x128xf32>
    %cst_17 = arith.constant 1.000000e+00 : f32
    %25 = vector.broadcast %cst_17 : f32 to vector<16x128xf32>
    %26 = arith.addf %25, %24 : vector<16x128xf32>
    %27 = arith.divf %25, %26 : vector<16x128xf32>
    %28 = vector.extract_strided_slice %16 {offsets = [0, 128], sizes = [16, 128], strides = [1, 1]} : vector<16x384xf32> to vector<16x128xf32>
    %29 = vector.extract_strided_slice %19 {offsets = [0, 128], sizes = [16, 128], strides = [1, 1]} : vector<16x384xf32> to vector<16x128xf32>
    %30 = arith.addf %28, %29 : vector<16x128xf32>
    %31 = arith.negf %30 : vector<16x128xf32>
    %32 = math.exp %31 : vector<16x128xf32>
    %cst_18 = arith.constant 1.000000e+00 : f32
    %33 = vector.broadcast %cst_18 : f32 to vector<16x128xf32>
    %34 = arith.addf %33, %32 : vector<16x128xf32>
    %35 = arith.divf %33, %34 : vector<16x128xf32>
    %36 = vector.extract_strided_slice %16 {offsets = [0, 256], sizes = [16, 128], strides = [1, 1]} : vector<16x384xf32> to vector<16x128xf32>
    %37 = vector.extract_strided_slice %19 {offsets = [0, 256], sizes = [16, 128], strides = [1, 1]} : vector<16x384xf32> to vector<16x128xf32>
    %38 = arith.mulf %27, %37 : vector<16x128xf32>
    %39 = arith.addf %36, %38 : vector<16x128xf32>
    %40 = math.tanh %39 : vector<16x128xf32>
    %cst_19 = arith.constant 1.000000e+00 : f32
    %41 = vector.broadcast %cst_19 : f32 to vector<16x128xf32>
    %42 = arith.subf %41, %35 : vector<16x128xf32>
    %43 = arith.mulf %42, %40 : vector<16x128xf32>
    %44 = arith.mulf %35, %6 : vector<16x128xf32>
    %45 = arith.addf %43, %44 : vector<16x128xf32>
    %46 = arith.truncf %45 : vector<16x128xf32> to vector<16x128xbf16>
    %c0_i32_20 = arith.constant 0 : i32
    %47 = arith.addi %c0_i32_20, %c0_i32 : i32
    %48 = arith.index_cast %47 : i32 to index
    %c0_21 = arith.constant 0 : index
    %c0_22 = arith.constant 0 : index
    %49 = vector.load %arg14[%48, %c0_21, %c0_22] : memref<8x16x128xbf16, #tpu.memory_space<vmem>>, vector<1x16x128xbf16>
    %50 = vector.shape_cast %49 : vector<1x16x128xbf16> to vector<16x128xbf16>
    %51 = vector.shape_cast %46 : vector<16x128xbf16> to vector<1x16x128xbf16>
    tpu.vector_store %arg14[%48, %c0_21, %c0_22], %51 {strides = array<i32>} : memref<8x16x128xbf16, #tpu.memory_space<vmem>>, vector<1x16x128xbf16>,
    %c1_i32 = arith.constant 1 : i32
    %52 = arith.index_cast %c1_i32 : i32 to index
    %c0_23 = arith.constant 0 : index
    %c0_24 = arith.constant 0 : index
    %53 = vector.load %arg13[%52, %c0_23, %c0_24] : memref<8x16x384xf32, #tpu.memory_space<vmem>>, vector<1x16x384xf32>
    %54 = vector.shape_cast %53 : vector<1x16x384xf32> to vector<16x384xf32>
    %55 = arith.truncf %45 : vector<16x128xf32> to vector<16x128xbf16>
    %cst_25 = arith.constant dense<0.000000e+00> : vector<16x384xf32>
    %56 = tpu.matmul %55, %1, %cst_25 {dimension_numbers = #tpu.dot_dimension_numbers<[1], [0], [0], [1], [0, 0, 1, 1], [], []>} : vector<16x128xbf16>, vector<128x384xbf16>, vector<16x384xf32> -> vector<16x384xf32>
    %57 = arith.addf %56, %5 : vector<16x384xf32>
    %58 = vector.extract_strided_slice %54 {offsets = [0, 0], sizes = [16, 128], strides = [1, 1]} : vector<16x384xf32> to vector<16x128xf32>
    %59 = vector.extract_strided_slice %57 {offsets = [0, 0], sizes = [16, 128], strides = [1, 1]} : vector<16x384xf32> to vector<16x128xf32>
    %60 = arith.addf %58, %59 : vector<16x128xf32>
    %61 = arith.negf %60 : vector<16x128xf32>
    %62 = math.exp %61 : vector<16x128xf32>
    %cst_26 = arith.constant 1.000000e+00 : f32
    %63 = vector.broadcast %cst_26 : f32 to vector<16x128xf32>
    %64 = arith.addf %63, %62 : vector<16x128xf32>
    %65 = arith.divf %63, %64 : vector<16x128xf32>
    %66 = vector.extract_strided_slice %54 {offsets = [0, 128], sizes = [16, 128], strides = [1, 1]} : vector<16x384xf32> to vector<16x128xf32>
    %67 = vector.extract_strided_slice %57 {offsets = [0, 128], sizes = [16, 128], strides = [1, 1]} : vector<16x384xf32> to vector<16x128xf32>
    %68 = arith.addf %66, %67 : vector<16x128xf32>
    %69 = arith.negf %68 : vector<16x128xf32>
    %70 = math.exp %69 : vector<16x128xf32>
    %cst_27 = arith.constant 1.000000e+00 : f32
    %71 = vector.broadcast %cst_27 : f32 to vector<16x128xf32>
    %72 = arith.addf %71, %70 : vector<16x128xf32>
    %73 = arith.divf %71, %72 : vector<16x128xf32>
    %74 = vector.extract_strided_slice %54 {offsets = [0, 256], sizes = [16, 128], strides = [1, 1]} : vector<16x384xf32> to vector<16x128xf32>
    %75 = vector.extract_strided_slice %57 {offsets = [0, 256], sizes = [16, 128], strides = [1, 1]} : vector<16x384xf32> to vector<16x128xf32>
    %76 = arith.mulf %65, %75 : vector<16x128xf32>
    %77 = arith.addf %74, %76 : vector<16x128xf32>
    %78 = math.tanh %77 : vector<16x128xf32>
    %cst_28 = arith.constant 1.000000e+00 : f32
    %79 = vector.broadcast %cst_28 : f32 to vector<16x128xf32>
    %80 = arith.subf %79, %73 : vector<16x128xf32>
    %81 = arith.mulf %80, %78 : vector<16x128xf32>
    %82 = arith.mulf %73, %45 : vector<16x128xf32>
    %83 = arith.addf %81, %82 : vector<16x128xf32>
    %84 = arith.truncf %83 : vector<16x128xf32> to vector<16x128xbf16>
    %c0_i32_29 = arith.constant 0 : i32
    %85 = arith.addi %c0_i32_29, %c1_i32 : i32
    %86 = arith.index_cast %85 : i32 to index
    %c0_30 = arith.constant 0 : index
    %c0_31 = arith.constant 0 : index
    %87 = vector.load %arg14[%86, %c0_30, %c0_31] : memref<8x16x128xbf16, #tpu.memory_space<vmem>>, vector<1x16x128xbf16>
    %88 = vector.shape_cast %87 : vector<1x16x128xbf16> to vector<16x128xbf16>
    %89 = vector.shape_cast %84 : vector<16x128xbf16> to vector<1x16x128xbf16>
    tpu.vector_store %arg14[%86, %c0_30, %c0_31], %89 {strides = array<i32>} : memref<8x16x128xbf16, #tpu.memory_space<vmem>>, vector<1x16x128xbf16>,
    %c2_i32 = arith.constant 2 : i32
    %90 = arith.index_cast %c2_i32 : i32 to index
    %c0_32 = arith.constant 0 : index
    %c0_33 = arith.constant 0 : index
    %91 = vector.load %arg13[%90, %c0_32, %c0_33] : memref<8x16x384xf32, #tpu.memory_space<vmem>>, vector<1x16x384xf32>
    %92 = vector.shape_cast %91 : vector<1x16x384xf32> to vector<16x384xf32>
    %93 = arith.truncf %83 : vector<16x128xf32> to vector<16x128xbf16>
    %cst_34 = arith.constant dense<0.000000e+00> : vector<16x384xf32>
    %94 = tpu.matmul %93, %1, %cst_34 {dimension_numbers = #tpu.dot_dimension_numbers<[1], [0], [0], [1], [0, 0, 1, 1], [], []>} : vector<16x128xbf16>, vector<128x384xbf16>, vector<16x384xf32> -> vector<16x384xf32>
    %95 = arith.addf %94, %5 : vector<16x384xf32>
    %96 = vector.extract_strided_slice %92 {offsets = [0, 0], sizes = [16, 128], strides = [1, 1]} : vector<16x384xf32> to vector<16x128xf32>
    %97 = vector.extract_strided_slice %95 {offsets = [0, 0], sizes = [16, 128], strides = [1, 1]} : vector<16x384xf32> to vector<16x128xf32>
    %98 = arith.addf %96, %97 : vector<16x128xf32>
    %99 = arith.negf %98 : vector<16x128xf32>
    %100 = math.exp %99 : vector<16x128xf32>
    %cst_35 = arith.constant 1.000000e+00 : f32
    %101 = vector.broadcast %cst_35 : f32 to vector<16x128xf32>
    %102 = arith.addf %101, %100 : vector<16x128xf32>
    %103 = arith.divf %101, %102 : vector<16x128xf32>
    %104 = vector.extract_strided_slice %92 {offsets = [0, 128], sizes = [16, 128], strides = [1, 1]} : vector<16x384xf32> to vector<16x128xf32>
    %105 = vector.extract_strided_slice %95 {offsets = [0, 128], sizes = [16, 128], strides = [1, 1]} : vector<16x384xf32> to vector<16x128xf32>
    %106 = arith.addf %104, %105 : vector<16x128xf32>
    %107 = arith.negf %106 : vector<16x128xf32>
    %108 = math.exp %107 : vector<16x128xf32>
    %cst_36 = arith.constant 1.000000e+00 : f32
    %109 = vector.broadcast %cst_36 : f32 to vector<16x128xf32>
    %110 = arith.addf %109, %108 : vector<16x128xf32>
    %111 = arith.divf %109, %110 : vector<16x128xf32>
    %112 = vector.extract_strided_slice %92 {offsets = [0, 256], sizes = [16, 128], strides = [1, 1]} : vector<16x384xf32> to vector<16x128xf32>
    %113 = vector.extract_strided_slice %95 {offsets = [0, 256], sizes = [16, 128], strides = [1, 1]} : vector<16x384xf32> to vector<16x128xf32>
    %114 = arith.mulf %103, %113 : vector<16x128xf32>
    %115 = arith.addf %112, %114 : vector<16x128xf32>
    %116 = math.tanh %115 : vector<16x128xf32>
    %cst_37 = arith.constant 1.000000e+00 : f32
    %117 = vector.broadcast %cst_37 : f32 to vector<16x128xf32>
    %118 = arith.subf %117, %111 : vector<16x128xf32>
    %119 = arith.mulf %118, %116 : vector<16x128xf32>
    %120 = arith.mulf %111, %83 : vector<16x128xf32>
    %121 = arith.addf %119, %120 : vector<16x128xf32>
    %122 = arith.truncf %121 : vector<16x128xf32> to vector<16x128xbf16>
    %c0_i32_38 = arith.constant 0 : i32
    %123 = arith.addi %c0_i32_38, %c2_i32 : i32
    %124 = arith.index_cast %123 : i32 to index
    %c0_39 = arith.constant 0 : index
    %c0_40 = arith.constant 0 : index
    %125 = vector.load %arg14[%124, %c0_39, %c0_40] : memref<8x16x128xbf16, #tpu.memory_space<vmem>>, vector<1x16x128xbf16>
    %126 = vector.shape_cast %125 : vector<1x16x128xbf16> to vector<16x128xbf16>
    %127 = vector.shape_cast %122 : vector<16x128xbf16> to vector<1x16x128xbf16>
    tpu.vector_store %arg14[%124, %c0_39, %c0_40], %127 {strides = array<i32>} : memref<8x16x128xbf16, #tpu.memory_space<vmem>>, vector<1x16x128xbf16>,
    %c3_i32 = arith.constant 3 : i32
    %128 = arith.index_cast %c3_i32 : i32 to index
    %c0_41 = arith.constant 0 : index
    %c0_42 = arith.constant 0 : index
    %129 = vector.load %arg13[%128, %c0_41, %c0_42] : memref<8x16x384xf32, #tpu.memory_space<vmem>>, vector<1x16x384xf32>
    %130 = vector.shape_cast %129 : vector<1x16x384xf32> to vector<16x384xf32>
    %131 = arith.truncf %121 : vector<16x128xf32> to vector<16x128xbf16>
    %cst_43 = arith.constant dense<0.000000e+00> : vector<16x384xf32>
    %132 = tpu.matmul %131, %1, %cst_43 {dimension_numbers = #tpu.dot_dimension_numbers<[1], [0], [0], [1], [0, 0, 1, 1], [], []>} : vector<16x128xbf16>, vector<128x384xbf16>, vector<16x384xf32> -> vector<16x384xf32>
    %133 = arith.addf %132, %5 : vector<16x384xf32>
    %134 = vector.extract_strided_slice %130 {offsets = [0, 0], sizes = [16, 128], strides = [1, 1]} : vector<16x384xf32> to vector<16x128xf32>
    %135 = vector.extract_strided_slice %133 {offsets = [0, 0], sizes = [16, 128], strides = [1, 1]} : vector<16x384xf32> to vector<16x128xf32>
    %136 = arith.addf %134, %135 : vector<16x128xf32>
    %137 = arith.negf %136 : vector<16x128xf32>
    %138 = math.exp %137 : vector<16x128xf32>
    %cst_44 = arith.constant 1.000000e+00 : f32
    %139 = vector.broadcast %cst_44 : f32 to vector<16x128xf32>
    %140 = arith.addf %139, %138 : vector<16x128xf32>
    %141 = arith.divf %139, %140 : vector<16x128xf32>
    %142 = vector.extract_strided_slice %130 {offsets = [0, 128], sizes = [16, 128], strides = [1, 1]} : vector<16x384xf32> to vector<16x128xf32>
    %143 = vector.extract_strided_slice %133 {offsets = [0, 128], sizes = [16, 128], strides = [1, 1]} : vector<16x384xf32> to vector<16x128xf32>
    %144 = arith.addf %142, %143 : vector<16x128xf32>
    %145 = arith.negf %144 : vector<16x128xf32>
    %146 = math.exp %145 : vector<16x128xf32>
    %cst_45 = arith.constant 1.000000e+00 : f32
    %147 = vector.broadcast %cst_45 : f32 to vector<16x128xf32>
    %148 = arith.addf %147, %146 : vector<16x128xf32>
    %149 = arith.divf %147, %148 : vector<16x128xf32>
    %150 = vector.extract_strided_slice %130 {offsets = [0, 256], sizes = [16, 128], strides = [1, 1]} : vector<16x384xf32> to vector<16x128xf32>
    %151 = vector.extract_strided_slice %133 {offsets = [0, 256], sizes = [16, 128], strides = [1, 1]} : vector<16x384xf32> to vector<16x128xf32>
    %152 = arith.mulf %141, %151 : vector<16x128xf32>
    %153 = arith.addf %150, %152 : vector<16x128xf32>
    %154 = math.tanh %153 : vector<16x128xf32>
    %cst_46 = arith.constant 1.000000e+00 : f32
    %155 = vector.broadcast %cst_46 : f32 to vector<16x128xf32>
    %156 = arith.subf %155, %149 : vector<16x128xf32>
    %157 = arith.mulf %156, %154 : vector<16x128xf32>
    %158 = arith.mulf %149, %121 : vector<16x128xf32>
    %159 = arith.addf %157, %158 : vector<16x128xf32>
    %160 = arith.truncf %159 : vector<16x128xf32> to vector<16x128xbf16>
    %c0_i32_47 = arith.constant 0 : i32
    %161 = arith.addi %c0_i32_47, %c3_i32 : i32
    %162 = arith.index_cast %161 : i32 to index
    %c0_48 = arith.constant 0 : index
    %c0_49 = arith.constant 0 : index
    %163 = vector.load %arg14[%162, %c0_48, %c0_49] : memref<8x16x128xbf16, #tpu.memory_space<vmem>>, vector<1x16x128xbf16>
    %164 = vector.shape_cast %163 : vector<1x16x128xbf16> to vector<16x128xbf16>
    %165 = vector.shape_cast %160 : vector<16x128xbf16> to vector<1x16x128xbf16>
    tpu.vector_store %arg14[%162, %c0_48, %c0_49], %165 {strides = array<i32>} : memref<8x16x128xbf16, #tpu.memory_space<vmem>>, vector<1x16x128xbf16>,
    %c4_i32 = arith.constant 4 : i32
    %166 = arith.index_cast %c4_i32 : i32 to index
    %c0_50 = arith.constant 0 : index
    %c0_51 = arith.constant 0 : index
    %167 = vector.load %arg13[%166, %c0_50, %c0_51] : memref<8x16x384xf32, #tpu.memory_space<vmem>>, vector<1x16x384xf32>
    %168 = vector.shape_cast %167 : vector<1x16x384xf32> to vector<16x384xf32>
    %169 = arith.truncf %159 : vector<16x128xf32> to vector<16x128xbf16>
    %cst_52 = arith.constant dense<0.000000e+00> : vector<16x384xf32>
    %170 = tpu.matmul %169, %1, %cst_52 {dimension_numbers = #tpu.dot_dimension_numbers<[1], [0], [0], [1], [0, 0, 1, 1], [], []>} : vector<16x128xbf16>, vector<128x384xbf16>, vector<16x384xf32> -> vector<16x384xf32>
    %171 = arith.addf %170, %5 : vector<16x384xf32>
    %172 = vector.extract_strided_slice %168 {offsets = [0, 0], sizes = [16, 128], strides = [1, 1]} : vector<16x384xf32> to vector<16x128xf32>
    %173 = vector.extract_strided_slice %171 {offsets = [0, 0], sizes = [16, 128], strides = [1, 1]} : vector<16x384xf32> to vector<16x128xf32>
    %174 = arith.addf %172, %173 : vector<16x128xf32>
    %175 = arith.negf %174 : vector<16x128xf32>
    %176 = math.exp %175 : vector<16x128xf32>
    %cst_53 = arith.constant 1.000000e+00 : f32
    %177 = vector.broadcast %cst_53 : f32 to vector<16x128xf32>
    %178 = arith.addf %177, %176 : vector<16x128xf32>
    %179 = arith.divf %177, %178 : vector<16x128xf32>
    %180 = vector.extract_strided_slice %168 {offsets = [0, 128], sizes = [16, 128], strides = [1, 1]} : vector<16x384xf32> to vector<16x128xf32>
    %181 = vector.extract_strided_slice %171 {offsets = [0, 128], sizes = [16, 128], strides = [1, 1]} : vector<16x384xf32> to vector<16x128xf32>
    %182 = arith.addf %180, %181 : vector<16x128xf32>
    %183 = arith.negf %182 : vector<16x128xf32>
    %184 = math.exp %183 : vector<16x128xf32>
    %cst_54 = arith.constant 1.000000e+00 : f32
    %185 = vector.broadcast %cst_54 : f32 to vector<16x128xf32>
    %186 = arith.addf %185, %184 : vector<16x128xf32>
    %187 = arith.divf %185, %186 : vector<16x128xf32>
    %188 = vector.extract_strided_slice %168 {offsets = [0, 256], sizes = [16, 128], strides = [1, 1]} : vector<16x384xf32> to vector<16x128xf32>
    %189 = vector.extract_strided_slice %171 {offsets = [0, 256], sizes = [16, 128], strides = [1, 1]} : vector<16x384xf32> to vector<16x128xf32>
    %190 = arith.mulf %179, %189 : vector<16x128xf32>
    %191 = arith.addf %188, %190 : vector<16x128xf32>
    %192 = math.tanh %191 : vector<16x128xf32>
    %cst_55 = arith.constant 1.000000e+00 : f32
    %193 = vector.broadcast %cst_55 : f32 to vector<16x128xf32>
    %194 = arith.subf %193, %187 : vector<16x128xf32>
    %195 = arith.mulf %194, %192 : vector<16x128xf32>
    %196 = arith.mulf %187, %159 : vector<16x128xf32>
    %197 = arith.addf %195, %196 : vector<16x128xf32>
    %198 = arith.truncf %197 : vector<16x128xf32> to vector<16x128xbf16>
    %c0_i32_56 = arith.constant 0 : i32
    %199 = arith.addi %c0_i32_56, %c4_i32 : i32
    %200 = arith.index_cast %199 : i32 to index
    %c0_57 = arith.constant 0 : index
    %c0_58 = arith.constant 0 : index
    %201 = vector.load %arg14[%200, %c0_57, %c0_58] : memref<8x16x128xbf16, #tpu.memory_space<vmem>>, vector<1x16x128xbf16>
    %202 = vector.shape_cast %201 : vector<1x16x128xbf16> to vector<16x128xbf16>
    %203 = vector.shape_cast %198 : vector<16x128xbf16> to vector<1x16x128xbf16>
    tpu.vector_store %arg14[%200, %c0_57, %c0_58], %203 {strides = array<i32>} : memref<8x16x128xbf16, #tpu.memory_space<vmem>>, vector<1x16x128xbf16>,
    %c5_i32 = arith.constant 5 : i32
    %204 = arith.index_cast %c5_i32 : i32 to index
    %c0_59 = arith.constant 0 : index
    %c0_60 = arith.constant 0 : index
    %205 = vector.load %arg13[%204, %c0_59, %c0_60] : memref<8x16x384xf32, #tpu.memory_space<vmem>>, vector<1x16x384xf32>
    %206 = vector.shape_cast %205 : vector<1x16x384xf32> to vector<16x384xf32>
    %207 = arith.truncf %197 : vector<16x128xf32> to vector<16x128xbf16>
    %cst_61 = arith.constant dense<0.000000e+00> : vector<16x384xf32>
    %208 = tpu.matmul %207, %1, %cst_61 {dimension_numbers = #tpu.dot_dimension_numbers<[1], [0], [0], [1], [0, 0, 1, 1], [], []>} : vector<16x128xbf16>, vector<128x384xbf16>, vector<16x384xf32> -> vector<16x384xf32>
    %209 = arith.addf %208, %5 : vector<16x384xf32>
    %210 = vector.extract_strided_slice %206 {offsets = [0, 0], sizes = [16, 128], strides = [1, 1]} : vector<16x384xf32> to vector<16x128xf32>
    %211 = vector.extract_strided_slice %209 {offsets = [0, 0], sizes = [16, 128], strides = [1, 1]} : vector<16x384xf32> to vector<16x128xf32>
    %212 = arith.addf %210, %211 : vector<16x128xf32>
    %213 = arith.negf %212 : vector<16x128xf32>
    %214 = math.exp %213 : vector<16x128xf32>
    %cst_62 = arith.constant 1.000000e+00 : f32
    %215 = vector.broadcast %cst_62 : f32 to vector<16x128xf32>
    %216 = arith.addf %215, %214 : vector<16x128xf32>
    %217 = arith.divf %215, %216 : vector<16x128xf32>
    %218 = vector.extract_strided_slice %206 {offsets = [0, 128], sizes = [16, 128], strides = [1, 1]} : vector<16x384xf32> to vector<16x128xf32>
    %219 = vector.extract_strided_slice %209 {offsets = [0, 128], sizes = [16, 128], strides = [1, 1]} : vector<16x384xf32> to vector<16x128xf32>
    %220 = arith.addf %218, %219 : vector<16x128xf32>
    %221 = arith.negf %220 : vector<16x128xf32>
    %222 = math.exp %221 : vector<16x128xf32>
    %cst_63 = arith.constant 1.000000e+00 : f32
    %223 = vector.broadcast %cst_63 : f32 to vector<16x128xf32>
    %224 = arith.addf %223, %222 : vector<16x128xf32>
    %225 = arith.divf %223, %224 : vector<16x128xf32>
    %226 = vector.extract_strided_slice %206 {offsets = [0, 256], sizes = [16, 128], strides = [1, 1]} : vector<16x384xf32> to vector<16x128xf32>
    %227 = vector.extract_strided_slice %209 {offsets = [0, 256], sizes = [16, 128], strides = [1, 1]} : vector<16x384xf32> to vector<16x128xf32>
    %228 = arith.mulf %217, %227 : vector<16x128xf32>
    %229 = arith.addf %226, %228 : vector<16x128xf32>
    %230 = math.tanh %229 : vector<16x128xf32>
    %cst_64 = arith.constant 1.000000e+00 : f32
    %231 = vector.broadcast %cst_64 : f32 to vector<16x128xf32>
    %232 = arith.subf %231, %225 : vector<16x128xf32>
    %233 = arith.mulf %232, %230 : vector<16x128xf32>
    %234 = arith.mulf %225, %197 : vector<16x128xf32>
    %235 = arith.addf %233, %234 : vector<16x128xf32>
    %236 = arith.truncf %235 : vector<16x128xf32> to vector<16x128xbf16>
    %c0_i32_65 = arith.constant 0 : i32
    %237 = arith.addi %c0_i32_65, %c5_i32 : i32
    %238 = arith.index_cast %237 : i32 to index
    %c0_66 = arith.constant 0 : index
    %c0_67 = arith.constant 0 : index
    %239 = vector.load %arg14[%238, %c0_66, %c0_67] : memref<8x16x128xbf16, #tpu.memory_space<vmem>>, vector<1x16x128xbf16>
    %240 = vector.shape_cast %239 : vector<1x16x128xbf16> to vector<16x128xbf16>
    %241 = vector.shape_cast %236 : vector<16x128xbf16> to vector<1x16x128xbf16>
    tpu.vector_store %arg14[%238, %c0_66, %c0_67], %241 {strides = array<i32>} : memref<8x16x128xbf16, #tpu.memory_space<vmem>>, vector<1x16x128xbf16>,
    %c6_i32 = arith.constant 6 : i32
    %242 = arith.index_cast %c6_i32 : i32 to index
    %c0_68 = arith.constant 0 : index
    %c0_69 = arith.constant 0 : index
    %243 = vector.load %arg13[%242, %c0_68, %c0_69] : memref<8x16x384xf32, #tpu.memory_space<vmem>>, vector<1x16x384xf32>
    %244 = vector.shape_cast %243 : vector<1x16x384xf32> to vector<16x384xf32>
    %245 = arith.truncf %235 : vector<16x128xf32> to vector<16x128xbf16>
    %cst_70 = arith.constant dense<0.000000e+00> : vector<16x384xf32>
    %246 = tpu.matmul %245, %1, %cst_70 {dimension_numbers = #tpu.dot_dimension_numbers<[1], [0], [0], [1], [0, 0, 1, 1], [], []>} : vector<16x128xbf16>, vector<128x384xbf16>, vector<16x384xf32> -> vector<16x384xf32>
    %247 = arith.addf %246, %5 : vector<16x384xf32>
    %248 = vector.extract_strided_slice %244 {offsets = [0, 0], sizes = [16, 128], strides = [1, 1]} : vector<16x384xf32> to vector<16x128xf32>
    %249 = vector.extract_strided_slice %247 {offsets = [0, 0], sizes = [16, 128], strides = [1, 1]} : vector<16x384xf32> to vector<16x128xf32>
    %250 = arith.addf %248, %249 : vector<16x128xf32>
    %251 = arith.negf %250 : vector<16x128xf32>
    %252 = math.exp %251 : vector<16x128xf32>
    %cst_71 = arith.constant 1.000000e+00 : f32
    %253 = vector.broadcast %cst_71 : f32 to vector<16x128xf32>
    %254 = arith.addf %253, %252 : vector<16x128xf32>
    %255 = arith.divf %253, %254 : vector<16x128xf32>
    %256 = vector.extract_strided_slice %244 {offsets = [0, 128], sizes = [16, 128], strides = [1, 1]} : vector<16x384xf32> to vector<16x128xf32>
    %257 = vector.extract_strided_slice %247 {offsets = [0, 128], sizes = [16, 128], strides = [1, 1]} : vector<16x384xf32> to vector<16x128xf32>
    %258 = arith.addf %256, %257 : vector<16x128xf32>
    %259 = arith.negf %258 : vector<16x128xf32>
    %260 = math.exp %259 : vector<16x128xf32>
    %cst_72 = arith.constant 1.000000e+00 : f32
    %261 = vector.broadcast %cst_72 : f32 to vector<16x128xf32>
    %262 = arith.addf %261, %260 : vector<16x128xf32>
    %263 = arith.divf %261, %262 : vector<16x128xf32>
    %264 = vector.extract_strided_slice %244 {offsets = [0, 256], sizes = [16, 128], strides = [1, 1]} : vector<16x384xf32> to vector<16x128xf32>
    %265 = vector.extract_strided_slice %247 {offsets = [0, 256], sizes = [16, 128], strides = [1, 1]} : vector<16x384xf32> to vector<16x128xf32>
    %266 = arith.mulf %255, %265 : vector<16x128xf32>
    %267 = arith.addf %264, %266 : vector<16x128xf32>
    %268 = math.tanh %267 : vector<16x128xf32>
    %cst_73 = arith.constant 1.000000e+00 : f32
    %269 = vector.broadcast %cst_73 : f32 to vector<16x128xf32>
    %270 = arith.subf %269, %263 : vector<16x128xf32>
    %271 = arith.mulf %270, %268 : vector<16x128xf32>
    %272 = arith.mulf %263, %235 : vector<16x128xf32>
    %273 = arith.addf %271, %272 : vector<16x128xf32>
    %274 = arith.truncf %273 : vector<16x128xf32> to vector<16x128xbf16>
    %c0_i32_74 = arith.constant 0 : i32
    %275 = arith.addi %c0_i32_74, %c6_i32 : i32
    %276 = arith.index_cast %275 : i32 to index
    %c0_75 = arith.constant 0 : index
    %c0_76 = arith.constant 0 : index
    %277 = vector.load %arg14[%276, %c0_75, %c0_76] : memref<8x16x128xbf16, #tpu.memory_space<vmem>>, vector<1x16x128xbf16>
    %278 = vector.shape_cast %277 : vector<1x16x128xbf16> to vector<16x128xbf16>
    %279 = vector.shape_cast %274 : vector<16x128xbf16> to vector<1x16x128xbf16>
    tpu.vector_store %arg14[%276, %c0_75, %c0_76], %279 {strides = array<i32>} : memref<8x16x128xbf16, #tpu.memory_space<vmem>>, vector<1x16x128xbf16>,
    %c7_i32 = arith.constant 7 : i32
    %280 = arith.index_cast %c7_i32 : i32 to index
    %c0_77 = arith.constant 0 : index
    %c0_78 = arith.constant 0 : index
    %281 = vector.load %arg13[%280, %c0_77, %c0_78] : memref<8x16x384xf32, #tpu.memory_space<vmem>>, vector<1x16x384xf32>
    %282 = vector.shape_cast %281 : vector<1x16x384xf32> to vector<16x384xf32>
    %283 = arith.truncf %273 : vector<16x128xf32> to vector<16x128xbf16>
    %cst_79 = arith.constant dense<0.000000e+00> : vector<16x384xf32>
    %284 = tpu.matmul %283, %1, %cst_79 {dimension_numbers = #tpu.dot_dimension_numbers<[1], [0], [0], [1], [0, 0, 1, 1], [], []>} : vector<16x128xbf16>, vector<128x384xbf16>, vector<16x384xf32> -> vector<16x384xf32>
    %285 = arith.addf %284, %5 : vector<16x384xf32>
    %286 = vector.extract_strided_slice %282 {offsets = [0, 0], sizes = [16, 128], strides = [1, 1]} : vector<16x384xf32> to vector<16x128xf32>
    %287 = vector.extract_strided_slice %285 {offsets = [0, 0], sizes = [16, 128], strides = [1, 1]} : vector<16x384xf32> to vector<16x128xf32>
    %288 = arith.addf %286, %287 : vector<16x128xf32>
    %289 = arith.negf %288 : vector<16x128xf32>
    %290 = math.exp %289 : vector<16x128xf32>
    %cst_80 = arith.constant 1.000000e+00 : f32
    %291 = vector.broadcast %cst_80 : f32 to vector<16x128xf32>
    %292 = arith.addf %291, %290 : vector<16x128xf32>
    %293 = arith.divf %291, %292 : vector<16x128xf32>
    %294 = vector.extract_strided_slice %282 {offsets = [0, 128], sizes = [16, 128], strides = [1, 1]} : vector<16x384xf32> to vector<16x128xf32>
    %295 = vector.extract_strided_slice %285 {offsets = [0, 128], sizes = [16, 128], strides = [1, 1]} : vector<16x384xf32> to vector<16x128xf32>
    %296 = arith.addf %294, %295 : vector<16x128xf32>
    %297 = arith.negf %296 : vector<16x128xf32>
    %298 = math.exp %297 : vector<16x128xf32>
    %cst_81 = arith.constant 1.000000e+00 : f32
    %299 = vector.broadcast %cst_81 : f32 to vector<16x128xf32>
    %300 = arith.addf %299, %298 : vector<16x128xf32>
    %301 = arith.divf %299, %300 : vector<16x128xf32>
    %302 = vector.extract_strided_slice %282 {offsets = [0, 256], sizes = [16, 128], strides = [1, 1]} : vector<16x384xf32> to vector<16x128xf32>
    %303 = vector.extract_strided_slice %285 {offsets = [0, 256], sizes = [16, 128], strides = [1, 1]} : vector<16x384xf32> to vector<16x128xf32>
    %304 = arith.mulf %293, %303 : vector<16x128xf32>
    %305 = arith.addf %302, %304 : vector<16x128xf32>
    %306 = math.tanh %305 : vector<16x128xf32>
    %cst_82 = arith.constant 1.000000e+00 : f32
    %307 = vector.broadcast %cst_82 : f32 to vector<16x128xf32>
    %308 = arith.subf %307, %301 : vector<16x128xf32>
    %309 = arith.mulf %308, %306 : vector<16x128xf32>
    %310 = arith.mulf %301, %273 : vector<16x128xf32>
    %311 = arith.addf %309, %310 : vector<16x128xf32>
    %312 = arith.truncf %311 : vector<16x128xf32> to vector<16x128xbf16>
    %c0_i32_83 = arith.constant 0 : i32
    %313 = arith.addi %c0_i32_83, %c7_i32 : i32
    %314 = arith.index_cast %313 : i32 to index
    %c0_84 = arith.constant 0 : index
    %c0_85 = arith.constant 0 : index
    %315 = vector.load %arg14[%314, %c0_84, %c0_85] : memref<8x16x128xbf16, #tpu.memory_space<vmem>>, vector<1x16x128xbf16>
    %316 = vector.shape_cast %315 : vector<1x16x128xbf16> to vector<16x128xbf16>
    %317 = vector.shape_cast %312 : vector<16x128xbf16> to vector<1x16x128xbf16>
    tpu.vector_store %arg14[%314, %c0_84, %c0_85], %317 {strides = array<i32>} : memref<8x16x128xbf16, #tpu.memory_space<vmem>>, vector<1x16x128xbf16>,
    %c8_i32 = arith.constant 8 : i32
    %c0_86 = arith.constant 0 : index
    %c0_87 = arith.constant 0 : index
    %318 = vector.load %arg6[%c0_86, %c0_87] : memref<128x384xbf16, #tpu.memory_space<vmem>>, vector<128x384xbf16>
    %c0_88 = arith.constant 0 : index
    %c0_89 = arith.constant 0 : index
    %319 = vector.load %arg7[%c0_88, %c0_89] : memref<128x384xbf16, #tpu.memory_space<vmem>>, vector<128x384xbf16>
    %c0_90 = arith.constant 0 : index
    %c0_91 = arith.constant 0 : index
    %320 = vector.load %arg8[%c0_90, %c0_91] : memref<1x384xf32, #tpu.memory_space<vmem>>, vector<1x384xf32>
    %c0_92 = arith.constant 0 : index
    %c0_93 = arith.constant 0 : index
    %321 = vector.load %arg9[%c0_92, %c0_93] : memref<1x384xf32, #tpu.memory_space<vmem>>, vector<1x384xf32>
    %322 = vector.shape_cast %321 : vector<1x384xf32> to vector<1x384xf32>
    %323 = vector.broadcast %322 : vector<1x384xf32> to vector<16x384xf32>
    %cst_94 = arith.constant 0.000000e+00 : f32
    %324 = vector.broadcast %cst_94 : f32 to vector<16x128xf32>
    %c0_95 = arith.constant 0 : index
    %c0_96 = arith.constant 0 : index
    %c0_97 = arith.constant 0 : index
    %325 = vector.load %arg14[%c0_95, %c0_96, %c0_97] : memref<8x16x128xbf16, #tpu.memory_space<vmem>>, vector<8x16x128xbf16>
    %326 = vector.shape_cast %325 : vector<8x16x128xbf16> to vector<128x128xbf16>
    %cst_98 = arith.constant dense<0.000000e+00> : vector<128x384xf32>
    %327 = tpu.matmul %326, %318, %cst_98 {dimension_numbers = #tpu.dot_dimension_numbers<[1], [0], [0], [1], [0, 0, 1, 1], [], []>} : vector<128x128xbf16>, vector<128x384xbf16>, vector<128x384xf32> -> vector<128x384xf32>
    %328 = vector.broadcast %320 : vector<1x384xf32> to vector<128x384xf32>
    %329 = arith.addf %327, %328 : vector<128x384xf32>
    %330 = vector.shape_cast %329 : vector<128x384xf32> to vector<8x16x384xf32>
    %c0_99 = arith.constant 0 : index
    %c0_100 = arith.constant 0 : index
    %c0_101 = arith.constant 0 : index
    %331 = vector.load %arg13[%c0_99, %c0_100, %c0_101] : memref<8x16x384xf32, #tpu.memory_space<vmem>>, vector<8x16x384xf32>
    tpu.vector_store %arg13[%c0_99, %c0_100, %c0_101], %330 {strides = array<i32>} : memref<8x16x384xf32, #tpu.memory_space<vmem>>, vector<8x16x384xf32>,
    %c0_i32_102 = arith.constant 0 : i32
    %332 = arith.index_cast %c0_i32_102 : i32 to index
    %c0_103 = arith.constant 0 : index
    %c0_104 = arith.constant 0 : index
    %333 = vector.load %arg13[%332, %c0_103, %c0_104] : memref<8x16x384xf32, #tpu.memory_space<vmem>>, vector<1x16x384xf32>
    %334 = vector.shape_cast %333 : vector<1x16x384xf32> to vector<16x384xf32>
    %335 = arith.truncf %324 : vector<16x128xf32> to vector<16x128xbf16>
    %cst_105 = arith.constant dense<0.000000e+00> : vector<16x384xf32>
    %336 = tpu.matmul %335, %319, %cst_105 {dimension_numbers = #tpu.dot_dimension_numbers<[1], [0], [0], [1], [0, 0, 1, 1], [], []>} : vector<16x128xbf16>, vector<128x384xbf16>, vector<16x384xf32> -> vector<16x384xf32>
    %337 = arith.addf %336, %323 : vector<16x384xf32>
    %338 = vector.extract_strided_slice %334 {offsets = [0, 0], sizes = [16, 128], strides = [1, 1]} : vector<16x384xf32> to vector<16x128xf32>
    %339 = vector.extract_strided_slice %337 {offsets = [0, 0], sizes = [16, 128], strides = [1, 1]} : vector<16x384xf32> to vector<16x128xf32>
    %340 = arith.addf %338, %339 : vector<16x128xf32>
    %341 = arith.negf %340 : vector<16x128xf32>
    %342 = math.exp %341 : vector<16x128xf32>
    %cst_106 = arith.constant 1.000000e+00 : f32
    %343 = vector.broadcast %cst_106 : f32 to vector<16x128xf32>
    %344 = arith.addf %343, %342 : vector<16x128xf32>
    %345 = arith.divf %343, %344 : vector<16x128xf32>
    %346 = vector.extract_strided_slice %334 {offsets = [0, 128], sizes = [16, 128], strides = [1, 1]} : vector<16x384xf32> to vector<16x128xf32>
    %347 = vector.extract_strided_slice %337 {offsets = [0, 128], sizes = [16, 128], strides = [1, 1]} : vector<16x384xf32> to vector<16x128xf32>
    %348 = arith.addf %346, %347 : vector<16x128xf32>
    %349 = arith.negf %348 : vector<16x128xf32>
    %350 = math.exp %349 : vector<16x128xf32>
    %cst_107 = arith.constant 1.000000e+00 : f32
    %351 = vector.broadcast %cst_107 : f32 to vector<16x128xf32>
    %352 = arith.addf %351, %350 : vector<16x128xf32>
    %353 = arith.divf %351, %352 : vector<16x128xf32>
    %354 = vector.extract_strided_slice %334 {offsets = [0, 256], sizes = [16, 128], strides = [1, 1]} : vector<16x384xf32> to vector<16x128xf32>
    %355 = vector.extract_strided_slice %337 {offsets = [0, 256], sizes = [16, 128], strides = [1, 1]} : vector<16x384xf32> to vector<16x128xf32>
    %356 = arith.mulf %345, %355 : vector<16x128xf32>
    %357 = arith.addf %354, %356 : vector<16x128xf32>
    %358 = math.tanh %357 : vector<16x128xf32>
    %cst_108 = arith.constant 1.000000e+00 : f32
    %359 = vector.broadcast %cst_108 : f32 to vector<16x128xf32>
    %360 = arith.subf %359, %353 : vector<16x128xf32>
    %361 = arith.mulf %360, %358 : vector<16x128xf32>
    %362 = arith.mulf %353, %324 : vector<16x128xf32>
    %363 = arith.addf %361, %362 : vector<16x128xf32>
    %c1_i32_109 = arith.constant 1 : i32
    %364 = arith.index_cast %c1_i32_109 : i32 to index
    %c0_110 = arith.constant 0 : index
    %c0_111 = arith.constant 0 : index
    %365 = vector.load %arg13[%364, %c0_110, %c0_111] : memref<8x16x384xf32, #tpu.memory_space<vmem>>, vector<1x16x384xf32>
    %366 = vector.shape_cast %365 : vector<1x16x384xf32> to vector<16x384xf32>
    %367 = arith.truncf %363 : vector<16x128xf32> to vector<16x128xbf16>
    %cst_112 = arith.constant dense<0.000000e+00> : vector<16x384xf32>
    %368 = tpu.matmul %367, %319, %cst_112 {dimension_numbers = #tpu.dot_dimension_numbers<[1], [0], [0], [1], [0, 0, 1, 1], [], []>} : vector<16x128xbf16>, vector<128x384xbf16>, vector<16x384xf32> -> vector<16x384xf32>
    %369 = arith.addf %368, %323 : vector<16x384xf32>
    %370 = vector.extract_strided_slice %366 {offsets = [0, 0], sizes = [16, 128], strides = [1, 1]} : vector<16x384xf32> to vector<16x128xf32>
    %371 = vector.extract_strided_slice %369 {offsets = [0, 0], sizes = [16, 128], strides = [1, 1]} : vector<16x384xf32> to vector<16x128xf32>
    %372 = arith.addf %370, %371 : vector<16x128xf32>
    %373 = arith.negf %372 : vector<16x128xf32>
    %374 = math.exp %373 : vector<16x128xf32>
    %cst_113 = arith.constant 1.000000e+00 : f32
    %375 = vector.broadcast %cst_113 : f32 to vector<16x128xf32>
    %376 = arith.addf %375, %374 : vector<16x128xf32>
    %377 = arith.divf %375, %376 : vector<16x128xf32>
    %378 = vector.extract_strided_slice %366 {offsets = [0, 128], sizes = [16, 128], strides = [1, 1]} : vector<16x384xf32> to vector<16x128xf32>
    %379 = vector.extract_strided_slice %369 {offsets = [0, 128], sizes = [16, 128], strides = [1, 1]} : vector<16x384xf32> to vector<16x128xf32>
    %380 = arith.addf %378, %379 : vector<16x128xf32>
    %381 = arith.negf %380 : vector<16x128xf32>
    %382 = math.exp %381 : vector<16x128xf32>
    %cst_114 = arith.constant 1.000000e+00 : f32
    %383 = vector.broadcast %cst_114 : f32 to vector<16x128xf32>
    %384 = arith.addf %383, %382 : vector<16x128xf32>
    %385 = arith.divf %383, %384 : vector<16x128xf32>
    %386 = vector.extract_strided_slice %366 {offsets = [0, 256], sizes = [16, 128], strides = [1, 1]} : vector<16x384xf32> to vector<16x128xf32>
    %387 = vector.extract_strided_slice %369 {offsets = [0, 256], sizes = [16, 128], strides = [1, 1]} : vector<16x384xf32> to vector<16x128xf32>
    %388 = arith.mulf %377, %387 : vector<16x128xf32>
    %389 = arith.addf %386, %388 : vector<16x128xf32>
    %390 = math.tanh %389 : vector<16x128xf32>
    %cst_115 = arith.constant 1.000000e+00 : f32
    %391 = vector.broadcast %cst_115 : f32 to vector<16x128xf32>
    %392 = arith.subf %391, %385 : vector<16x128xf32>
    %393 = arith.mulf %392, %390 : vector<16x128xf32>
    %394 = arith.mulf %385, %363 : vector<16x128xf32>
    %395 = arith.addf %393, %394 : vector<16x128xf32>
    %c2_i32_116 = arith.constant 2 : i32
    %396 = arith.index_cast %c2_i32_116 : i32 to index
    %c0_117 = arith.constant 0 : index
    %c0_118 = arith.constant 0 : index
    %397 = vector.load %arg13[%396, %c0_117, %c0_118] : memref<8x16x384xf32, #tpu.memory_space<vmem>>, vector<1x16x384xf32>
    %398 = vector.shape_cast %397 : vector<1x16x384xf32> to vector<16x384xf32>
    %399 = arith.truncf %395 : vector<16x128xf32> to vector<16x128xbf16>
    %cst_119 = arith.constant dense<0.000000e+00> : vector<16x384xf32>
    %400 = tpu.matmul %399, %319, %cst_119 {dimension_numbers = #tpu.dot_dimension_numbers<[1], [0], [0], [1], [0, 0, 1, 1], [], []>} : vector<16x128xbf16>, vector<128x384xbf16>, vector<16x384xf32> -> vector<16x384xf32>
    %401 = arith.addf %400, %323 : vector<16x384xf32>
    %402 = vector.extract_strided_slice %398 {offsets = [0, 0], sizes = [16, 128], strides = [1, 1]} : vector<16x384xf32> to vector<16x128xf32>
    %403 = vector.extract_strided_slice %401 {offsets = [0, 0], sizes = [16, 128], strides = [1, 1]} : vector<16x384xf32> to vector<16x128xf32>
    %404 = arith.addf %402, %403 : vector<16x128xf32>
    %405 = arith.negf %404 : vector<16x128xf32>
    %406 = math.exp %405 : vector<16x128xf32>
    %cst_120 = arith.constant 1.000000e+00 : f32
    %407 = vector.broadcast %cst_120 : f32 to vector<16x128xf32>
    %408 = arith.addf %407, %406 : vector<16x128xf32>
    %409 = arith.divf %407, %408 : vector<16x128xf32>
    %410 = vector.extract_strided_slice %398 {offsets = [0, 128], sizes = [16, 128], strides = [1, 1]} : vector<16x384xf32> to vector<16x128xf32>
    %411 = vector.extract_strided_slice %401 {offsets = [0, 128], sizes = [16, 128], strides = [1, 1]} : vector<16x384xf32> to vector<16x128xf32>
    %412 = arith.addf %410, %411 : vector<16x128xf32>
    %413 = arith.negf %412 : vector<16x128xf32>
    %414 = math.exp %413 : vector<16x128xf32>
    %cst_121 = arith.constant 1.000000e+00 : f32
    %415 = vector.broadcast %cst_121 : f32 to vector<16x128xf32>
    %416 = arith.addf %415, %414 : vector<16x128xf32>
    %417 = arith.divf %415, %416 : vector<16x128xf32>
    %418 = vector.extract_strided_slice %398 {offsets = [0, 256], sizes = [16, 128], strides = [1, 1]} : vector<16x384xf32> to vector<16x128xf32>
    %419 = vector.extract_strided_slice %401 {offsets = [0, 256], sizes = [16, 128], strides = [1, 1]} : vector<16x384xf32> to vector<16x128xf32>
    %420 = arith.mulf %409, %419 : vector<16x128xf32>
    %421 = arith.addf %418, %420 : vector<16x128xf32>
    %422 = math.tanh %421 : vector<16x128xf32>
    %cst_122 = arith.constant 1.000000e+00 : f32
    %423 = vector.broadcast %cst_122 : f32 to vector<16x128xf32>
    %424 = arith.subf %423, %417 : vector<16x128xf32>
    %425 = arith.mulf %424, %422 : vector<16x128xf32>
    %426 = arith.mulf %417, %395 : vector<16x128xf32>
    %427 = arith.addf %425, %426 : vector<16x128xf32>
    %c3_i32_123 = arith.constant 3 : i32
    %428 = arith.index_cast %c3_i32_123 : i32 to index
    %c0_124 = arith.constant 0 : index
    %c0_125 = arith.constant 0 : index
    %429 = vector.load %arg13[%428, %c0_124, %c0_125] : memref<8x16x384xf32, #tpu.memory_space<vmem>>, vector<1x16x384xf32>
    %430 = vector.shape_cast %429 : vector<1x16x384xf32> to vector<16x384xf32>
    %431 = arith.truncf %427 : vector<16x128xf32> to vector<16x128xbf16>
    %cst_126 = arith.constant dense<0.000000e+00> : vector<16x384xf32>
    %432 = tpu.matmul %431, %319, %cst_126 {dimension_numbers = #tpu.dot_dimension_numbers<[1], [0], [0], [1], [0, 0, 1, 1], [], []>} : vector<16x128xbf16>, vector<128x384xbf16>, vector<16x384xf32> -> vector<16x384xf32>
    %433 = arith.addf %432, %323 : vector<16x384xf32>
    %434 = vector.extract_strided_slice %430 {offsets = [0, 0], sizes = [16, 128], strides = [1, 1]} : vector<16x384xf32> to vector<16x128xf32>
    %435 = vector.extract_strided_slice %433 {offsets = [0, 0], sizes = [16, 128], strides = [1, 1]} : vector<16x384xf32> to vector<16x128xf32>
    %436 = arith.addf %434, %435 : vector<16x128xf32>
    %437 = arith.negf %436 : vector<16x128xf32>
    %438 = math.exp %437 : vector<16x128xf32>
    %cst_127 = arith.constant 1.000000e+00 : f32
    %439 = vector.broadcast %cst_127 : f32 to vector<16x128xf32>
    %440 = arith.addf %439, %438 : vector<16x128xf32>
    %441 = arith.divf %439, %440 : vector<16x128xf32>
    %442 = vector.extract_strided_slice %430 {offsets = [0, 128], sizes = [16, 128], strides = [1, 1]} : vector<16x384xf32> to vector<16x128xf32>
    %443 = vector.extract_strided_slice %433 {offsets = [0, 128], sizes = [16, 128], strides = [1, 1]} : vector<16x384xf32> to vector<16x128xf32>
    %444 = arith.addf %442, %443 : vector<16x128xf32>
    %445 = arith.negf %444 : vector<16x128xf32>
    %446 = math.exp %445 : vector<16x128xf32>
    %cst_128 = arith.constant 1.000000e+00 : f32
    %447 = vector.broadcast %cst_128 : f32 to vector<16x128xf32>
    %448 = arith.addf %447, %446 : vector<16x128xf32>
    %449 = arith.divf %447, %448 : vector<16x128xf32>
    %450 = vector.extract_strided_slice %430 {offsets = [0, 256], sizes = [16, 128], strides = [1, 1]} : vector<16x384xf32> to vector<16x128xf32>
    %451 = vector.extract_strided_slice %433 {offsets = [0, 256], sizes = [16, 128], strides = [1, 1]} : vector<16x384xf32> to vector<16x128xf32>
    %452 = arith.mulf %441, %451 : vector<16x128xf32>
    %453 = arith.addf %450, %452 : vector<16x128xf32>
    %454 = math.tanh %453 : vector<16x128xf32>
    %cst_129 = arith.constant 1.000000e+00 : f32
    %455 = vector.broadcast %cst_129 : f32 to vector<16x128xf32>
    %456 = arith.subf %455, %449 : vector<16x128xf32>
    %457 = arith.mulf %456, %454 : vector<16x128xf32>
    %458 = arith.mulf %449, %427 : vector<16x128xf32>
    %459 = arith.addf %457, %458 : vector<16x128xf32>
    %c4_i32_130 = arith.constant 4 : i32
    %460 = arith.index_cast %c4_i32_130 : i32 to index
    %c0_131 = arith.constant 0 : index
    %c0_132 = arith.constant 0 : index
    %461 = vector.load %arg13[%460, %c0_131, %c0_132] : memref<8x16x384xf32, #tpu.memory_space<vmem>>, vector<1x16x384xf32>
    %462 = vector.shape_cast %461 : vector<1x16x384xf32> to vector<16x384xf32>
    %463 = arith.truncf %459 : vector<16x128xf32> to vector<16x128xbf16>
    %cst_133 = arith.constant dense<0.000000e+00> : vector<16x384xf32>
    %464 = tpu.matmul %463, %319, %cst_133 {dimension_numbers = #tpu.dot_dimension_numbers<[1], [0], [0], [1], [0, 0, 1, 1], [], []>} : vector<16x128xbf16>, vector<128x384xbf16>, vector<16x384xf32> -> vector<16x384xf32>
    %465 = arith.addf %464, %323 : vector<16x384xf32>
    %466 = vector.extract_strided_slice %462 {offsets = [0, 0], sizes = [16, 128], strides = [1, 1]} : vector<16x384xf32> to vector<16x128xf32>
    %467 = vector.extract_strided_slice %465 {offsets = [0, 0], sizes = [16, 128], strides = [1, 1]} : vector<16x384xf32> to vector<16x128xf32>
    %468 = arith.addf %466, %467 : vector<16x128xf32>
    %469 = arith.negf %468 : vector<16x128xf32>
    %470 = math.exp %469 : vector<16x128xf32>
    %cst_134 = arith.constant 1.000000e+00 : f32
    %471 = vector.broadcast %cst_134 : f32 to vector<16x128xf32>
    %472 = arith.addf %471, %470 : vector<16x128xf32>
    %473 = arith.divf %471, %472 : vector<16x128xf32>
    %474 = vector.extract_strided_slice %462 {offsets = [0, 128], sizes = [16, 128], strides = [1, 1]} : vector<16x384xf32> to vector<16x128xf32>
    %475 = vector.extract_strided_slice %465 {offsets = [0, 128], sizes = [16, 128], strides = [1, 1]} : vector<16x384xf32> to vector<16x128xf32>
    %476 = arith.addf %474, %475 : vector<16x128xf32>
    %477 = arith.negf %476 : vector<16x128xf32>
    %478 = math.exp %477 : vector<16x128xf32>
    %cst_135 = arith.constant 1.000000e+00 : f32
    %479 = vector.broadcast %cst_135 : f32 to vector<16x128xf32>
    %480 = arith.addf %479, %478 : vector<16x128xf32>
    %481 = arith.divf %479, %480 : vector<16x128xf32>
    %482 = vector.extract_strided_slice %462 {offsets = [0, 256], sizes = [16, 128], strides = [1, 1]} : vector<16x384xf32> to vector<16x128xf32>
    %483 = vector.extract_strided_slice %465 {offsets = [0, 256], sizes = [16, 128], strides = [1, 1]} : vector<16x384xf32> to vector<16x128xf32>
    %484 = arith.mulf %473, %483 : vector<16x128xf32>
    %485 = arith.addf %482, %484 : vector<16x128xf32>
    %486 = math.tanh %485 : vector<16x128xf32>
    %cst_136 = arith.constant 1.000000e+00 : f32
    %487 = vector.broadcast %cst_136 : f32 to vector<16x128xf32>
    %488 = arith.subf %487, %481 : vector<16x128xf32>
    %489 = arith.mulf %488, %486 : vector<16x128xf32>
    %490 = arith.mulf %481, %459 : vector<16x128xf32>
    %491 = arith.addf %489, %490 : vector<16x128xf32>
    %c5_i32_137 = arith.constant 5 : i32
    %492 = arith.index_cast %c5_i32_137 : i32 to index
    %c0_138 = arith.constant 0 : index
    %c0_139 = arith.constant 0 : index
    %493 = vector.load %arg13[%492, %c0_138, %c0_139] : memref<8x16x384xf32, #tpu.memory_space<vmem>>, vector<1x16x384xf32>
    %494 = vector.shape_cast %493 : vector<1x16x384xf32> to vector<16x384xf32>
    %495 = arith.truncf %491 : vector<16x128xf32> to vector<16x128xbf16>
    %cst_140 = arith.constant dense<0.000000e+00> : vector<16x384xf32>
    %496 = tpu.matmul %495, %319, %cst_140 {dimension_numbers = #tpu.dot_dimension_numbers<[1], [0], [0], [1], [0, 0, 1, 1], [], []>} : vector<16x128xbf16>, vector<128x384xbf16>, vector<16x384xf32> -> vector<16x384xf32>
    %497 = arith.addf %496, %323 : vector<16x384xf32>
    %498 = vector.extract_strided_slice %494 {offsets = [0, 0], sizes = [16, 128], strides = [1, 1]} : vector<16x384xf32> to vector<16x128xf32>
    %499 = vector.extract_strided_slice %497 {offsets = [0, 0], sizes = [16, 128], strides = [1, 1]} : vector<16x384xf32> to vector<16x128xf32>
    %500 = arith.addf %498, %499 : vector<16x128xf32>
    %501 = arith.negf %500 : vector<16x128xf32>
    %502 = math.exp %501 : vector<16x128xf32>
    %cst_141 = arith.constant 1.000000e+00 : f32
    %503 = vector.broadcast %cst_141 : f32 to vector<16x128xf32>
    %504 = arith.addf %503, %502 : vector<16x128xf32>
    %505 = arith.divf %503, %504 : vector<16x128xf32>
    %506 = vector.extract_strided_slice %494 {offsets = [0, 128], sizes = [16, 128], strides = [1, 1]} : vector<16x384xf32> to vector<16x128xf32>
    %507 = vector.extract_strided_slice %497 {offsets = [0, 128], sizes = [16, 128], strides = [1, 1]} : vector<16x384xf32> to vector<16x128xf32>
    %508 = arith.addf %506, %507 : vector<16x128xf32>
    %509 = arith.negf %508 : vector<16x128xf32>
    %510 = math.exp %509 : vector<16x128xf32>
    %cst_142 = arith.constant 1.000000e+00 : f32
    %511 = vector.broadcast %cst_142 : f32 to vector<16x128xf32>
    %512 = arith.addf %511, %510 : vector<16x128xf32>
    %513 = arith.divf %511, %512 : vector<16x128xf32>
    %514 = vector.extract_strided_slice %494 {offsets = [0, 256], sizes = [16, 128], strides = [1, 1]} : vector<16x384xf32> to vector<16x128xf32>
    %515 = vector.extract_strided_slice %497 {offsets = [0, 256], sizes = [16, 128], strides = [1, 1]} : vector<16x384xf32> to vector<16x128xf32>
    %516 = arith.mulf %505, %515 : vector<16x128xf32>
    %517 = arith.addf %514, %516 : vector<16x128xf32>
    %518 = math.tanh %517 : vector<16x128xf32>
    %cst_143 = arith.constant 1.000000e+00 : f32
    %519 = vector.broadcast %cst_143 : f32 to vector<16x128xf32>
    %520 = arith.subf %519, %513 : vector<16x128xf32>
    %521 = arith.mulf %520, %518 : vector<16x128xf32>
    %522 = arith.mulf %513, %491 : vector<16x128xf32>
    %523 = arith.addf %521, %522 : vector<16x128xf32>
    %c6_i32_144 = arith.constant 6 : i32
    %524 = arith.index_cast %c6_i32_144 : i32 to index
    %c0_145 = arith.constant 0 : index
    %c0_146 = arith.constant 0 : index
    %525 = vector.load %arg13[%524, %c0_145, %c0_146] : memref<8x16x384xf32, #tpu.memory_space<vmem>>, vector<1x16x384xf32>
    %526 = vector.shape_cast %525 : vector<1x16x384xf32> to vector<16x384xf32>
    %527 = arith.truncf %523 : vector<16x128xf32> to vector<16x128xbf16>
    %cst_147 = arith.constant dense<0.000000e+00> : vector<16x384xf32>
    %528 = tpu.matmul %527, %319, %cst_147 {dimension_numbers = #tpu.dot_dimension_numbers<[1], [0], [0], [1], [0, 0, 1, 1], [], []>} : vector<16x128xbf16>, vector<128x384xbf16>, vector<16x384xf32> -> vector<16x384xf32>
    %529 = arith.addf %528, %323 : vector<16x384xf32>
    %530 = vector.extract_strided_slice %526 {offsets = [0, 0], sizes = [16, 128], strides = [1, 1]} : vector<16x384xf32> to vector<16x128xf32>
    %531 = vector.extract_strided_slice %529 {offsets = [0, 0], sizes = [16, 128], strides = [1, 1]} : vector<16x384xf32> to vector<16x128xf32>
    %532 = arith.addf %530, %531 : vector<16x128xf32>
    %533 = arith.negf %532 : vector<16x128xf32>
    %534 = math.exp %533 : vector<16x128xf32>
    %cst_148 = arith.constant 1.000000e+00 : f32
    %535 = vector.broadcast %cst_148 : f32 to vector<16x128xf32>
    %536 = arith.addf %535, %534 : vector<16x128xf32>
    %537 = arith.divf %535, %536 : vector<16x128xf32>
    %538 = vector.extract_strided_slice %526 {offsets = [0, 128], sizes = [16, 128], strides = [1, 1]} : vector<16x384xf32> to vector<16x128xf32>
    %539 = vector.extract_strided_slice %529 {offsets = [0, 128], sizes = [16, 128], strides = [1, 1]} : vector<16x384xf32> to vector<16x128xf32>
    %540 = arith.addf %538, %539 : vector<16x128xf32>
    %541 = arith.negf %540 : vector<16x128xf32>
    %542 = math.exp %541 : vector<16x128xf32>
    %cst_149 = arith.constant 1.000000e+00 : f32
    %543 = vector.broadcast %cst_149 : f32 to vector<16x128xf32>
    %544 = arith.addf %543, %542 : vector<16x128xf32>
    %545 = arith.divf %543, %544 : vector<16x128xf32>
    %546 = vector.extract_strided_slice %526 {offsets = [0, 256], sizes = [16, 128], strides = [1, 1]} : vector<16x384xf32> to vector<16x128xf32>
    %547 = vector.extract_strided_slice %529 {offsets = [0, 256], sizes = [16, 128], strides = [1, 1]} : vector<16x384xf32> to vector<16x128xf32>
    %548 = arith.mulf %537, %547 : vector<16x128xf32>
    %549 = arith.addf %546, %548 : vector<16x128xf32>
    %550 = math.tanh %549 : vector<16x128xf32>
    %cst_150 = arith.constant 1.000000e+00 : f32
    %551 = vector.broadcast %cst_150 : f32 to vector<16x128xf32>
    %552 = arith.subf %551, %545 : vector<16x128xf32>
    %553 = arith.mulf %552, %550 : vector<16x128xf32>
    %554 = arith.mulf %545, %523 : vector<16x128xf32>
    %555 = arith.addf %553, %554 : vector<16x128xf32>
    %c7_i32_151 = arith.constant 7 : i32
    %556 = arith.index_cast %c7_i32_151 : i32 to index
    %c0_152 = arith.constant 0 : index
    %c0_153 = arith.constant 0 : index
    %557 = vector.load %arg13[%556, %c0_152, %c0_153] : memref<8x16x384xf32, #tpu.memory_space<vmem>>, vector<1x16x384xf32>
    %558 = vector.shape_cast %557 : vector<1x16x384xf32> to vector<16x384xf32>
    %559 = arith.truncf %555 : vector<16x128xf32> to vector<16x128xbf16>
    %cst_154 = arith.constant dense<0.000000e+00> : vector<16x384xf32>
    %560 = tpu.matmul %559, %319, %cst_154 {dimension_numbers = #tpu.dot_dimension_numbers<[1], [0], [0], [1], [0, 0, 1, 1], [], []>} : vector<16x128xbf16>, vector<128x384xbf16>, vector<16x384xf32> -> vector<16x384xf32>
    %561 = arith.addf %560, %323 : vector<16x384xf32>
    %562 = vector.extract_strided_slice %558 {offsets = [0, 0], sizes = [16, 128], strides = [1, 1]} : vector<16x384xf32> to vector<16x128xf32>
    %563 = vector.extract_strided_slice %561 {offsets = [0, 0], sizes = [16, 128], strides = [1, 1]} : vector<16x384xf32> to vector<16x128xf32>
    %564 = arith.addf %562, %563 : vector<16x128xf32>
    %565 = arith.negf %564 : vector<16x128xf32>
    %566 = math.exp %565 : vector<16x128xf32>
    %cst_155 = arith.constant 1.000000e+00 : f32
    %567 = vector.broadcast %cst_155 : f32 to vector<16x128xf32>
    %568 = arith.addf %567, %566 : vector<16x128xf32>
    %569 = arith.divf %567, %568 : vector<16x128xf32>
    %570 = vector.extract_strided_slice %558 {offsets = [0, 128], sizes = [16, 128], strides = [1, 1]} : vector<16x384xf32> to vector<16x128xf32>
    %571 = vector.extract_strided_slice %561 {offsets = [0, 128], sizes = [16, 128], strides = [1, 1]} : vector<16x384xf32> to vector<16x128xf32>
    %572 = arith.addf %570, %571 : vector<16x128xf32>
    %573 = arith.negf %572 : vector<16x128xf32>
    %574 = math.exp %573 : vector<16x128xf32>
    %cst_156 = arith.constant 1.000000e+00 : f32
    %575 = vector.broadcast %cst_156 : f32 to vector<16x128xf32>
    %576 = arith.addf %575, %574 : vector<16x128xf32>
    %577 = arith.divf %575, %576 : vector<16x128xf32>
    %578 = vector.extract_strided_slice %558 {offsets = [0, 256], sizes = [16, 128], strides = [1, 1]} : vector<16x384xf32> to vector<16x128xf32>
    %579 = vector.extract_strided_slice %561 {offsets = [0, 256], sizes = [16, 128], strides = [1, 1]} : vector<16x384xf32> to vector<16x128xf32>
    %580 = arith.mulf %569, %579 : vector<16x128xf32>
    %581 = arith.addf %578, %580 : vector<16x128xf32>
    %582 = math.tanh %581 : vector<16x128xf32>
    %cst_157 = arith.constant 1.000000e+00 : f32
    %583 = vector.broadcast %cst_157 : f32 to vector<16x128xf32>
    %584 = arith.subf %583, %577 : vector<16x128xf32>
    %585 = arith.mulf %584, %582 : vector<16x128xf32>
    %586 = arith.mulf %577, %555 : vector<16x128xf32>
    %587 = arith.addf %585, %586 : vector<16x128xf32>
    %c8_i32_158 = arith.constant 8 : i32
    %588 = arith.truncf %587 : vector<16x128xf32> to vector<16x128xbf16>
    %c0_159 = arith.constant 0 : index
    %c0_160 = arith.constant 0 : index
    %589 = vector.load %arg10[%c0_159, %c0_160] : memref<128x128xbf16, #tpu.memory_space<vmem>>, vector<128x128xbf16>
    %cst_161 = arith.constant dense<0.000000e+00> : vector<16x128xf32>
    %590 = tpu.matmul %588, %589, %cst_161 {dimension_numbers = #tpu.dot_dimension_numbers<[1], [0], [0], [1], [0, 0, 1, 1], [], []>} : vector<16x128xbf16>, vector<128x128xbf16>, vector<16x128xf32> -> vector<16x128xf32>
    %c0_162 = arith.constant 0 : index
    %c0_163 = arith.constant 0 : index
    %591 = vector.load %arg11[%c0_162, %c0_163] : memref<1x128xf32, #tpu.memory_space<vmem>>, vector<1x128xf32>
    %592 = vector.broadcast %591 : vector<1x128xf32> to vector<16x128xf32>
    %593 = arith.addf %590, %592 : vector<16x128xf32>
    %c0_164 = arith.constant 0 : index
    %c0_165 = arith.constant 0 : index
    %594 = vector.load %arg12[%c0_164, %c0_165] : memref<16x128xf32, #tpu.memory_space<vmem>>, vector<16x128xf32>
    tpu.vector_store %arg12[%c0_164, %c0_165], %593 {strides = array<i32>} : memref<16x128xf32, #tpu.memory_space<vmem>>, vector<16x128xf32>,
    return
  }
  func.func @transform_0(%arg0: i32) -> (i32, i32, i32) {
    %c0_i32 = arith.constant 0 : i32
    %c0_i32_0 = arith.constant 0 : i32
    %c0_i32_1 = arith.constant 0 : i32
    return %c0_i32, %arg0, %c0_i32_0 : i32, i32, i32
  }
  func.func @transform_1(%arg0: i32) -> (i32, i32) {
    %c0_i32 = arith.constant 0 : i32
    %c0_i32_0 = arith.constant 0 : i32
    %c0_i32_1 = arith.constant 0 : i32
    return %c0_i32, %c0_i32_0 : i32, i32
  }
  func.func @transform_2(%arg0: i32) -> (i32, i32) {
    %c0_i32 = arith.constant 0 : i32
    %c0_i32_0 = arith.constant 0 : i32
    %c0_i32_1 = arith.constant 0 : i32
    return %c0_i32, %c0_i32_0 : i32, i32
  }
  func.func @transform_3(%arg0: i32) -> (i32, i32) {
    %c0_i32 = arith.constant 0 : i32
    %c0_i32_0 = arith.constant 0 : i32
    %c0_i32_1 = arith.constant 0 : i32
    return %c0_i32, %c0_i32_0 : i32, i32
  }
  func.func @transform_4(%arg0: i32) -> (i32, i32) {
    %c0_i32 = arith.constant 0 : i32
    %c0_i32_0 = arith.constant 0 : i32
    %c0_i32_1 = arith.constant 0 : i32
    return %c0_i32, %c0_i32_0 : i32, i32
  }
  func.func @transform_5(%arg0: i32) -> (i32, i32) {
    %c0_i32 = arith.constant 0 : i32
    %c0_i32_0 = arith.constant 0 : i32
    %c0_i32_1 = arith.constant 0 : i32
    return %c0_i32, %c0_i32_0 : i32, i32
  }
  func.func @transform_6(%arg0: i32) -> (i32, i32) {
    %c0_i32 = arith.constant 0 : i32
    %c0_i32_0 = arith.constant 0 : i32
    %c0_i32_1 = arith.constant 0 : i32
    return %c0_i32, %c0_i32_0 : i32, i32
  }
  func.func @transform_7(%arg0: i32) -> (i32, i32) {
    %c0_i32 = arith.constant 0 : i32
    %c0_i32_0 = arith.constant 0 : i32
    %c0_i32_1 = arith.constant 0 : i32
    return %c0_i32, %c0_i32_0 : i32, i32
  }
  func.func @transform_8(%arg0: i32) -> (i32, i32) {
    %c0_i32 = arith.constant 0 : i32
    %c0_i32_0 = arith.constant 0 : i32
    %c0_i32_1 = arith.constant 0 : i32
    return %c0_i32, %c0_i32_0 : i32, i32
  }
  func.func @transform_9(%arg0: i32) -> (i32, i32) {
    %c0_i32 = arith.constant 0 : i32
    %c0_i32_0 = arith.constant 0 : i32
    %c0_i32_1 = arith.constant 0 : i32
    return %c0_i32, %c0_i32_0 : i32, i32
  }
  func.func @transform_10(%arg0: i32) -> (i32, i32) {
    %c0_i32 = arith.constant 0 : i32
    %c0_i32_0 = arith.constant 0 : i32
    %c0_i32_1 = arith.constant 0 : i32
    return %c0_i32, %c0_i32_0 : i32, i32
  }
  func.func @transform_11(%arg0: i32) -> (i32, i32) {
    %c0_i32 = arith.constant 0 : i32
    %c0_i32_0 = arith.constant 0 : i32
    return %arg0, %c0_i32 : i32, i32
  }
}

</mosaic_0001>

<bundles_post_ra>
// kernel: gru_model_forward.1
= control target key start
LH: loop header
LB: loop body
LE: loop exit
PB: predicated region body
PF: predicated region fallthrough
CT: control target
= control target key end

     0   :  { %16 = vsyncpa [#allocation5], 0  ;;  %s6823_s0 = inlined_call_operand.vmem [shape: bf16[8,16,128], index: 0, kind: input, shape index: {}]   ;;  %s6824_s1 = inlined_call_operand.hbm [shape: bf16[128,384], index: 1, kind: input, shape index: {}]   ;;  %s6825_s2 = inlined_call_operand.hbm [shape: bf16[128,384], index: 2, kind: input, shape index: {}]   ;;  %s6826_s3 = inlined_call_operand.vmem [shape: f32[1,384], index: 3, kind: input, shape index: {}]   ;;  %s6827_s4 = inlined_call_operand.vmem [shape: f32[1,384], index: 4, kind: input, shape index: {}]   ;;  %s6828_s5 = inlined_call_operand.hbm [shape: bf16[128,384], index: 5, kind: input, shape index: {}]   ;;  %s6829_s6 = inlined_call_operand.hbm [shape: bf16[128,384], index: 6, kind: input, shape index: {}]   ;;  %s6830_s7 = inlined_call_operand.vmem [shape: f32[1,384], index: 7, kind: input, shape index: {}]   ;;  %s6831_s8 = inlined_call_operand.vmem [shape: f32[1,384], index: 8, kind: input, shape index: {}]   ;;  %s6832_s9 = inlined_call_operand.vmem [shape: bf16[128,128], index: 9, kind: input, shape index: {}]   ;;  %s6833_s10 = inlined_call_operand.vmem [shape: f32[1,128], index: 10, kind: input, shape index: {}]   ;;  %s6834_s11 = inlined_call_operand.vmem [shape: f32[16,128], index: 11, kind: output, shape index: {}]  }
   0x1   :  { %17 = vsyncpa [#allocation7], 0 }
   0x2   :  { %18 = vsyncpa [#allocation10], 0  ;;  %s5242_s17 = smov [#allocation6]   ;;  %s5243_s19 = smov [#allocation4]  }
   0x3   :  { %s38_s18 = sshll.u32 %s5242_s17, 4  ;;  %s26_s20 = sshll.u32 %s5243_s19, 4  ;;  %s39_s18 = int_to_ptr.vmem [resolvable:$true] %s38_s18  ;;  %s27_s20 = int_to_ptr.vmem [resolvable:$true] %s26_s20 }
   0x4   :  { %s5164_s21 = scalar_lea.vmem %s39_s18, 3072  ;;  %p5169_p1 = scmp.lt.s32.totalorder %s39_s18, %s39_s18 }
   0x5   :  { %p5165_p0 = scmp.ne.s32.totalorder %s39_s18, %s5164_s21  ;;  %p5170_p2 = scmp.lt.s32.totalorder %s5164_s21, %s5164_s21 }
   0x7   :  { %p5171_p3 = por %p5170_p2, %p5169_p1 }
   0x9   :  { %p5172_p4 = pnand %p5171_p3, %p5165_p0 }
   0xb   :  { %5175 = shalt.err (!%p5172_p4)
}
   0xc   :  { %s5244_s22 = smov 192   ;;  %s5245_s23 = smov 12  }
   0xd   :  { %44 = dma.hbm_to_vmem [thread:$0]  %s6825_s2, 3072, %s39_s18, [#allocation7], %s5244_s22, %s5244_s22, %s5245_s23  }
   0xe   :  { %s5184_s26 = scalar_lea.vmem %s27_s20, 3072  ;;  %p5189_p6 = scmp.lt.s32.totalorder %s27_s20, %s27_s20 }
   0xf   :  { %p5185_p5 = scmp.ne.s32.totalorder %s27_s20, %s5184_s26  ;;  %p5190_p7 = scmp.lt.s32.totalorder %s5184_s26, %s5184_s26 }
  0x11   :  { %p5191_p8 = por %p5190_p7, %p5189_p6 }
  0x13   :  { %p5192_p9 = pnand %p5191_p8, %p5185_p5 }
  0x15   :  { %5195 = shalt.err (!%p5192_p9)
}
  0x16   :  { %32 = dma.hbm_to_vmem [thread:$0]  %s6824_s1, 3072, %s27_s20, [#allocation5], %s5244_s22, %s5244_s22, %s5245_s23  }
  0x17   :  { %s5246_s29 = smov [#allocation8]   ;;  %s5247_s12 = smov [#allocation9]  }
  0x18   :  { %s54_s30 = sshll.u32 %s5246_s29, 4  ;;  %s66_s13 = sshll.u32 %s5247_s12, 4  ;;  %s55_s30 = int_to_ptr.vmem [resolvable:$true] %s54_s30  ;;  %s67_s13 = int_to_ptr.vmem [resolvable:$true] %s66_s13 }
  0x19   :  { %s5204_s2 = scalar_lea.vmem %s55_s30, 3072  ;;  %p5209_p11 = scmp.lt.s32.totalorder %s55_s30, %s55_s30 }
  0x1a   :  { %p5205_p10 = scmp.ne.s32.totalorder %s55_s30, %s5204_s2  ;;  %p5210_p12 = scmp.lt.s32.totalorder %s5204_s2, %s5204_s2 }
  0x1c   :  { %p5211_p13 = por %p5210_p12, %p5209_p11 }
  0x1e   :  { %p5212_p0 = pnand %p5211_p13, %p5205_p10 }
  0x20   :  { %5215 = shalt.err (!%p5212_p0)
}
  0x21   :  { %60 = dma.hbm_to_vmem [thread:$0]  %s6828_s5, 3072, %s55_s30, [#allocation7], %s5244_s22, %s5244_s22, %s5245_s23  }
  0x22   :  { %s5224_s1 = scalar_lea.vmem %s67_s13, 3072  ;;  %p5229_p2 = scmp.lt.s32.totalorder %s67_s13, %s67_s13 }
  0x23   :  { %p5225_p1 = scmp.ne.s32.totalorder %s67_s13, %s5224_s1  ;;  %p5230_p3 = scmp.lt.s32.totalorder %s5224_s1, %s5224_s1 }
  0x25   :  { %p5231_p4 = por %p5230_p3, %p5229_p2 }
  0x27   :  { %p5232_p5 = pnand %p5231_p4, %p5225_p1 }
  0x29   :  { %5235 = shalt.err (!%p5232_p5)
}
  0x2a   :  { %72 = dma.hbm_to_vmem [thread:$0]  %s6829_s6, 3072, %s67_s13, [#allocation10], %s5244_s22, %s5244_s22, %s5245_s23  }
  0x2b   :  { %5236 = dma.done.wait [#allocation5], 3072  }
  0x2c   :  { %5237 = vsyncadd [#allocation5], 4294964224 }
  0x2d   :  { %5238 = dma.done.wait [#allocation7], 6144  }
  0x2e   :  { %5239 = vsyncadd [#allocation7], 4294961152 }
  0x2f   :  { %5240 = dma.done.wait [#allocation10], 3072  }
  0x30   :  { %5241 = vsyncadd [#allocation10], 4294964224  ;;  %v6835_v0 = vmov 0   ;;  %v4636_v1 = vld [vmem:[#allocation4 + $0xac] ss:$12 sps:$4 sm:$0xff]   ;;  %v4668_v18 = vld [vmem:[%s6823_s0] sm:$0xff]   ;;  %v161_v58 = vlaneseq }
  0x31   :  { %416 = vmatprep.mubr.bf16.mxu0 %v6835_v0  ;;  %v4638_v2 = vld [vmem:[#allocation4 + $0xb0] ss:$12 sps:$4 sm:$0xff]   ;;  %384 = vmatprep.subr.bf16.mxu0 %v4636_v1  ;;  %v4639_v3 = vld [vmem:[#allocation4 + $0xa8] ss:$12 sps:$4 sm:$0xff]   ;;  %v4642_v5 = vld [vmem:[#allocation4 + $0x98] ss:$12 sps:$4 sm:$0xff]  }
  0x32   :  { %4223 = vmatprep.subr.bf16.mxu1 %v4638_v2  ;;  %v4640_v4 = vld [vmem:[#allocation4 + $0x94] ss:$12 sps:$4 sm:$0xff]   ;;  %385 = vmatpush1.bf16.msra.mxu0 %v4639_v3  ;;  %v4643_v6 = vld [vmem:[#allocation4 + $0x90] ss:$12 sps:$4 sm:$0xff]   ;;  %v4647_v9 = vld [vmem:[#allocation4 + $0x78] ss:$12 sps:$4 sm:$0xff]  }
  0x33   :  { %4224 = vmatpush3.bf16.msra.mxu1 %v4638_v2  ;;  %386 = vmatprep.subr.bf16.mxu0 %v4640_v4  ;;  %v4644_v7 = vld [vmem:[#allocation4 + $0x7c] ss:$12 sps:$4 sm:$0xff]   ;;  %v4646_v8 = vld [vmem:[#allocation4 + $0x80] ss:$12 sps:$4 sm:$0xff]   ;;  %v4648_v10 = vld [vmem:[#allocation4 + $0x64] ss:$12 sps:$4 sm:$0xff]  }
  0x34   :  { %4225 = vmatprep.subr.bf16.mxu1 %v4642_v5  ;;  %v4650_v11 = vld [vmem:[#allocation4 + $0x68] ss:$12 sps:$4 sm:$0xff]   ;;  %v4651_v12 = vld [vmem:[#allocation4 + $0x60] ss:$12 sps:$4 sm:$0xff]   ;;  %v4654_v14 = vld [vmem:[#allocation4 + $0x50] ss:$12 sps:$4 sm:$0xff]   ;;  %4239 = vmatprep.mubr.bf16.mxu1 %v4668_v18 }
  0x35   :  { %v4652_v13 = vld [vmem:[#allocation4 + $0x4c] ss:$12 sps:$4 sm:$0xff]   ;;  %v4655_v15 = vld [vmem:[#allocation4 + $0x48] ss:$12 sps:$4 sm:$0xff]   ;;  %v4659_v19 = vld [vmem:[#allocation4 + $0x30] ss:$12 sps:$4 sm:$0xff]  }
  0x36   :  { %387 = vmatpush1.bf16.msra.mxu0 %v4643_v6  ;;  %v4656_v16 = vld [vmem:[#allocation4 + $0x34] ss:$12 sps:$4 sm:$0xff]   ;;  %v4658_v17 = vld [vmem:[#allocation4 + $0x38] ss:$12 sps:$4 sm:$0xff]   ;;  %v4660_v20 = vld [vmem:[#allocation4 + $0x1c] ss:$12 sps:$4 sm:$0xff]  }
  0x37   :  { %4226 = vmatpush3.bf16.msra.mxu1 %v4642_v5  ;;  %388 = vmatprep.subr.bf16.mxu0 %v4644_v7  ;;  %v4662_v21 = vld [vmem:[#allocation4 + $0x20] ss:$12 sps:$4 sm:$0xff]   ;;  %v4663_v22 = vld [vmem:[#allocation4 + $0x18] ss:$12 sps:$4 sm:$0xff]   ;;  %v4666_v24 = vld [vmem:[#allocation4 + $0x8] ss:$12 sps:$4 sm:$0xff]  }
  0x38   :  { %4227 = vmatprep.subr.bf16.mxu1 %v4646_v8  ;;  %v4664_v23 = vld [vmem:[#allocation4 + $0x4] ss:$12 sps:$4 sm:$0xff]   ;;  %v4667_v25 = vld [vmem:[#allocation4] ss:$12 sps:$4 sm:$0xff]   ;;  %v5344_v28 = vld [vmem:[#allocation6 + $0xa8] ss:$12 sps:$4 sm:$0xff]  }
  0x39   :  { %v5339_v26 = vld [vmem:[#allocation6 + $0xac] ss:$12 sps:$4 sm:$0xff]   ;;  %v5346_v29 = vld [vmem:[#allocation6 + $0xb0] ss:$12 sps:$4 sm:$0xff]   ;;  %v6837_v30 = vmov 0.0   ;;  %v4686_v39 = vld [vmem:[%s6823_s0 + $0x20] sm:$0xff]  }
  0x3a   :  { %389 = vmatpush1.bf16.msra.mxu0 %v4647_v9  ;;  %v4669_v27 = vld [vmem:[%s6823_s0 + $0x8] sm:$0xff]   ;;  %v5350_v31 = vld [vmem:[#allocation6 + $0x94] ss:$12 sps:$4 sm:$0xff]   ;;  %v5355_v33 = vld [vmem:[#allocation6 + $0x90] ss:$12 sps:$4 sm:$0xff]   ;;  %vm5250_vm0 = vmmov 0  }
  0x3b   :  { %4228 = vmatpush3.bf16.msra.mxu1 %v4646_v8  ;;  %390 = vmatprep.subr.bf16.mxu0 %v4648_v10  ;;  %v4677_v32 = vld [vmem:[%s6823_s0 + $0x10] sm:$0xff]   ;;  %v5359_v34 = vld [vmem:[#allocation6 + $0x98] ss:$12 sps:$4 sm:$0xff]   ;;  %v5363_v35 = vld [vmem:[#allocation6 + $0x7c] ss:$12 sps:$4 sm:$0xff]   ;;  %v162_v59 = vshrl.u32 %v161_v58, 7 }
  0x3c   :  { %4229 = vmatprep.subr.bf16.mxu1 %v4650_v11  ;;  %v4678_v36 = vld [vmem:[%s6823_s0 + $0x18] sm:$0xff]   ;;  %v5373_v38 = vld [vmem:[#allocation6 + $0x64] ss:$12 sps:$4 sm:$0xff]   ;;  %v5380_v40 = vld [vmem:[#allocation6 + $0x80] ss:$12 sps:$4 sm:$0xff]  }
  0x3d   :  { %v5369_v37 = vld [vmem:[#allocation6 + $0x78] ss:$12 sps:$4 sm:$0xff]   ;;  %v5383_v41 = vld [vmem:[#allocation6 + $0x60] ss:$12 sps:$4 sm:$0xff]   ;;  %v5392_v44 = vld [vmem:[#allocation6 + $0x68] ss:$12 sps:$4 sm:$0xff]  }
  0x3e   :  { %391 = vmatpush1.bf16.msra.mxu0 %v4651_v12  ;;  %v4687_v42 = vld [vmem:[%s6823_s0 + $0x28] sm:$0xff]   ;;  %v5397_v46 = vld [vmem:[#allocation6 + $0x34] ss:$12 sps:$4 sm:$0xff]   ;;  %v5405_v48 = vld [vmem:[#allocation6 + $0x50] ss:$12 sps:$4 sm:$0xff]   ;;  %v5489_v60 = vsub.s32 2, %v162_v59 }
  0x3f   :  { %4230 = vmatpush3.bf16.msra.mxu1 %v4650_v11  ;;  %392 = vmatprep.subr.bf16.mxu0 %v4652_v13  ;;  %v5390_v43 = vld [vmem:[#allocation6 + $0x4c] ss:$12 sps:$4 sm:$0xff]   ;;  %v5394_v45 = vld [vmem:[#allocation6 + $0x48] ss:$12 sps:$4 sm:$0xff]   ;;  %v5407_v49 = vld [vmem:[#allocation6 + $0x30] ss:$12 sps:$4 sm:$0xff]  }
  0x40   :  { %4231 = vmatprep.subr.bf16.mxu1 %v4654_v14  ;;  %v4695_v47 = vld [vmem:[%s6823_s0 + $0x30] sm:$0xff]   ;;  %v5410_v50 = vld [vmem:[#allocation6 + $0x1c] ss:$12 sps:$4 sm:$0xff]   ;;  %v5418_v52 = vld [vmem:[#allocation6 + $0x18] ss:$12 sps:$4 sm:$0xff]   ;;  %6845 = vst [vmem:[#allocation14_spill] sm:$0xff] %v5489_v60 }
  0x41   :  { %v4696_v51 = vld [vmem:[%s6823_s0 + $0x38] sm:$0xff]   ;;  %v5421_v53 = vld [vmem:[#allocation6 + $0x4] ss:$12 sps:$4 sm:$0xff]   ;;  %v5429_v55 = vld [vmem:[#allocation6] ss:$12 sps:$4 sm:$0xff]   ;;  %v5506_v5 = vsub.s32 0, %v162_v59 }
  0x42   :  { %393 = vmatpush1.bf16.msra.mxu0 %v4655_v15  ;;  %v5426_v54 = vld [vmem:[#allocation6 + $0x38] ss:$12 sps:$4 sm:$0xff]   ;;  %v5433_v56 = vld [vmem:[#allocation6 + $0x20] ss:$12 sps:$4 sm:$0xff]   ;;  %v5440_v57 = vld [vmem:[#allocation6 + $0x8] ss:$12 sps:$4 sm:$0xff]  }
  0x43   :  { %4232 = vmatpush3.bf16.msra.mxu1 %v4654_v14  ;;  %394 = vmatprep.subr.bf16.mxu0 %v4656_v16  ;;  %v158_v61 = vld [vmem:[%s6826_s3] sm:$0x7]  ;;  %6846 = vst [vmem:[#allocation15_spill] sm:$0xff] %v5506_v5  ;;  %v5510_v8 = vsub.s32 1, %v162_v59 }
  0x44   :  { %4233 = vmatprep.subr.bf16.mxu1 %v4658_v17  ;;  %v5495_v62 = vrot.slane %v158_v61, %v5489_v60  ;;  %v5520_v12 = vrot.slane %v158_v61, %v5506_v5 }
  0x45   :  { %6847 = vst [vmem:[#allocation16_spill] sm:$0xff] %v5510_v8  ;;  %v5523_v15 = vrot.slane %v158_v61, %v5510_v8 }
  0x46   :  { %395 = vmatpush1.bf16.msra.mxu0 %v4659_v19 }
  0x47   :  { %4234 = vmatpush3.bf16.msra.mxu1 %v4658_v17  ;;  %396 = vmatprep.subr.bf16.mxu0 %v4660_v20 }
  0x48   :  { %4235 = vmatprep.subr.bf16.mxu1 %v4662_v21 }
  0x4a   :  { %397 = vmatpush1.bf16.msra.mxu0 %v4663_v22 }
  0x4b   :  { %4236 = vmatpush3.bf16.msra.mxu1 %v4662_v21  ;;  %398 = vmatprep.subr.bf16.mxu0 %v4664_v23 }
  0x4c   :  { %4237 = vmatprep.subr.bf16.mxu1 %v4666_v24 }
  0x4e   :  { %399 = vmatpush1.bf16.msra.mxu0 %v4667_v25 }
  0x4f   :  { %4238 = vmatpush3.bf16.msra.mxu1 %v4666_v24  ;;  %4255 = vmatprep.subr.bf16.mxu0 %v6837_v30 }
  0x50   :  { %776 = vmatprep.subr.bf16.mxu1 %v5339_v26 }
  0x51   :  { %417 = vmatmul.mubr.bf16.vlgmr.msra.gmra.mxu0 %v4668_v18 }
  0x52   :  { %4240 = vmatmul.mubr.bf16.vlgmr.msra.gmra.mxu1 %v4669_v27  ;;  %4256 = vmatpush3.bf16.msra.mxu0 %v5346_v29 }
  0x53   :  { %777 = vmatpush1.bf16.msra.mxu1 %v5344_v28  ;;  %426 = vmatprep.mubr.bf16.mxu0 %v6835_v0 }
  0x54   :  { %778 = vmatprep.subr.bf16.mxu1 %v5350_v31  ;;  %4243 = vmatprep.mubr.bf16.mxu1 %v4677_v32 }
  0x55   :  { %4257 = vmatprep.subr.bf16.mxu0 %v6837_v30 }
  0x56   :  { %4258 = vmatpush3.bf16.msra.mxu0 %v5359_v34 }
  0x57   :  { %779 = vmatpush1.bf16.msra.mxu1 %v5355_v33  ;;  %4259 = vmatprep.subr.bf16.mxu0 %v6837_v30 }
  0x58   :  { %780 = vmatprep.subr.bf16.mxu1 %v5363_v35 }
  0x59   :  { %427 = vmatmul.mubr.bf16.gmra.mxu0 %v4669_v27 }
  0x5a   :  { %4244 = vmatmul.mubr.bf16.gmra.mxu1 %v4678_v36  ;;  %436 = vmatprep.mubr.bf16.mxu0 %v6835_v0 }
  0x5b   :  { %781 = vmatpush1.bf16.msra.mxu1 %v5369_v37  ;;  %4247 = vmatprep.mubr.bf16.mxu1 %v4686_v39 }
  0x5c   :  { %782 = vmatprep.subr.bf16.mxu1 %v5373_v38  ;;  %4260 = vmatpush3.bf16.msra.mxu0 %v5380_v40 }
  0x5d   :  { %4261 = vmatprep.subr.bf16.mxu0 %v6837_v30 }
  0x5f   :  { %783 = vmatpush1.bf16.msra.mxu1 %v5383_v41 }
  0x60   :  { %784 = vmatprep.subr.bf16.mxu1 %v5390_v43  ;;  %4262 = vmatpush3.bf16.msra.mxu0 %v5392_v44 }
  0x61   :  { %437 = vmatmul.mubr.bf16.gmra.mxu0 %v4677_v32  ;;  %4263 = vmatprep.subr.bf16.mxu0 %v6837_v30 }
  0x62   :  { %4248 = vmatmul.mubr.bf16.gmra.mxu1 %v4687_v42  ;;  %446 = vmatprep.mubr.bf16.mxu0 %v6835_v0 }
  0x63   :  { %785 = vmatpush1.bf16.msra.mxu1 %v5394_v45  ;;  %4251 = vmatprep.mubr.bf16.mxu1 %v4695_v47 }
  0x64   :  { %786 = vmatprep.subr.bf16.mxu1 %v5397_v46  ;;  %4264 = vmatpush3.bf16.msra.mxu0 %v5405_v48 }
  0x65   :  { %4265 = vmatprep.subr.bf16.mxu0 %v6837_v30 }
  0x67   :  { %787 = vmatpush1.bf16.msra.mxu1 %v5407_v49 }
  0x68   :  { %788 = vmatprep.subr.bf16.mxu1 %v5410_v50  ;;  %4266 = vmatpush3.bf16.msra.mxu0 %v5426_v54 }
  0x69   :  { %447 = vmatmul.mubr.bf16.gmra.mxu0 %v4678_v36  ;;  %4267 = vmatprep.subr.bf16.mxu0 %v6837_v30 }
  0x6a   :  { %4252 = vmatmul.mubr.bf16.gmra.mxu1 %v4696_v51  ;;  %456 = vmatprep.mubr.bf16.mxu0 %v6835_v0 }
  0x6b   :  { %789 = vmatpush1.bf16.msra.mxu1 %v5418_v52  ;;  %808 = vmatprep.mubr.bf16.mxu1 %v6835_v0 }
  0x6c   :  { %790 = vmatprep.subr.bf16.mxu1 %v5421_v53  ;;  %4268 = vmatpush3.bf16.msra.mxu0 %v5433_v56 }
  0x6d   :  { %4269 = vmatprep.subr.bf16.mxu0 %v6837_v30 }
  0x6f   :  { %791 = vmatpush1.bf16.msra.mxu1 %v5429_v55 }
  0x70   :  { %919 = vmatprep.subr.bf16.mxu1 %v5339_v26  ;;  %4270 = vmatpush3.bf16.msra.mxu0 %v5440_v57 }
  0x71   :  { %457 = vmatmul.mubr.bf16.gmra.mxu0 %v4686_v39  ;;  %4275 = vmatprep.subr.bf16.mxu0 %v6837_v30 }
  0x72   :  { %809 = vmatmul.mubr.bf16.vlgmr.msra.gmra.mxu1 %v6835_v0  ;;  %466 = vmatprep.mubr.bf16.mxu0 %v6835_v0 }
  0x73   :  { %920 = vmatpush1.bf16.msra.mxu1 %v5344_v28  ;;  %951 = vmatprep.mubr.bf16.mxu1 %v6835_v0 }
  0x74   :  { %921 = vmatprep.subr.bf16.mxu1 %v5350_v31 }
  0x77   :  { %922 = vmatpush1.bf16.msra.mxu1 %v5355_v33 }
  0x78   :  { %923 = vmatprep.subr.bf16.mxu1 %v5363_v35 }
  0x79   :  { %467 = vmatmul.mubr.bf16.gmra.mxu0 %v4687_v42 }
  0x7a   :  { %476 = vmatprep.mubr.bf16.mxu0 %v6835_v0 }
  0x7b   :  { %924 = vmatpush1.bf16.msra.mxu1 %v5369_v37 }
  0x7c   :  { %925 = vmatprep.subr.bf16.mxu1 %v5373_v38 }
  0x7f   :  { %926 = vmatpush1.bf16.msra.mxu1 %v5383_v41 }
  0x80   :  { %927 = vmatprep.subr.bf16.mxu1 %v5390_v43 }
  0x81   :  { %477 = vmatmul.mubr.bf16.gmra.mxu0 %v4695_v47 }
  0x82   :  { %486 = vmatprep.mubr.bf16.mxu0 %v6835_v0 }
  0x83   :  { %928 = vmatpush1.bf16.msra.mxu1 %v5394_v45 }
  0x84   :  { %929 = vmatprep.subr.bf16.mxu1 %v5397_v46 }
  0x87   :  { %930 = vmatpush1.bf16.msra.mxu1 %v5407_v49 }
  0x88   :  { %931 = vmatprep.subr.bf16.mxu1 %v5410_v50 }
  0x89   :  { %487 = vmatmul.mubr.bf16.gmra.mxu0 %v4696_v51 }
  0x8a   :  { %4271 = vmatprep.mubr.msk.bf16.mxu0 %vm5250_vm0, %v6837_v30 }
  0x8b   :  { %932 = vmatpush1.bf16.msra.mxu1 %v5418_v52 }
  0x8c   :  { %933 = vmatprep.subr.bf16.mxu1 %v5421_v53 }
  0x8f   :  { %934 = vmatpush1.bf16.msra.mxu1 %v5429_v55 }
  0x90   :  { %1063 = vmatprep.subr.bf16.mxu1 %v5339_v26 }
  0x91   :  { %4272 = vmatmul.mubr.bf16.vlgmr.msra.gmra.mxu0 %v6835_v0 }
  0x92   :  { %4276 = vmatpush3.bf16.msra.mxu0 %v5346_v29  ;;  %4291 = vmatprep.mubr.msk.bf16.mxu0 %vm5250_vm0, %v6837_v30 }
  0x93   :  { %4277 = vmatprep.subr.bf16.mxu0 %v6837_v30 }
  0x96   :  { %4278 = vmatpush3.bf16.msra.mxu0 %v5359_v34 }
  0x97   :  { %4279 = vmatprep.subr.bf16.mxu0 %v6837_v30 }
  0x9a   :  { %4280 = vmatpush3.bf16.msra.mxu0 %v5380_v40 }
  0x9b   :  { %4281 = vmatprep.subr.bf16.mxu0 %v6837_v30 }
  0x9e   :  { %4282 = vmatpush3.bf16.msra.mxu0 %v5392_v44 }
  0x9f   :  { %4283 = vmatprep.subr.bf16.mxu0 %v6837_v30 }
  0xa2   :  { %4284 = vmatpush3.bf16.msra.mxu0 %v5405_v48 }
  0xa3   :  { %4285 = vmatprep.subr.bf16.mxu0 %v6837_v30 }
  0xa6   :  { %4286 = vmatpush3.bf16.msra.mxu0 %v5426_v54 }
  0xa7   :  { %4287 = vmatprep.subr.bf16.mxu0 %v6837_v30 }
  0xaa   :  { %4288 = vmatpush3.bf16.msra.mxu0 %v5433_v56 }
  0xab   :  { %4289 = vmatprep.subr.bf16.mxu0 %v6837_v30 }
  0xae   :  { %4290 = vmatpush3.bf16.msra.mxu0 %v5440_v57 }
  0xaf   :  { %4295 = vmatprep.subr.bf16.mxu0 %v6837_v30 }
 0x111   :  { %v5497_v63 = vpop.f32.mrf.mxu0 }
 0x112   :  { %v4241_v1 = vpop.f32.mrf.mxu1 }
 0x113   :  { %v5500_v2 = vadd.f32 %v4241_v1, %v5495_v62  ;;  %v5502_v3 = vpop.f32.mrf.mxu0 }
 0x114   :  { %v5504_v4 = vpop.f32.mrf.mxu1 }
 0x115   :  { %v5508_v6 = vpop.f32.mrf.mxu0 }
 0x116   :  { %v4242_v7 = vpop.f32.mrf.mxu1 }
 0x117   :  { %v5513_v9 = vadd.f32 %v4242_v7, %v5495_v62  ;;  %v5515_v10 = vpop.f32.mrf.mxu0 }
 0x118   :  { %v5517_v11 = vpop.f32.mrf.mxu1 }
 0x119   :  { %v428_v13 = vpop.f32.mrf.mxu0 }
 0x11a   :  { %v4245_v14 = vpop.f32.mrf.mxu1  ;;  %v5526_v16 = vadd.f32 %v428_v13, %v5520_v12 }
 0x11b   :  { %v5529_v17 = vadd.f32 %v4245_v14, %v5495_v62  ;;  %v430_v18 = vpop.f32.mrf.mxu0 }
 0x11c   :  { %v547_v19 = vpop.f32.mrf.mxu1  ;;  %v5532_v20 = vadd.f32 %v430_v18, %v5523_v15 }
 0x11d   :  { %6848 = vst [vmem:[#allocation17_spill] sm:$0xff] %v5529_v17  ;;  %v5535_v21 = vadd.f32 %v547_v19, %v5495_v62  ;;  %v432_v22 = vpop.f32.mrf.mxu0 }
 0x11e   :  { %v4246_v23 = vpop.f32.mrf.mxu1  ;;  %v5538_v24 = vadd.f32 %v432_v22, %v5520_v12 }
 0x11f   :  { %v5541_v25 = vadd.f32 %v4246_v23, %v5495_v62  ;;  %v434_v27 = vpop.f32.mrf.mxu0 }
 0x120   :  { %v550_v32 = vpop.f32.mrf.mxu1  ;;  %v5544_v36 = vadd.f32 %v434_v27, %v5523_v15 }
 0x121   :  { %6849 = vst [vmem:[#allocation18_spill] sm:$0xff] %v5541_v25  ;;  %v5547_v39 = vadd.f32 %v550_v32, %v5495_v62  ;;  %v438_v42 = vpop.f32.mrf.mxu0 }
 0x122   :  { %v4249_v47 = vpop.f32.mrf.mxu1  ;;  %v5550_v51 = vadd.f32 %v438_v42, %v5520_v12 }
 0x123   :  { %v5553_v58 = vadd.f32 %v4249_v47, %v5495_v62  ;;  %v440_v59 = vpop.f32.mrf.mxu0 }
 0x124   :  { %v563_v61 = vpop.f32.mrf.mxu1  ;;  %v5556_v1 = vadd.f32 %v440_v59, %v5523_v15 }
 0x125   :  { %6850 = vst [vmem:[#allocation19_spill] sm:$0xff] %v5553_v58  ;;  %v5559_v7 = vadd.f32 %v563_v61, %v5495_v62  ;;  %v442_v13 = vpop.f32.mrf.mxu0 }
 0x126   :  { %v4250_v14 = vpop.f32.mrf.mxu1  ;;  %v5562_v18 = vadd.f32 %v442_v13, %v5520_v12 }
 0x127   :  { %6851 = vst [vmem:[#allocation20_spill] sm:$0xff] %v5559_v7  ;;  %v5565_v19 = vadd.f32 %v4250_v14, %v5495_v62  ;;  %v444_v22 = vpop.f32.mrf.mxu0  ;;  %v5582_v14 = vld [vmem:[%s6827_s4] sm:$0x7] }
 0x128   :  { %v566_v23 = vpop.f32.mrf.mxu1  ;;  %v5568_v27 = vadd.f32 %v444_v22, %v5523_v15 }
 0x129   :  { %6852 = vst [vmem:[#allocation21_spill] sm:$0xff] %v5565_v19  ;;  %v5571_v32 = vadd.f32 %v566_v23, %v5495_v62  ;;  %v448_v42 = vpop.f32.mrf.mxu0 }
 0x12a   :  { %v4253_v47 = vpop.f32.mrf.mxu1  ;;  %v5574_v59 = vadd.f32 %v448_v42, %v5520_v12 }
 0x12b   :  { %6853 = vst [vmem:[#allocation22_spill] sm:$0xff] %v5571_v32  ;;  %v5577_v61 = vadd.f32 %v4253_v47, %v5495_v62  ;;  %v450_v13 = vpop.f32.mrf.mxu0 }
 0x12c   :  { %v579_v0 = vpop.f32.mrf.mxu1  ;;  %v5585_v22 = vadd.f32 %v450_v13, %v5523_v15 }
 0x12d   :  { %6854 = vst [vmem:[#allocation23_spill] sm:$0xff] %v5577_v61  ;;  %v5588_v23 = vadd.f32 %v579_v0, %v5495_v62  ;;  %v452_v30 = vpop.f32.mrf.mxu0  ;;  %v5598_v61 = vrot.slane %v5582_v14, %v5506_v5 }
 0x12e   :  { %6855 = vst [vmem:[#allocation24_spill] sm:$0xff] %v5585_v22  ;;  %v4254_v19 = vpop.f32.mrf.mxu1  ;;  %v5591_v42 = vadd.f32 %v452_v30, %v5520_v12  ;;  %v419_v30 = vadd.f32 %v5497_v63, %v5520_v12  ;;  %v423_v63 = vadd.f32 %v5508_v6, %v5520_v12  ;;  %v421_v6 = vadd.f32 %v5502_v3, %v5523_v15 }
 0x12f   :  { %6856 = vst [vmem:[#allocation25_spill] sm:$0xff] %v5588_v23  ;;  %v5594_v47 = vadd.f32 %v4254_v19, %v5495_v62  ;;  %v454_v58 = vpop.f32.mrf.mxu0 }
 0x130   :  { %6857 = vst [vmem:[#allocation26_spill] sm:$0xff] %v5591_v42  ;;  %v582_v32 = vpop.f32.mrf.mxu1  ;;  %v5601_v13 = vadd.f32 %v454_v58, %v5523_v15  ;;  %v5617_v58 = vrot.slane %v5582_v14, %v5510_v8 }
 0x131   :  { %6858 = vst [vmem:[#allocation27_spill] sm:$0xff] %v5594_v47  ;;  %v5604_v0 = vadd.f32 %v582_v32, %v5495_v62  ;;  %v458_v23 = vpop.f32.mrf.mxu0 }
 0x132   :  { %6859 = vst [vmem:[#allocation28_spill] sm:$0xff] %v5601_v13  ;;  %v810_v7 = vpop.f32.mrf.mxu1  ;;  %v5609_v19 = vadd.f32 %v458_v23, %v5520_v12 }
 0x133   :  { %6860 = vst [vmem:[#allocation29_spill] sm:$0xff] %v5604_v0  ;;  %v811_v47 = vadd.f32 %v810_v7, %v5598_v61  ;;  %v460_v5 = vpop.f32.mrf.mxu0 }
 0x134   :  { %6861 = vst [vmem:[#allocation30_spill] sm:$0xff] %v5609_v19  ;;  %v812_v25 = vpop.f32.mrf.mxu1  ;;  %v5613_v22 = vadd.f32 %v460_v5, %v5523_v15 }
 0x135   :  { %v860_v17 = vadd.f32 %v811_v47, %v419_v30  ;;  %v462_v32 = vpop.f32.mrf.mxu0  ;;  %v813_v5 = vadd.f32 %v812_v25, %v5617_v58 }
 0x136   :  { %6862 = vst [vmem:[#allocation31_spill] sm:$0xff] %v5613_v22  ;;  %v814_v0 = vpop.f32.mrf.mxu1  ;;  %v5622_v23 = vadd.f32 %v462_v32, %v5520_v12 }
 0x137   :  { %v3837_v13 = vmul.f32 -1.442695, %v860_v17  ;;  %v815_v7 = vadd.f32 %v814_v0, %v5598_v61  ;;  %v464_v19 = vpop.f32.mrf.mxu0  ;;  %v425_v0 = vadd.f32 %v5515_v10, %v5523_v15 }
 0x138   :  { %6863 = vst [vmem:[#allocation32_spill] sm:$0xff] %v5622_v23  ;;  %v816_v47 = vpop.f32.mrf.mxu1  ;;  %v5627_v8 = vadd.f32 %v464_v19, %v5523_v15  ;;  %v874_v23 = vadd.f32 %v813_v5, %v421_v6 }
 0x139   :  { %4788 = vpow2.f32 %v3837_v13  ;;  %v861_v30 = vadd.f32 %v815_v7, %v423_v63  ;;  %v817_v22 = vadd.f32 %v816_v47, %v5617_v58  ;;  %v468_v42 = vpop.f32.mrf.mxu0 }
 0x13a   :  { %v5633_v32 = vadd.f32 %v468_v42, %v5520_v12  ;;  %v3839_v3 = vmul.f32 -1.442695, %v874_v23 }
 0x13b   :  { %v3838_v17 = vmul.f32 -1.442695, %v861_v30  ;;  %v470_v13 = vpop.f32.mrf.mxu0  ;;  %v875_v19 = vadd.f32 %v817_v22, %v425_v0 }
 0x13c   :  { %6864 = vst [vmem:[#allocation33_spill] sm:$0xff] %v5633_v32  ;;  %v5638_v25 = vadd.f32 %v470_v13, %v5523_v15 }
 0x13d   :  { %4790 = vpow2.f32 %v3838_v17  ;;  %v472_v63 = vpop.f32.mrf.mxu0  ;;  %v3840_v42 = vmul.f32 -1.442695, %v875_v19 }
 0x13e   :  { %v5641_v7 = vadd.f32 %v472_v63, %v5520_v12  ;;  %4792 = vpow2.f32 %v3839_v3 }
 0x13f   :  { %v474_v47 = vpop.f32.mrf.mxu0  ;;  %4794 = vpow2.f32 %v3840_v42 }
 0x140   :  { %v5644_v30 = vadd.f32 %v474_v47, %v5523_v15 }
 0x141   :  { %v478_v32 = vpop.f32.mrf.mxu0 }
 0x142   :  { %6865 = vst [vmem:[#allocation34_spill] sm:$0xff] %v5644_v30  ;;  %v5647_v10 = vadd.f32 %v478_v32, %v5520_v12 }
 0x143   :  { %v480_v5 = vpop.f32.mrf.mxu0 }
 0x144   :  { %6866 = vst [vmem:[#allocation35_spill] sm:$0xff] %v5647_v10  ;;  %v5650_v6 = vadd.f32 %v480_v5, %v5523_v15 }
 0x145   :  { %v482_v17 = vpop.f32.mrf.mxu0 }
 0x146   :  { %6867 = vst [vmem:[#allocation36_spill] sm:$0xff] %v5650_v6  ;;  %v4789_v22 = vpop.eup %4788  ;;  %v5653_v13 = vadd.f32 %v482_v17, %v5520_v12 }
 0x147   :  { %v868_v0 = vadd.f32 1.0, %v4789_v22  ;;  %v484_v23 = vpop.f32.mrf.mxu0 }
 0x148   :  { %6868 = vst [vmem:[#allocation37_spill] sm:$0xff] %v5653_v13  ;;  %v5656_v19 = vadd.f32 %v484_v23, %v5523_v15 }
 0x149   :  { %4796 = vrcp.f32 %v868_v0  ;;  %v488_v32 = vpop.f32.mrf.mxu0  ;;  %v5669_v0 = vrot.slane %v5582_v14, %v5489_v60 }
 0x14a   :  { %6869 = vst [vmem:[#allocation38_spill] sm:$0xff] %v5656_v19  ;;  %v4791_v63 = vpop.eup %4790  ;;  %v5659_v3 = vadd.f32 %v488_v32, %v5520_v12 }
 0x14b   :  { %v869_v47 = vadd.f32 1.0, %v4791_v63  ;;  %v490_v5 = vpop.f32.mrf.mxu0  ;;  %v4793_v63 = vpop.eup %4792 }
 0x14c   :  { %6870 = vst [vmem:[#allocation39_spill] sm:$0xff] %v5659_v3  ;;  %v5662_v42 = vadd.f32 %v490_v5, %v5523_v15  ;;  %v4795_v3 = vpop.eup %4794  ;;  %v882_v5 = vadd.f32 1.0, %v4793_v63 }
 0x14d   :  { %4798 = vrcp.f32 %v869_v47  ;;  %v492_v22 = vpop.f32.mrf.mxu0  ;;  %v883_v13 = vadd.f32 1.0, %v4795_v3 }
 0x14e   :  { %6871 = vst [vmem:[#allocation40_spill] sm:$0xff] %v5662_v42  ;;  %v5665_v17 = vadd.f32 %v492_v22, %v5520_v12  ;;  %v532_v12 = vadd.f32 %v5504_v4, %v5495_v62  ;;  %4800 = vrcp.f32 %v882_v5 }
 0x14f   :  { %v494_v23 = vpop.f32.mrf.mxu0  ;;  %4802 = vrcp.f32 %v883_v13 }
 0x150   :  { %6872 = vst [vmem:[#allocation41_spill] sm:$0xff] %v5665_v17  ;;  %v5672_v19 = vadd.f32 %v494_v23, %v5523_v15 }
 0x151   :  { %v853_v32 = vpop.f32.mrf.mxu0 }
 0x152   :  { %6873 = vst [vmem:[#allocation42_spill] sm:$0xff] %v5672_v19  ;;  %v854_v47 = vadd.f32 %v853_v32, %v5669_v0  ;;  %v535_v19 = vadd.f32 %v5517_v11, %v5495_v62  ;;  %v6874_v62 = vmov 0.0   ;;  %v6875_v11 = vmov 0  }
 0x153   :  { %v4273_v6 = vpop.f32.mrf.mxu0 }
 0x155   :  { %v856_v10 = vpop.f32.mrf.mxu0 }
 0x156   :  { %v4797_v42 = vpop.eup %4796  ;;  %v857_v15 = vadd.f32 %v856_v10, %v5669_v0 }
 0x157   :  { %v888_v22 = vmul.f32 %v4797_v42, %v854_v47  ;;  %v4274_v14 = vpop.f32.mrf.mxu0 }
 0x159   :  { %v890_v60 = vadd.f32 %v888_v22, %v532_v12 }
 0x15a   :  { %v4799_v23 = vpop.eup %4798 }
 0x15b   :  { %4804 = vtanh.f32 %v890_v60  ;;  %v889_v6 = vmul.f32 %v4799_v23, %v857_v15  ;;  %v4801_v3 = vpop.eup %4800 }
 0x15c   :  { %v4803_v32 = vpop.eup %4802  ;;  %v894_v30 = vsub.f32 1.0, %v4801_v3  ;;  %v898_v12 = vmul.f32 0.0, %v4801_v3 }
 0x15d   :  { %v891_v63 = vadd.f32 %v889_v6, %v535_v19  ;;  %v895_v4 = vsub.f32 1.0, %v4803_v32  ;;  %v899_v22 = vmul.f32 0.0, %v4803_v32 }
 0x15f   :  { %4806 = vtanh.f32 %v891_v63 }
 0x168   :  { %v4805_v17 = vpop.eup %4804 }
 0x169   :  { %v896_v42 = vmul.f32 %v4805_v17, %v894_v30 }
 0x16b   :  { %v5680_v10 = vadd.f32 %v898_v12, %v896_v42 }
 0x16c   :  { %v4807_v47 = vpop.eup %4806 }
 0x16d   :  { %v897_v5 = vmul.f32 %v4807_v47, %v895_v4 }
 0x16f   :  { %v5682_v13 = vadd.f32 %v899_v22, %v897_v5 }
 0x171   :  { %v902_v60 = vpack.c.bf16 %v5682_v13, %v5680_v10 }
 0x173   :  { %4002 = vst [vmem:[#allocation3] sm:$0xff] %v902_v60   ;;  %952 = vmatmul.mubr.bf16.vlgmr.msra.gmra.mxu1 %v902_v60  ;;  %4292 = vmatmul.mubr.bf16.vlgmr.msra.gmra.mxu0 %v902_v60 }
 0x174   :  { %1064 = vmatpush1.bf16.msra.mxu1 %v5344_v28  ;;  %4296 = vmatpush3.bf16.msra.mxu0 %v5346_v29 }
 0x175   :  { %1065 = vmatprep.subr.bf16.mxu1 %v5350_v31  ;;  %4297 = vmatprep.subr.bf16.mxu0 %v6874_v62 }
 0x176   :  { %1095 = vmatprep.mubr.bf16.mxu1 %v6875_v11  ;;  %4311 = vmatprep.mubr.msk.bf16.mxu0 %vm5250_vm0, %v6874_v62 }
 0x178   :  { %1066 = vmatpush1.bf16.msra.mxu1 %v5355_v33  ;;  %4298 = vmatpush3.bf16.msra.mxu0 %v5359_v34 }
 0x179   :  { %1067 = vmatprep.subr.bf16.mxu1 %v5363_v35  ;;  %4299 = vmatprep.subr.bf16.mxu0 %v6874_v62 }
 0x17c   :  { %1068 = vmatpush1.bf16.msra.mxu1 %v5369_v37  ;;  %4300 = vmatpush3.bf16.msra.mxu0 %v5380_v40 }
 0x17d   :  { %1069 = vmatprep.subr.bf16.mxu1 %v5373_v38  ;;  %4301 = vmatprep.subr.bf16.mxu0 %v6874_v62 }
 0x180   :  { %1070 = vmatpush1.bf16.msra.mxu1 %v5383_v41  ;;  %4302 = vmatpush3.bf16.msra.mxu0 %v5392_v44 }
 0x181   :  { %1071 = vmatprep.subr.bf16.mxu1 %v5390_v43  ;;  %4303 = vmatprep.subr.bf16.mxu0 %v6874_v62 }
 0x184   :  { %1072 = vmatpush1.bf16.msra.mxu1 %v5394_v45  ;;  %4304 = vmatpush3.bf16.msra.mxu0 %v5405_v48 }
 0x185   :  { %1073 = vmatprep.subr.bf16.mxu1 %v5397_v46  ;;  %4305 = vmatprep.subr.bf16.mxu0 %v6874_v62 }
 0x188   :  { %1074 = vmatpush1.bf16.msra.mxu1 %v5407_v49  ;;  %4306 = vmatpush3.bf16.msra.mxu0 %v5426_v54 }
 0x189   :  { %1075 = vmatprep.subr.bf16.mxu1 %v5410_v50  ;;  %4307 = vmatprep.subr.bf16.mxu0 %v6874_v62 }
 0x18c   :  { %1076 = vmatpush1.bf16.msra.mxu1 %v5418_v52  ;;  %4308 = vmatpush3.bf16.msra.mxu0 %v5433_v56 }
 0x18d   :  { %1077 = vmatprep.subr.bf16.mxu1 %v5421_v53  ;;  %4309 = vmatprep.subr.bf16.mxu0 %v6874_v62 }
 0x190   :  { %1078 = vmatpush1.bf16.msra.mxu1 %v5429_v55  ;;  %4310 = vmatpush3.bf16.msra.mxu0 %v5440_v57 }
 0x191   :  { %1207 = vmatprep.subr.bf16.mxu1 %v5339_v26  ;;  %4315 = vmatprep.subr.bf16.mxu0 %v6874_v62 }
 0x233   :  { %v953_v30 = vpop.f32.mrf.mxu1  ;;  %v996_v19 = vpop.f32.mrf.mxu0 }
 0x234   :  { %v954_v17 = vadd.f32 %v953_v30, %v5598_v61 }
 0x235   :  { %v955_v14 = vpop.f32.mrf.mxu1  ;;  %v4293_v15 = vpop.f32.mrf.mxu0 }
 0x236   :  { %v1003_v23 = vadd.f32 %v954_v17, %v5526_v16  ;;  %v956_v32 = vadd.f32 %v955_v14, %v5617_v58 }
 0x237   :  { %v957_v6 = vpop.f32.mrf.mxu1  ;;  %v999_v63 = vpop.f32.mrf.mxu0 }
 0x238   :  { %v3843_v3 = vmul.f32 -1.442695, %v1003_v23  ;;  %v958_v4 = vadd.f32 %v957_v6, %v5598_v61  ;;  %v1017_v12 = vadd.f32 %v956_v32, %v5532_v20 }
 0x239   :  { %v959_v42 = vpop.f32.mrf.mxu1  ;;  %v4294_v47 = vpop.f32.mrf.mxu0 }
 0x23a   :  { %4808 = vpow2.f32 %v3843_v3  ;;  %v1004_v26 = vadd.f32 %v958_v4, %v5538_v24  ;;  %v960_v5 = vadd.f32 %v959_v42, %v5617_v58  ;;  %v3845_v60 = vmul.f32 -1.442695, %v1017_v12 }
 0x23b   :  { %v997_v4 = vadd.f32 %v996_v19, %v5669_v0  ;;  %v1000_v47 = vadd.f32 %v999_v63, %v5669_v0 }
 0x23c   :  { %v3844_v22 = vmul.f32 -1.442695, %v1004_v26  ;;  %v1018_v16 = vadd.f32 %v960_v5, %v5544_v36 }
 0x23e   :  { %4810 = vpow2.f32 %v3844_v22  ;;  %v3846_v30 = vmul.f32 -1.442695, %v1018_v16 }
 0x23f   :  { %4812 = vpow2.f32 %v3845_v60 }
 0x240   :  { %4814 = vpow2.f32 %v3846_v30 }
 0x247   :  { %v4809_v17 = vpop.eup %4808 }
 0x248   :  { %v1011_v14 = vadd.f32 1.0, %v4809_v17 }
 0x24a   :  { %4816 = vrcp.f32 %v1011_v14 }
 0x24b   :  { %v4811_v15 = vpop.eup %4810 }
 0x24c   :  { %v1012_v23 = vadd.f32 1.0, %v4811_v15  ;;  %v4813_v6 = vpop.eup %4812 }
 0x24d   :  { %v4815_v24 = vpop.eup %4814  ;;  %v1025_v3 = vadd.f32 1.0, %v4813_v6 }
 0x24e   :  { %4818 = vrcp.f32 %v1012_v23  ;;  %v1026_v32 = vadd.f32 1.0, %v4815_v24 }
 0x24f   :  { %4820 = vrcp.f32 %v1025_v3 }
 0x250   :  { %4822 = vrcp.f32 %v1026_v32 }
 0x257   :  { %v4817_v20 = vpop.eup %4816 }
 0x258   :  { %v1031_v42 = vmul.f32 %v4817_v20, %v997_v4 }
 0x25a   :  { %v1033_v36 = vadd.f32 %v1031_v42, %v5500_v2 }
 0x25b   :  { %v4819_v26 = vpop.eup %4818 }
 0x25c   :  { %4824 = vtanh.f32 %v1033_v36  ;;  %v1032_v5 = vmul.f32 %v4819_v26, %v1000_v47  ;;  %v4821_v22 = vpop.eup %4820 }
 0x25d   :  { %v4823_v16 = vpop.eup %4822  ;;  %v1037_v60 = vsub.f32 1.0, %v4821_v22  ;;  %v1041_v17 = vmul.f32 %v4821_v22, %v5680_v10 }
 0x25e   :  { %v1034_v12 = vadd.f32 %v1032_v5, %v5513_v9  ;;  %v1038_v14 = vsub.f32 1.0, %v4823_v16  ;;  %v1042_v63 = vmul.f32 %v4823_v16, %v5682_v13 }
 0x260   :  { %4826 = vtanh.f32 %v1034_v12 }
 0x269   :  { %v4825_v30 = vpop.eup %4824 }
 0x26a   :  { %v1039_v19 = vmul.f32 %v4825_v30, %v1037_v60 }
 0x26c   :  { %v5734_v15 = vadd.f32 %v1041_v17, %v1039_v19 }
 0x26d   :  { %v4827_v2 = vpop.eup %4826 }
 0x26e   :  { %v1040_v23 = vmul.f32 %v4827_v2, %v1038_v14 }
 0x270   :  { %v5737_v6 = vadd.f32 %v1042_v63, %v1040_v23 }
 0x272   :  { %v1045_v9 = vpack.c.bf16 %v5737_v6, %v5734_v15 }
 0x274   :  { %4007 = vst [vmem:[#allocation3 + $0x8] sm:$0xff] %v1045_v9   ;;  %1096 = vmatmul.mubr.bf16.vlgmr.msra.gmra.mxu1 %v1045_v9  ;;  %4312 = vmatmul.mubr.bf16.vlgmr.msra.gmra.mxu0 %v1045_v9 }
 0x275   :  { %1208 = vmatpush1.bf16.msra.mxu1 %v5344_v28  ;;  %4316 = vmatpush3.bf16.msra.mxu0 %v5346_v29  ;;  %v5774_v28 = vld [vmem:[#allocation6 + $0xac] ss:$12 sps:$4 sm:$0xff]  }
 0x276   :  { %1209 = vmatprep.subr.bf16.mxu1 %v5350_v31  ;;  %4317 = vmatprep.subr.bf16.mxu0 %v6874_v62 }
 0x277   :  { %1239 = vmatprep.mubr.bf16.mxu1 %v6875_v11  ;;  %4331 = vmatprep.mubr.msk.bf16.mxu0 %vm5250_vm0, %v6874_v62 }
 0x279   :  { %1210 = vmatpush1.bf16.msra.mxu1 %v5355_v33  ;;  %4318 = vmatpush3.bf16.msra.mxu0 %v5359_v34 }
 0x27a   :  { %1211 = vmatprep.subr.bf16.mxu1 %v5363_v35  ;;  %4319 = vmatprep.subr.bf16.mxu0 %v6874_v62 }
 0x27d   :  { %1212 = vmatpush1.bf16.msra.mxu1 %v5369_v37  ;;  %4320 = vmatpush3.bf16.msra.mxu0 %v5380_v40 }
 0x27e   :  { %1213 = vmatprep.subr.bf16.mxu1 %v5373_v38  ;;  %4321 = vmatprep.subr.bf16.mxu0 %v6874_v62 }
 0x281   :  { %1214 = vmatpush1.bf16.msra.mxu1 %v5383_v41  ;;  %4322 = vmatpush3.bf16.msra.mxu0 %v5392_v44 }
 0x282   :  { %1215 = vmatprep.subr.bf16.mxu1 %v5390_v43  ;;  %4323 = vmatprep.subr.bf16.mxu0 %v6874_v62 }
 0x285   :  { %1216 = vmatpush1.bf16.msra.mxu1 %v5394_v45  ;;  %4324 = vmatpush3.bf16.msra.mxu0 %v5405_v48 }
 0x286   :  { %1217 = vmatprep.subr.bf16.mxu1 %v5397_v46  ;;  %4325 = vmatprep.subr.bf16.mxu0 %v6874_v62 }
 0x289   :  { %1218 = vmatpush1.bf16.msra.mxu1 %v5407_v49  ;;  %4326 = vmatpush3.bf16.msra.mxu0 %v5426_v54 }
 0x28a   :  { %1219 = vmatprep.subr.bf16.mxu1 %v5410_v50  ;;  %4327 = vmatprep.subr.bf16.mxu0 %v6874_v62 }
 0x28d   :  { %1220 = vmatpush1.bf16.msra.mxu1 %v5418_v52  ;;  %4328 = vmatpush3.bf16.msra.mxu0 %v5433_v56 }
 0x28e   :  { %1221 = vmatprep.subr.bf16.mxu1 %v5421_v53  ;;  %4329 = vmatprep.subr.bf16.mxu0 %v6874_v62 }
 0x291   :  { %1222 = vmatpush1.bf16.msra.mxu1 %v5429_v55  ;;  %4330 = vmatpush3.bf16.msra.mxu0 %v5440_v57 }
 0x292   :  { %1351 = vmatprep.subr.bf16.mxu1 %v5774_v28  ;;  %4335 = vmatprep.subr.bf16.mxu0 %v6874_v62 }
 0x334   :  { %v1097_v29 = vpop.f32.mrf.mxu1  ;;  %v1140_v31 = vpop.f32.mrf.mxu0 }
 0x335   :  { %v1098_v33 = vadd.f32 %v1097_v29, %v5598_v61  ;;  %v1141_v42 = vadd.f32 %v1140_v31, %v5669_v0  ;;  %v5798_v31 = vld [vmem:[#allocation6 + $0xa8] ss:$12 sps:$4 sm:$0xff]  }
 0x336   :  { %v1099_v34 = vpop.f32.mrf.mxu1  ;;  %v4313_v35 = vpop.f32.mrf.mxu0 }
 0x337   :  { %v1147_v37 = vadd.f32 %v1098_v33, %v5550_v51  ;;  %v1100_v43 = vadd.f32 %v1099_v34, %v5617_v58  ;;  %v5804_v33 = vld [vmem:[#allocation6 + $0x94] ss:$12 sps:$4 sm:$0xff]   ;;  %v5814_v34 = vld [vmem:[#allocation6 + $0x98] ss:$12 sps:$4 sm:$0xff]   ;;  %v5817_v35 = vld [vmem:[#allocation6 + $0x7c] ss:$12 sps:$4 sm:$0xff]  }
 0x338   :  { %v1101_v38 = vpop.f32.mrf.mxu1  ;;  %v1143_v40 = vpop.f32.mrf.mxu0 }
 0x339   :  { %v3849_v41 = vmul.f32 -1.442695, %v1147_v37  ;;  %v1102_v44 = vadd.f32 %v1101_v38, %v5598_v61  ;;  %v1161_v50 = vadd.f32 %v1100_v43, %v5556_v1  ;;  %v1144_v26 = vadd.f32 %v1143_v40, %v5669_v0  ;;  %v5821_v37 = vld [vmem:[#allocation6 + $0x78] ss:$12 sps:$4 sm:$0xff]   ;;  %v5824_v38 = vld [vmem:[#allocation6 + $0x80] ss:$12 sps:$4 sm:$0xff]  }
 0x33a   :  { %v1103_v45 = vpop.f32.mrf.mxu1  ;;  %v4314_v46 = vpop.f32.mrf.mxu0  ;;  %v5827_v40 = vld [vmem:[#allocation6 + $0x64] ss:$12 sps:$4 sm:$0xff]   ;;  %v5834_v43 = vld [vmem:[#allocation6 + $0x68] ss:$12 sps:$4 sm:$0xff]  }
 0x33b   :  { %4828 = vpow2.f32 %v3849_v41  ;;  %v1148_v48 = vadd.f32 %v1102_v44, %v5562_v18  ;;  %v1104_v49 = vadd.f32 %v1103_v45, %v5617_v58  ;;  %v3851_v51 = vmul.f32 -1.442695, %v1161_v50  ;;  %v5831_v41 = vld [vmem:[#allocation6 + $0x60] ss:$12 sps:$4 sm:$0xff]   ;;  %v5841_v45 = vld [vmem:[#allocation6 + $0x48] ss:$12 sps:$4 sm:$0xff]  }
 0x33c   :  { %v5837_v44 = vld [vmem:[#allocation6 + $0x4c] ss:$12 sps:$4 sm:$0xff]   ;;  %v5844_v46 = vld [vmem:[#allocation6 + $0x50] ss:$12 sps:$4 sm:$0xff]  }
 0x33d   :  { %v3850_v52 = vmul.f32 -1.442695, %v1148_v48  ;;  %v1162_v53 = vadd.f32 %v1104_v49, %v5568_v27  ;;  %v5847_v48 = vld [vmem:[#allocation6 + $0x34] ss:$12 sps:$4 sm:$0xff]   ;;  %v5851_v49 = vld [vmem:[#allocation6 + $0x30] ss:$12 sps:$4 sm:$0xff]  }
 0x33e   :  { %v5855_v50 = vld [vmem:[#allocation6 + $0x1c] ss:$12 sps:$4 sm:$0xff]  }
 0x33f   :  { %4830 = vpow2.f32 %v3850_v52  ;;  %v3852_v10 = vmul.f32 -1.442695, %v1162_v53  ;;  %v5859_v52 = vld [vmem:[#allocation6 + $0x18] ss:$12 sps:$4 sm:$0xff]  }
 0x340   :  { %4832 = vpow2.f32 %v3851_v51  ;;  %v5863_v53 = vld [vmem:[#allocation6 + $0x4] ss:$12 sps:$4 sm:$0xff]  }
 0x341   :  { %4834 = vpow2.f32 %v3852_v10 }
 0x348   :  { %v4829_v13 = vpop.eup %4828 }
 0x349   :  { %v1155_v24 = vadd.f32 1.0, %v4829_v13 }
 0x34b   :  { %4836 = vrcp.f32 %v1155_v24 }
 0x34c   :  { %v4831_v3 = vpop.eup %4830 }
 0x34d   :  { %v1156_v4 = vadd.f32 1.0, %v4831_v3  ;;  %v4833_v20 = vpop.eup %4832 }
 0x34e   :  { %v4835_v18 = vpop.eup %4834  ;;  %v1169_v32 = vadd.f32 1.0, %v4833_v20 }
 0x34f   :  { %4838 = vrcp.f32 %v1156_v4  ;;  %v1170_v36 = vadd.f32 1.0, %v4835_v18 }
 0x350   :  { %4840 = vrcp.f32 %v1169_v32 }
 0x351   :  { %4842 = vrcp.f32 %v1170_v36 }
 0x358   :  { %v4837_v1 = vpop.eup %4836 }
 0x359   :  { %v1175_v47 = vmul.f32 %v4837_v1, %v1141_v42  ;;  %v6876_v42 = vld [vmem:[#allocation26_spill] sm:$0xff] }
 0x35b   :  { %v1177_v27 = vadd.f32 %v1175_v47, %v5535_v21  ;;  %v6877_v47 = vld [vmem:[#allocation24_spill] sm:$0xff] }
 0x35c   :  { %v4839_v5 = vpop.eup %4838 }
 0x35d   :  { %4844 = vtanh.f32 %v1177_v27  ;;  %v1176_v12 = vmul.f32 %v4839_v5, %v1144_v26  ;;  %v4841_v16 = vpop.eup %4840  ;;  %v6878_v5 = vld [vmem:[#allocation28_spill] sm:$0xff] }
 0x35e   :  { %v4843_v60 = vpop.eup %4842  ;;  %v1181_v30 = vsub.f32 1.0, %v4841_v16  ;;  %v1185_v14 = vmul.f32 %v4841_v16, %v5734_v15  ;;  %v5801_v15 = vld [vmem:[#allocation6 + $0xb0] ss:$12 sps:$4 sm:$0xff]  }
 0x35f   :  { %v1178_v22 = vadd.f32 %v1176_v12, %v5547_v39  ;;  %v1182_v2 = vsub.f32 1.0, %v4843_v60  ;;  %v1186_v9 = vmul.f32 %v4843_v60, %v5737_v6  ;;  %v5811_v6 = vld [vmem:[#allocation6 + $0x90] ss:$12 sps:$4 sm:$0xff]  }
 0x361   :  { %4846 = vtanh.f32 %v1178_v22 }
 0x36a   :  { %v4845_v19 = vpop.eup %4844 }
 0x36b   :  { %v1183_v17 = vmul.f32 %v4845_v19, %v1181_v30 }
 0x36d   :  { %v5791_v23 = vadd.f32 %v1185_v14, %v1183_v17 }
 0x36e   :  { %v4847_v21 = vpop.eup %4846 }
 0x36f   :  { %v1184_v63 = vmul.f32 %v4847_v21, %v1182_v2 }
 0x371   :  { %v5794_v29 = vadd.f32 %v1186_v9, %v1184_v63 }
 0x373   :  { %v1189_v39 = vpack.c.bf16 %v5794_v29, %v5791_v23 }
 0x375   :  { %4012 = vst [vmem:[#allocation3 + $0x10] sm:$0xff] %v1189_v39   ;;  %1240 = vmatmul.mubr.bf16.vlgmr.msra.gmra.mxu1 %v1189_v39  ;;  %4332 = vmatmul.mubr.bf16.vlgmr.msra.gmra.mxu0 %v1189_v39 }
 0x376   :  { %1352 = vmatpush1.bf16.msra.mxu1 %v5798_v31  ;;  %4336 = vmatpush3.bf16.msra.mxu0 %v5801_v15 }
 0x377   :  { %1353 = vmatprep.subr.bf16.mxu1 %v5804_v33  ;;  %4337 = vmatprep.subr.bf16.mxu0 %v6874_v62 }
 0x378   :  { %1383 = vmatprep.mubr.bf16.mxu1 %v6875_v11  ;;  %4351 = vmatprep.mubr.msk.bf16.mxu0 %vm5250_vm0, %v6874_v62 }
 0x37a   :  { %1354 = vmatpush1.bf16.msra.mxu1 %v5811_v6  ;;  %4338 = vmatpush3.bf16.msra.mxu0 %v5814_v34 }
 0x37b   :  { %1355 = vmatprep.subr.bf16.mxu1 %v5817_v35  ;;  %4339 = vmatprep.subr.bf16.mxu0 %v6874_v62 }
 0x37e   :  { %1356 = vmatpush1.bf16.msra.mxu1 %v5821_v37  ;;  %4340 = vmatpush3.bf16.msra.mxu0 %v5824_v38 }
 0x37f   :  { %1357 = vmatprep.subr.bf16.mxu1 %v5827_v40  ;;  %4341 = vmatprep.subr.bf16.mxu0 %v6874_v62 }
 0x382   :  { %1358 = vmatpush1.bf16.msra.mxu1 %v5831_v41  ;;  %4342 = vmatpush3.bf16.msra.mxu0 %v5834_v43 }
 0x383   :  { %1359 = vmatprep.subr.bf16.mxu1 %v5837_v44  ;;  %4343 = vmatprep.subr.bf16.mxu0 %v6874_v62 }
 0x386   :  { %1360 = vmatpush1.bf16.msra.mxu1 %v5841_v45  ;;  %4344 = vmatpush3.bf16.msra.mxu0 %v5844_v46 }
 0x387   :  { %1361 = vmatprep.subr.bf16.mxu1 %v5847_v48  ;;  %4345 = vmatprep.subr.bf16.mxu0 %v6874_v62 }
 0x38a   :  { %1362 = vmatpush1.bf16.msra.mxu1 %v5851_v49  ;;  %4346 = vmatpush3.bf16.msra.mxu0 %v5426_v54 }
 0x38b   :  { %1363 = vmatprep.subr.bf16.mxu1 %v5855_v50  ;;  %4347 = vmatprep.subr.bf16.mxu0 %v6874_v62 }
 0x38e   :  { %1364 = vmatpush1.bf16.msra.mxu1 %v5859_v52  ;;  %4348 = vmatpush3.bf16.msra.mxu0 %v5433_v56 }
 0x38f   :  { %1365 = vmatprep.subr.bf16.mxu1 %v5863_v53  ;;  %4349 = vmatprep.subr.bf16.mxu0 %v6874_v62 }
 0x392   :  { %1366 = vmatpush1.bf16.msra.mxu1 %v5429_v55  ;;  %4350 = vmatpush3.bf16.msra.mxu0 %v5440_v57 }
 0x393   :  { %1495 = vmatprep.subr.bf16.mxu1 %v5774_v28  ;;  %4355 = vmatprep.subr.bf16.mxu0 %v6874_v62 }
 0x435   :  { %v1241_v54 = vpop.f32.mrf.mxu1  ;;  %v1284_v51 = vpop.f32.mrf.mxu0 }
 0x436   :  { %v1242_v10 = vadd.f32 %v1241_v54, %v5598_v61  ;;  %v1285_v21 = vadd.f32 %v1284_v51, %v5669_v0  ;;  %v6879_v54 = vld [vmem:[#allocation17_spill] sm:$0xff] }
 0x437   :  { %v1243_v13 = vpop.f32.mrf.mxu1  ;;  %v4333_v56 = vpop.f32.mrf.mxu0 }
 0x438   :  { %v1291_v24 = vadd.f32 %v1242_v10, %v5574_v59  ;;  %v1244_v18 = vadd.f32 %v1243_v13, %v5617_v58 }
 0x439   :  { %v1245_v3 = vpop.f32.mrf.mxu1  ;;  %v1287_v4 = vpop.f32.mrf.mxu0 }
 0x43a   :  { %v3855_v20 = vmul.f32 -1.442695, %v1291_v24  ;;  %v1246_v55 = vadd.f32 %v1245_v3, %v5598_v61  ;;  %v1305_v27 = vadd.f32 %v1244_v18, %v6877_v47  ;;  %v1288_v13 = vadd.f32 %v1287_v4, %v5669_v0  ;;  %v6880_v3 = vld [vmem:[#allocation18_spill] sm:$0xff] }
 0x43b   :  { %v1247_v57 = vpop.f32.mrf.mxu1  ;;  %v4334_v32 = vpop.f32.mrf.mxu0 }
 0x43c   :  { %4848 = vpow2.f32 %v3855_v20  ;;  %v1292_v1 = vadd.f32 %v1246_v55, %v6876_v42  ;;  %v1248_v36 = vadd.f32 %v1247_v57, %v5617_v58  ;;  %v3857_v12 = vmul.f32 -1.442695, %v1305_v27 }
 0x43e   :  { %v3856_v26 = vmul.f32 -1.442695, %v1292_v1  ;;  %v1306_v59 = vadd.f32 %v1248_v36, %v6878_v5 }
 0x440   :  { %4850 = vpow2.f32 %v3856_v26  ;;  %v3858_v22 = vmul.f32 -1.442695, %v1306_v59  ;;  %v5926_v59 = vld [vmem:[#allocation6] ss:$12 sps:$4 sm:$0xff]  }
 0x441   :  { %4852 = vpow2.f32 %v3857_v12  ;;  %v5929_v12 = vld [vmem:[#allocation6 + $0x8] ss:$12 sps:$4 sm:$0xff]  }
 0x442   :  { %4854 = vpow2.f32 %v3858_v22 }
 0x449   :  { %v4849_v16 = vpop.eup %4848 }
 0x44a   :  { %v1299_v60 = vadd.f32 1.0, %v4849_v16 }
 0x44c   :  { %4856 = vrcp.f32 %v1299_v60 }
 0x44d   :  { %v4851_v30 = vpop.eup %4850 }
 0x44e   :  { %v1300_v19 = vadd.f32 1.0, %v4851_v30  ;;  %v4853_v17 = vpop.eup %4852 }
 0x44f   :  { %v4855_v14 = vpop.eup %4854  ;;  %v1313_v2 = vadd.f32 1.0, %v4853_v17  ;;  %v6881_v17 = vld [vmem:[#allocation30_spill] sm:$0xff] }
 0x450   :  { %4858 = vrcp.f32 %v1300_v19  ;;  %v1314_v9 = vadd.f32 1.0, %v4855_v14 }
 0x451   :  { %4860 = vrcp.f32 %v1313_v2 }
 0x452   :  { %4862 = vrcp.f32 %v1314_v9 }
 0x459   :  { %v4857_v63 = vpop.eup %4856 }
 0x45a   :  { %v1319_v39 = vmul.f32 %v4857_v63, %v1285_v21 }
 0x45c   :  { %v1321_v10 = vadd.f32 %v1319_v39, %v6879_v54 }
 0x45d   :  { %v4859_v56 = vpop.eup %4858 }
 0x45e   :  { %4864 = vtanh.f32 %v1321_v10  ;;  %v1320_v24 = vmul.f32 %v4859_v56, %v1288_v13  ;;  %v4861_v18 = vpop.eup %4860  ;;  %v6882_v13 = vld [vmem:[#allocation32_spill] sm:$0xff] }
 0x45f   :  { %v4863_v55 = vpop.eup %4862  ;;  %v1325_v57 = vsub.f32 1.0, %v4861_v18  ;;  %v1329_v42 = vmul.f32 %v4861_v18, %v5791_v23  ;;  %v5915_v23 = vld [vmem:[#allocation6 + $0x38] ss:$12 sps:$4 sm:$0xff]  }
 0x460   :  { %v1322_v20 = vadd.f32 %v1320_v24, %v6880_v3  ;;  %v1326_v1 = vsub.f32 1.0, %v4863_v55  ;;  %v1330_v4 = vmul.f32 %v4863_v55, %v5794_v29  ;;  %v5921_v29 = vld [vmem:[#allocation6 + $0x20] ss:$12 sps:$4 sm:$0xff]  }
 0x461   :  { %v6883_v3 = vld [vmem:[#allocation31_spill] sm:$0xff] }
 0x462   :  { %4866 = vtanh.f32 %v1322_v20 }
 0x46b   :  { %v4865_v32 = vpop.eup %4864 }
 0x46c   :  { %v1327_v51 = vmul.f32 %v4865_v32, %v1325_v57 }
 0x46e   :  { %v5884_v36 = vadd.f32 %v1329_v42, %v1327_v51 }
 0x46f   :  { %v4867_v47 = vpop.eup %4866 }
 0x470   :  { %v1328_v27 = vmul.f32 %v4867_v47, %v1326_v1 }
 0x472   :  { %v5887_v26 = vadd.f32 %v1330_v4, %v1328_v27 }
 0x474   :  { %v1333_v5 = vpack.c.bf16 %v5887_v26, %v5884_v36 }
 0x476   :  { %4017 = vst [vmem:[#allocation3 + $0x18] sm:$0xff] %v1333_v5   ;;  %1384 = vmatmul.mubr.bf16.vlgmr.msra.gmra.mxu1 %v1333_v5  ;;  %4352 = vmatmul.mubr.bf16.vlgmr.msra.gmra.mxu0 %v1333_v5 }
 0x477   :  { %1496 = vmatpush1.bf16.msra.mxu1 %v5798_v31  ;;  %4356 = vmatpush3.bf16.msra.mxu0 %v5801_v15 }
 0x478   :  { %1497 = vmatprep.subr.bf16.mxu1 %v5804_v33  ;;  %4357 = vmatprep.subr.bf16.mxu0 %v6874_v62 }
 0x479   :  { %1527 = vmatprep.mubr.bf16.mxu1 %v6875_v11  ;;  %4371 = vmatprep.mubr.msk.bf16.mxu0 %vm5250_vm0, %v6874_v62 }
 0x47b   :  { %1498 = vmatpush1.bf16.msra.mxu1 %v5811_v6  ;;  %4358 = vmatpush3.bf16.msra.mxu0 %v5814_v34 }
 0x47c   :  { %1499 = vmatprep.subr.bf16.mxu1 %v5817_v35  ;;  %4359 = vmatprep.subr.bf16.mxu0 %v6874_v62 }
 0x47f   :  { %1500 = vmatpush1.bf16.msra.mxu1 %v5821_v37  ;;  %4360 = vmatpush3.bf16.msra.mxu0 %v5824_v38 }
 0x480   :  { %1501 = vmatprep.subr.bf16.mxu1 %v5827_v40  ;;  %4361 = vmatprep.subr.bf16.mxu0 %v6874_v62 }
 0x483   :  { %1502 = vmatpush1.bf16.msra.mxu1 %v5831_v41  ;;  %4362 = vmatpush3.bf16.msra.mxu0 %v5834_v43 }
 0x484   :  { %1503 = vmatprep.subr.bf16.mxu1 %v5837_v44  ;;  %4363 = vmatprep.subr.bf16.mxu0 %v6874_v62 }
 0x487   :  { %1504 = vmatpush1.bf16.msra.mxu1 %v5841_v45  ;;  %4364 = vmatpush3.bf16.msra.mxu0 %v5844_v46 }
 0x488   :  { %1505 = vmatprep.subr.bf16.mxu1 %v5847_v48  ;;  %4365 = vmatprep.subr.bf16.mxu0 %v6874_v62 }
 0x48b   :  { %1506 = vmatpush1.bf16.msra.mxu1 %v5851_v49  ;;  %4366 = vmatpush3.bf16.msra.mxu0 %v5915_v23 }
 0x48c   :  { %1507 = vmatprep.subr.bf16.mxu1 %v5855_v50  ;;  %4367 = vmatprep.subr.bf16.mxu0 %v6874_v62 }
 0x48f   :  { %1508 = vmatpush1.bf16.msra.mxu1 %v5859_v52  ;;  %4368 = vmatpush3.bf16.msra.mxu0 %v5921_v29 }
 0x490   :  { %1509 = vmatprep.subr.bf16.mxu1 %v5863_v53  ;;  %4369 = vmatprep.subr.bf16.mxu0 %v6874_v62 }
 0x493   :  { %1510 = vmatpush1.bf16.msra.mxu1 %v5926_v59  ;;  %4370 = vmatpush3.bf16.msra.mxu0 %v5929_v12 }
 0x494   :  { %1639 = vmatprep.subr.bf16.mxu1 %v5774_v28  ;;  %4375 = vmatprep.subr.bf16.mxu0 %v6874_v62 }
 0x536   :  { %v1385_v22 = vpop.f32.mrf.mxu1  ;;  %v1428_v16 = vpop.f32.mrf.mxu0 }
 0x537   :  { %v1386_v60 = vadd.f32 %v1385_v22, %v5598_v61  ;;  %v1429_v22 = vadd.f32 %v1428_v16, %v5669_v0 }
 0x538   :  { %v1387_v30 = vpop.f32.mrf.mxu1  ;;  %v4353_v19 = vpop.f32.mrf.mxu0 }
 0x539   :  { %v1435_v14 = vadd.f32 %v1386_v60, %v6881_v17  ;;  %v1388_v9 = vadd.f32 %v1387_v30, %v5617_v58 }
 0x53a   :  { %v1389_v2 = vpop.f32.mrf.mxu1  ;;  %v1431_v21 = vpop.f32.mrf.mxu0 }
 0x53b   :  { %v3861_v63 = vmul.f32 -1.442695, %v1435_v14  ;;  %v1390_v39 = vadd.f32 %v1389_v2, %v5598_v61  ;;  %v1449_v20 = vadd.f32 %v1388_v9, %v6883_v3  ;;  %v1432_v14 = vadd.f32 %v1431_v21, %v5669_v0  ;;  %v6885_v9 = vld [vmem:[#allocation22_spill] sm:$0xff] }
 0x53c   :  { %v1391_v54 = vpop.f32.mrf.mxu1  ;;  %v4354_v10 = vpop.f32.mrf.mxu0 }
 0x53d   :  { %4868 = vpow2.f32 %v3861_v63  ;;  %v1436_v56 = vadd.f32 %v1390_v39, %v6882_v13  ;;  %v1392_v24 = vadd.f32 %v1391_v54, %v5617_v58  ;;  %v3863_v57 = vmul.f32 -1.442695, %v1449_v20 }
 0x53f   :  { %v3862_v18 = vmul.f32 -1.442695, %v1436_v56  ;;  %v1450_v55 = vadd.f32 %v1392_v24, %v5627_v8  ;;  %v6884_v8 = vld [vmem:[#allocation20_spill] sm:$0xff] }
 0x541   :  { %4870 = vpow2.f32 %v3862_v18  ;;  %v3864_v32 = vmul.f32 -1.442695, %v1450_v55 }
 0x542   :  { %4872 = vpow2.f32 %v3863_v57 }
 0x543   :  { %4874 = vpow2.f32 %v3864_v32 }
 0x54a   :  { %v4869_v51 = vpop.eup %4868 }
 0x54b   :  { %v1443_v42 = vadd.f32 1.0, %v4869_v51 }
 0x54d   :  { %4876 = vrcp.f32 %v1443_v42 }
 0x54e   :  { %v4871_v1 = vpop.eup %4870 }
 0x54f   :  { %v1444_v47 = vadd.f32 1.0, %v4871_v1  ;;  %v4873_v27 = vpop.eup %4872 }
 0x550   :  { %v4875_v4 = vpop.eup %4874  ;;  %v1457_v5 = vadd.f32 1.0, %v4873_v27 }
 0x551   :  { %4878 = vrcp.f32 %v1444_v47  ;;  %v1458_v30 = vadd.f32 1.0, %v4875_v4  ;;  %v6886_v47 = vld [vmem:[#allocation33_spill] sm:$0xff] }
 0x552   :  { %4880 = vrcp.f32 %v1457_v5 }
 0x553   :  { %4882 = vrcp.f32 %v1458_v30 }
 0x55a   :  { %v4877_v60 = vpop.eup %4876 }
 0x55b   :  { %v1463_v19 = vmul.f32 %v4877_v60, %v1429_v22 }
 0x55d   :  { %v1465_v17 = vadd.f32 %v1463_v19, %v6884_v8 }
 0x55e   :  { %v4879_v2 = vpop.eup %4878 }
 0x55f   :  { %4884 = vtanh.f32 %v1465_v17  ;;  %v1464_v63 = vmul.f32 %v4879_v2, %v1432_v14  ;;  %v4881_v54 = vpop.eup %4880 }
 0x560   :  { %v4883_v10 = vpop.eup %4882  ;;  %v1469_v13 = vsub.f32 1.0, %v4881_v54  ;;  %v1473_v24 = vmul.f32 %v4881_v54, %v5884_v36 }
 0x561   :  { %v1466_v39 = vadd.f32 %v1464_v63, %v6885_v9  ;;  %v1470_v3 = vsub.f32 1.0, %v4883_v10  ;;  %v1474_v21 = vmul.f32 %v4883_v10, %v5887_v26  ;;  %v6887_v63 = vld [vmem:[#allocation34_spill] sm:$0xff] }
 0x563   :  { %4886 = vtanh.f32 %v1466_v39 }
 0x56c   :  { %v4885_v56 = vpop.eup %4884 }
 0x56d   :  { %v1471_v16 = vmul.f32 %v4885_v56, %v1469_v13 }
 0x56f   :  { %v5947_v20 = vadd.f32 %v1473_v24, %v1471_v16 }
 0x570   :  { %v4887_v18 = vpop.eup %4886 }
 0x571   :  { %v1472_v55 = vmul.f32 %v4887_v18, %v1470_v3 }
 0x573   :  { %v5950_v57 = vadd.f32 %v1474_v21, %v1472_v55 }
 0x575   :  { %v1477_v32 = vpack.c.bf16 %v5950_v57, %v5947_v20 }
 0x577   :  { %4022 = vst [vmem:[#allocation3 + $0x20] sm:$0xff] %v1477_v32   ;;  %1528 = vmatmul.mubr.bf16.vlgmr.msra.gmra.mxu1 %v1477_v32  ;;  %4372 = vmatmul.mubr.bf16.vlgmr.msra.gmra.mxu0 %v1477_v32  ;;  %v6888_v32 = vld [vmem:[#allocation19_spill] sm:$0xff] }
 0x578   :  { %1640 = vmatpush1.bf16.msra.mxu1 %v5798_v31  ;;  %4376 = vmatpush3.bf16.msra.mxu0 %v5801_v15 }
 0x579   :  { %1641 = vmatprep.subr.bf16.mxu1 %v5804_v33  ;;  %4377 = vmatprep.subr.bf16.mxu0 %v6874_v62 }
 0x57a   :  { %1671 = vmatprep.mubr.bf16.mxu1 %v6875_v11  ;;  %4391 = vmatprep.mubr.msk.bf16.mxu0 %vm5250_vm0, %v6874_v62 }
 0x57c   :  { %1642 = vmatpush1.bf16.msra.mxu1 %v5811_v6  ;;  %4378 = vmatpush3.bf16.msra.mxu0 %v5814_v34 }
 0x57d   :  { %1643 = vmatprep.subr.bf16.mxu1 %v5817_v35  ;;  %4379 = vmatprep.subr.bf16.mxu0 %v6874_v62 }
 0x580   :  { %1644 = vmatpush1.bf16.msra.mxu1 %v5821_v37  ;;  %4380 = vmatpush3.bf16.msra.mxu0 %v5824_v38 }
 0x581   :  { %1645 = vmatprep.subr.bf16.mxu1 %v5827_v40  ;;  %4381 = vmatprep.subr.bf16.mxu0 %v6874_v62 }
 0x584   :  { %1646 = vmatpush1.bf16.msra.mxu1 %v5831_v41  ;;  %4382 = vmatpush3.bf16.msra.mxu0 %v5834_v43 }
 0x585   :  { %1647 = vmatprep.subr.bf16.mxu1 %v5837_v44  ;;  %4383 = vmatprep.subr.bf16.mxu0 %v6874_v62 }
 0x588   :  { %1648 = vmatpush1.bf16.msra.mxu1 %v5841_v45  ;;  %4384 = vmatpush3.bf16.msra.mxu0 %v5844_v46 }
 0x589   :  { %1649 = vmatprep.subr.bf16.mxu1 %v5847_v48  ;;  %4385 = vmatprep.subr.bf16.mxu0 %v6874_v62 }
 0x58c   :  { %1650 = vmatpush1.bf16.msra.mxu1 %v5851_v49  ;;  %4386 = vmatpush3.bf16.msra.mxu0 %v5915_v23 }
 0x58d   :  { %1651 = vmatprep.subr.bf16.mxu1 %v5855_v50  ;;  %4387 = vmatprep.subr.bf16.mxu0 %v6874_v62 }
 0x590   :  { %1652 = vmatpush1.bf16.msra.mxu1 %v5859_v52  ;;  %4388 = vmatpush3.bf16.msra.mxu0 %v5921_v29 }
 0x591   :  { %1653 = vmatprep.subr.bf16.mxu1 %v5863_v53  ;;  %4389 = vmatprep.subr.bf16.mxu0 %v6874_v62 }
 0x594   :  { %1654 = vmatpush1.bf16.msra.mxu1 %v5926_v59  ;;  %4390 = vmatpush3.bf16.msra.mxu0 %v5929_v12 }
 0x595   :  { %1783 = vmatprep.subr.bf16.mxu1 %v5774_v28  ;;  %4395 = vmatprep.subr.bf16.mxu0 %v6874_v62 }
 0x637   :  { %v1529_v36 = vpop.f32.mrf.mxu1  ;;  %v1572_v26 = vpop.f32.mrf.mxu0 }
 0x638   :  { %v1530_v51 = vadd.f32 %v1529_v36, %v5598_v61  ;;  %v1573_v18 = vadd.f32 %v1572_v26, %v5669_v0 }
 0x639   :  { %v1531_v42 = vpop.f32.mrf.mxu1  ;;  %v4373_v1 = vpop.f32.mrf.mxu0 }
 0x63a   :  { %v1579_v27 = vadd.f32 %v1530_v51, %v6886_v47  ;;  %v1532_v60 = vadd.f32 %v1531_v42, %v5617_v58  ;;  %v6889_v47 = vld [vmem:[#allocation21_spill] sm:$0xff] }
 0x63b   :  { %v1533_v4 = vpop.f32.mrf.mxu1  ;;  %v1575_v5 = vpop.f32.mrf.mxu0 }
 0x63c   :  { %v3867_v22 = vmul.f32 -1.442695, %v1579_v27  ;;  %v1534_v30 = vadd.f32 %v1533_v4, %v5598_v61  ;;  %v1593_v14 = vadd.f32 %v1532_v60, %v5638_v25  ;;  %v1576_v51 = vadd.f32 %v1575_v5, %v5669_v0 }
 0x63d   :  { %v1535_v19 = vpop.f32.mrf.mxu1  ;;  %v4374_v8 = vpop.f32.mrf.mxu0 }
 0x63e   :  { %4888 = vpow2.f32 %v3867_v22  ;;  %v1580_v28 = vadd.f32 %v1534_v30, %v5641_v7  ;;  %v1536_v17 = vadd.f32 %v1535_v19, %v5617_v58  ;;  %v3869_v39 = vmul.f32 -1.442695, %v1593_v14 }
 0x640   :  { %v3868_v2 = vmul.f32 -1.442695, %v1580_v28  ;;  %v1594_v9 = vadd.f32 %v1536_v17, %v6887_v63 }
 0x642   :  { %4890 = vpow2.f32 %v3868_v2  ;;  %v3870_v54 = vmul.f32 -1.442695, %v1594_v9 }
 0x643   :  { %4892 = vpow2.f32 %v3869_v39 }
 0x644   :  { %4894 = vpow2.f32 %v3870_v54 }
 0x64b   :  { %v4889_v10 = vpop.eup %4888 }
 0x64c   :  { %v1587_v13 = vadd.f32 1.0, %v4889_v10 }
 0x64e   :  { %4896 = vrcp.f32 %v1587_v13 }
 0x64f   :  { %v4891_v56 = vpop.eup %4890 }
 0x650   :  { %v1588_v16 = vadd.f32 1.0, %v4891_v56  ;;  %v4893_v24 = vpop.eup %4892 }
 0x651   :  { %v4895_v7 = vpop.eup %4894  ;;  %v1601_v3 = vadd.f32 1.0, %v4893_v24 }
 0x652   :  { %4898 = vrcp.f32 %v1588_v16  ;;  %v1602_v55 = vadd.f32 1.0, %v4895_v7 }
 0x653   :  { %4900 = vrcp.f32 %v1601_v3 }
 0x654   :  { %4902 = vrcp.f32 %v1602_v55  ;;  %v6894_v55 = vld [vmem:[#allocation25_spill] sm:$0xff] }
 0x65b   :  { %v4897_v25 = vpop.eup %4896 }
 0x65c   :  { %v1607_v21 = vmul.f32 %v4897_v25, %v1573_v18 }
 0x65e   :  { %v1609_v36 = vadd.f32 %v1607_v21, %v6888_v32 }
 0x65f   :  { %v4899_v42 = vpop.eup %4898 }
 0x660   :  { %4904 = vtanh.f32 %v1609_v36  ;;  %v1608_v1 = vmul.f32 %v4899_v42, %v1576_v51  ;;  %v4901_v4 = vpop.eup %4900  ;;  %v6895_v42 = vld [vmem:[#allocation29_spill] sm:$0xff] }
 0x661   :  { %v4903_v22 = vpop.eup %4902  ;;  %v1613_v60 = vsub.f32 1.0, %v4901_v4  ;;  %v1617_v19 = vmul.f32 %v4901_v4, %v5947_v20 }
 0x662   :  { %v1610_v27 = vadd.f32 %v1608_v1, %v6889_v47  ;;  %v1614_v8 = vsub.f32 1.0, %v4903_v22  ;;  %v1618_v5 = vmul.f32 %v4903_v22, %v5950_v57 }
 0x664   :  { %4906 = vtanh.f32 %v1610_v27 }
 0x66d   :  { %v4905_v30 = vpop.eup %4904 }
 0x66e   :  { %v1615_v26 = vmul.f32 %v4905_v30, %v1613_v60 }
 0x670   :  { %v6002_v28 = vadd.f32 %v1617_v19, %v1615_v26 }
 0x671   :  { %v4907_v17 = vpop.eup %4906 }
 0x672   :  { %v1616_v14 = vmul.f32 %v4907_v17, %v1614_v8 }
 0x674   :  { %v6005_v2 = vadd.f32 %v1618_v5, %v1616_v14 }
 0x676   :  { %v1621_v63 = vpack.c.bf16 %v6005_v2, %v6002_v28 }
 0x678   :  { %4027 = vst [vmem:[#allocation3 + $0x28] sm:$0xff] %v1621_v63   ;;  %1672 = vmatmul.mubr.bf16.vlgmr.msra.gmra.mxu1 %v1621_v63  ;;  %4392 = vmatmul.mubr.bf16.vlgmr.msra.gmra.mxu0 %v1621_v63  ;;  %v4708_v63 = vld [vmem:[#allocation8 + $0xa8] ss:$12 sps:$4 sm:$0xff]  }
 0x679   :  { %1784 = vmatpush1.bf16.msra.mxu1 %v5798_v31  ;;  %4396 = vmatpush3.bf16.msra.mxu0 %v5801_v15  ;;  %v4710_v31 = vld [vmem:[#allocation8 + $0xac] ss:$12 sps:$4 sm:$0xff]   ;;  %v6042_v15 = vld [vmem:[#allocation8 + $0xb0] ss:$12 sps:$4 sm:$0xff]  }
 0x67a   :  { %1785 = vmatprep.subr.bf16.mxu1 %v5804_v33  ;;  %4397 = vmatprep.subr.bf16.mxu0 %v6874_v62 }
 0x67b   :  { %1815 = vmatprep.mubr.bf16.mxu1 %v6875_v11  ;;  %4411 = vmatprep.mubr.msk.bf16.mxu0 %vm5250_vm0, %v6874_v62 }
 0x67d   :  { %1786 = vmatpush1.bf16.msra.mxu1 %v5811_v6  ;;  %4398 = vmatpush3.bf16.msra.mxu0 %v5814_v34 }
 0x67e   :  { %1787 = vmatprep.subr.bf16.mxu1 %v5817_v35  ;;  %4399 = vmatprep.subr.bf16.mxu0 %v6874_v62 }
 0x681   :  { %1788 = vmatpush1.bf16.msra.mxu1 %v5821_v37  ;;  %4400 = vmatpush3.bf16.msra.mxu0 %v5824_v38  ;;  %v6890_v38 = vld [vmem:[#allocation35_spill] sm:$0xff] }
 0x682   :  { %1789 = vmatprep.subr.bf16.mxu1 %v5827_v40  ;;  %4401 = vmatprep.subr.bf16.mxu0 %v6874_v62 }
 0x685   :  { %1790 = vmatpush1.bf16.msra.mxu1 %v5831_v41  ;;  %4402 = vmatpush3.bf16.msra.mxu0 %v5834_v43 }
 0x686   :  { %1791 = vmatprep.subr.bf16.mxu1 %v5837_v44  ;;  %4403 = vmatprep.subr.bf16.mxu0 %v6874_v62 }
 0x689   :  { %1792 = vmatpush1.bf16.msra.mxu1 %v5841_v45  ;;  %4404 = vmatpush3.bf16.msra.mxu0 %v5844_v46 }
 0x68a   :  { %1793 = vmatprep.subr.bf16.mxu1 %v5847_v48  ;;  %4405 = vmatprep.subr.bf16.mxu0 %v6874_v62 }
 0x68d   :  { %1794 = vmatpush1.bf16.msra.mxu1 %v5851_v49  ;;  %4406 = vmatpush3.bf16.msra.mxu0 %v5915_v23  ;;  %v6892_v23 = vld [vmem:[#allocation36_spill] sm:$0xff] }
 0x68e   :  { %1795 = vmatprep.subr.bf16.mxu1 %v5855_v50  ;;  %4407 = vmatprep.subr.bf16.mxu0 %v6874_v62  ;;  %v6891_v50 = vld [vmem:[#allocation37_spill] sm:$0xff] }
 0x691   :  { %1796 = vmatpush1.bf16.msra.mxu1 %v5859_v52  ;;  %4408 = vmatpush3.bf16.msra.mxu0 %v5921_v29 }
 0x692   :  { %1797 = vmatprep.subr.bf16.mxu1 %v5863_v53  ;;  %4409 = vmatprep.subr.bf16.mxu0 %v6874_v62 }
 0x695   :  { %1798 = vmatpush1.bf16.msra.mxu1 %v5926_v59  ;;  %4410 = vmatpush3.bf16.msra.mxu0 %v5929_v12  ;;  %v6893_v12 = vld [vmem:[#allocation38_spill] sm:$0xff] }
 0x696   :  { %2210 = vmatprep.subr.bf16.mxu1 %v4710_v31  ;;  %4415 = vmatprep.subr.bf16.mxu0 %v6042_v15 }
 0x738   :  { %v1673_v33 = vpop.f32.mrf.mxu1  ;;  %v1716_v6 = vpop.f32.mrf.mxu0 }
 0x739   :  { %v1674_v34 = vadd.f32 %v1673_v33, %v5598_v61  ;;  %v1717_v7 = vadd.f32 %v1716_v6, %v5669_v0  ;;  %v4715_v33 = vld [vmem:[#allocation8 + $0x94] ss:$12 sps:$4 sm:$0xff]   ;;  %v4716_v6 = vld [vmem:[#allocation8 + $0x98] ss:$12 sps:$4 sm:$0xff]  }
 0x73a   :  { %v1675_v35 = vpop.f32.mrf.mxu1  ;;  %v4393_v37 = vpop.f32.mrf.mxu0 }
 0x73b   :  { %v1723_v40 = vadd.f32 %v1674_v34, %v6890_v38  ;;  %v1676_v45 = vadd.f32 %v1675_v35, %v5617_v58  ;;  %v4712_v34 = vld [vmem:[#allocation3] sm:$0xff]   ;;  %v4719_v35 = vld [vmem:[#allocation8 + $0x7c] ss:$12 sps:$4 sm:$0xff]  }
 0x73c   :  { %v1677_v41 = vpop.f32.mrf.mxu1  ;;  %v1719_v43 = vpop.f32.mrf.mxu0  ;;  %v4717_v37 = vld [vmem:[#allocation8 + $0x78] ss:$12 sps:$4 sm:$0xff]  }
 0x73d   :  { %v3873_v44 = vmul.f32 -1.442695, %v1723_v40  ;;  %v1678_v46 = vadd.f32 %v1677_v41, %v5598_v61  ;;  %v1737_v29 = vadd.f32 %v1676_v45, %v6892_v23  ;;  %v1720_v32 = vadd.f32 %v1719_v43, %v5669_v0  ;;  %v4723_v38 = vld [vmem:[#allocation8 + $0x64] ss:$12 sps:$4 sm:$0xff]   ;;  %v4724_v40 = vld [vmem:[#allocation8 + $0x68] ss:$12 sps:$4 sm:$0xff]  }
 0x73e   :  { %v1679_v48 = vpop.f32.mrf.mxu1  ;;  %v4394_v49 = vpop.f32.mrf.mxu0  ;;  %v4721_v41 = vld [vmem:[#allocation8 + $0x60] ss:$12 sps:$4 sm:$0xff]   ;;  %v4728_v43 = vld [vmem:[#allocation8 + $0x50] ss:$12 sps:$4 sm:$0xff]   ;;  %v4740_v23 = vld [vmem:[#allocation8 + $0x8] ss:$12 sps:$4 sm:$0xff]  }
 0x73f   :  { %4908 = vpow2.f32 %v3873_v44  ;;  %v1724_v52 = vadd.f32 %v1678_v46, %v6891_v50  ;;  %v1680_v53 = vadd.f32 %v1679_v48, %v5617_v58  ;;  %v3875_v57 = vmul.f32 -1.442695, %v1737_v29  ;;  %v4725_v44 = vld [vmem:[#allocation8 + $0x48] ss:$12 sps:$4 sm:$0xff]   ;;  %v4732_v46 = vld [vmem:[#allocation8 + $0x38] ss:$12 sps:$4 sm:$0xff]  }
 0x740   :  { %v4731_v45 = vld [vmem:[#allocation8 + $0x34] ss:$12 sps:$4 sm:$0xff]   ;;  %v4729_v48 = vld [vmem:[#allocation8 + $0x30] ss:$12 sps:$4 sm:$0xff]  }
 0x741   :  { %v3874_v59 = vmul.f32 -1.442695, %v1724_v52  ;;  %v1738_v20 = vadd.f32 %v1680_v53, %v6893_v12  ;;  %v4735_v49 = vld [vmem:[#allocation8 + $0x1c] ss:$12 sps:$4 sm:$0xff]   ;;  %v4736_v50 = vld [vmem:[#allocation8 + $0x20] ss:$12 sps:$4 sm:$0xff]  }
 0x742   :  { %v4733_v52 = vld [vmem:[#allocation8 + $0x18] ss:$12 sps:$4 sm:$0xff]   ;;  %v4737_v29 = vld [vmem:[#allocation8] ss:$12 sps:$4 sm:$0xff]   ;;  %v4742_v12 = vld [vmem:[#allocation3 + $0x10] sm:$0xff]  }
 0x743   :  { %4910 = vpow2.f32 %v3874_v59  ;;  %v3876_v9 = vmul.f32 -1.442695, %v1738_v20  ;;  %v4739_v53 = vld [vmem:[#allocation8 + $0x4] ss:$12 sps:$4 sm:$0xff]   ;;  %v4741_v59 = vld [vmem:[#allocation3 + $0x8] sm:$0xff]   ;;  %v4743_v20 = vld [vmem:[#allocation3 + $0x18] sm:$0xff]  }
 0x744   :  { %4912 = vpow2.f32 %v3875_v57  ;;  %v4744_v57 = vld [vmem:[#allocation3 + $0x20] sm:$0xff]  }
 0x745   :  { %4914 = vpow2.f32 %v3876_v9  ;;  %v4745_v9 = vld [vmem:[#allocation3 + $0x28] sm:$0xff]  }
 0x74c   :  { %v4909_v39 = vpop.eup %4908 }
 0x74d   :  { %v1731_v54 = vadd.f32 1.0, %v4909_v39 }
 0x74f   :  { %4916 = vrcp.f32 %v1731_v54  ;;  %v6075_v54 = vld [vmem:[#allocation9 + $0xac] ss:$12 sps:$4 sm:$0xff]  }
 0x750   :  { %v4911_v10 = vpop.eup %4910 }
 0x751   :  { %v1732_v13 = vadd.f32 1.0, %v4911_v10  ;;  %v4913_v56 = vpop.eup %4912  ;;  %v6077_v10 = vld [vmem:[#allocation9 + $0xa8] ss:$12 sps:$4 sm:$0xff]  }
 0x752   :  { %v4915_v16 = vpop.eup %4914  ;;  %v1745_v24 = vadd.f32 1.0, %v4913_v56  ;;  %v6083_v56 = vld [vmem:[#allocation9 + $0x90] ss:$12 sps:$4 sm:$0xff]  }
 0x753   :  { %4918 = vrcp.f32 %v1732_v13  ;;  %v1746_v18 = vadd.f32 1.0, %v4915_v16  ;;  %v6081_v13 = vld [vmem:[#allocation9 + $0x94] ss:$12 sps:$4 sm:$0xff]   ;;  %v6087_v16 = vld [vmem:[#allocation9 + $0x7c] ss:$12 sps:$4 sm:$0xff]  }
 0x754   :  { %4920 = vrcp.f32 %v1745_v24  ;;  %v6089_v24 = vld [vmem:[#allocation9 + $0x78] ss:$12 sps:$4 sm:$0xff]  }
 0x755   :  { %4922 = vrcp.f32 %v1746_v18  ;;  %v6098_v18 = vld [vmem:[#allocation9 + $0xb0] ss:$12 sps:$4 sm:$0xff]  }
 0x75c   :  { %v4917_v3 = vpop.eup %4916 }
 0x75d   :  { %v1751_v25 = vmul.f32 %v4917_v3, %v1717_v7  ;;  %v6093_v7 = vld [vmem:[#allocation9 + $0x64] ss:$12 sps:$4 sm:$0xff]   ;;  %v6095_v3 = vld [vmem:[#allocation9 + $0x60] ss:$12 sps:$4 sm:$0xff]  }
 0x75f   :  { %v1753_v21 = vadd.f32 %v1751_v25, %v6894_v55  ;;  %v6101_v25 = vld [vmem:[#allocation9 + $0x4c] ss:$12 sps:$4 sm:$0xff]  }
 0x760   :  { %v4919_v36 = vpop.eup %4918  ;;  %v6104_v55 = vld [vmem:[#allocation9 + $0x98] ss:$12 sps:$4 sm:$0xff]  }
 0x761   :  { %4924 = vtanh.f32 %v1753_v21  ;;  %v1752_v51 = vmul.f32 %v4919_v36, %v1720_v32  ;;  %v4921_v47 = vpop.eup %4920  ;;  %v6106_v21 = vld [vmem:[#allocation9 + $0x48] ss:$12 sps:$4 sm:$0xff]   ;;  %v6114_v36 = vld [vmem:[#allocation9 + $0x80] ss:$12 sps:$4 sm:$0xff]  }
 0x762   :  { %v4923_v27 = vpop.eup %4922  ;;  %v1757_v4 = vsub.f32 1.0, %v4921_v47  ;;  %v1761_v30 = vmul.f32 %v4921_v47, %v6002_v28  ;;  %v4713_v28 = vld [vmem:[#allocation8 + $0x90] ss:$12 sps:$4 sm:$0xff]   ;;  %v6111_v32 = vld [vmem:[#allocation9 + $0x34] ss:$12 sps:$4 sm:$0xff]  }
 0x763   :  { %v1754_v1 = vadd.f32 %v1752_v51, %v6895_v42  ;;  %v1758_v26 = vsub.f32 1.0, %v4923_v27  ;;  %v1762_v14 = vmul.f32 %v4923_v27, %v6005_v2  ;;  %v4720_v2 = vld [vmem:[#allocation8 + $0x80] ss:$12 sps:$4 sm:$0xff]   ;;  %v6116_v51 = vld [vmem:[#allocation9 + $0x30] ss:$12 sps:$4 sm:$0xff]  }
 0x764   :  { %v6121_v42 = vld [vmem:[#allocation9 + $0x1c] ss:$12 sps:$4 sm:$0xff]   ;;  %v6129_v47 = vld [vmem:[#allocation9 + $0x4] ss:$12 sps:$4 sm:$0xff]  }
 0x765   :  { %4926 = vtanh.f32 %v1754_v1  ;;  %v6124_v1 = vld [vmem:[#allocation9 + $0x18] ss:$12 sps:$4 sm:$0xff]   ;;  %v6131_v27 = vld [vmem:[#allocation9 + $0x68] ss:$12 sps:$4 sm:$0xff]  }
 0x76e   :  { %v4925_v22 = vpop.eup %4924 }
 0x76f   :  { %v1759_v60 = vmul.f32 %v4925_v22, %v1757_v4  ;;  %v6133_v4 = vld [vmem:[#allocation9] ss:$12 sps:$4 sm:$0xff]   ;;  %v6140_v22 = vld [vmem:[#allocation9 + $0x50] ss:$12 sps:$4 sm:$0xff]  }
 0x771   :  { %v6058_v19 = vadd.f32 %v1761_v30, %v1759_v60  ;;  %v6143_v60 = vld [vmem:[#allocation9 + $0x38] ss:$12 sps:$4 sm:$0xff]   ;;  %v6147_v30 = vld [vmem:[#allocation9 + $0x20] ss:$12 sps:$4 sm:$0xff]  }
 0x772   :  { %v4927_v8 = vpop.eup %4926 }
 0x773   :  { %v1760_v17 = vmul.f32 %v4927_v8, %v1758_v26  ;;  %v6151_v26 = vld [vmem:[#allocation9 + $0x8] ss:$12 sps:$4 sm:$0xff]  }
 0x775   :  { %v6061_v5 = vadd.f32 %v1762_v14, %v1760_v17 }
 0x777   :  { %v1765_v31 = vpack.c.bf16 %v6061_v5, %v6058_v19 }
 0x779   :  { %4032 = vst [vmem:[#allocation3 + $0x30] sm:$0xff] %v1765_v31   ;;  %1816 = vmatmul.mubr.bf16.vlgmr.msra.gmra.mxu1 %v1765_v31  ;;  %4412 = vmatmul.mubr.bf16.vlgmr.msra.gmra.mxu0 %v1765_v31 }
 0x77a   :  { %2211 = vmatpush1.bf16.msra.mxu1 %v4708_v63  ;;  %4416 = vmatpush3.bf16.msra.mxu0 %v6042_v15  ;;  %v4727_v15 = vld [vmem:[#allocation8 + $0x4c] ss:$12 sps:$4 sm:$0xff]  }
 0x77b   :  { %4431 = vmatprep.mubr.bf16.mxu0 %v4712_v34  ;;  %2212 = vmatprep.subr.bf16.mxu1 %v4715_v33  ;;  %v6896_v33 = vld [vmem:[#allocation39_spill] sm:$0xff] }
 0x77c   :  { %4417 = vmatprep.subr.bf16.mxu0 %v4716_v6  ;;  %2242 = vmatprep.mubr.bf16.mxu1 %v6875_v11 }
 0x77e   :  { %2213 = vmatpush1.bf16.msra.mxu1 %v4713_v28  ;;  %4418 = vmatpush3.bf16.msra.mxu0 %v4716_v6 }
 0x77f   :  { %2214 = vmatprep.subr.bf16.mxu1 %v4719_v35  ;;  %4419 = vmatprep.subr.bf16.mxu0 %v4720_v2 }
 0x780   :  { %v4746_v39 = vld [vmem:[#allocation3 + $0x30] sm:$0xff]  }
 0x782   :  { %2215 = vmatpush1.bf16.msra.mxu1 %v4717_v37  ;;  %4420 = vmatpush3.bf16.msra.mxu0 %v4720_v2 }
 0x783   :  { %2216 = vmatprep.subr.bf16.mxu1 %v4723_v38  ;;  %4421 = vmatprep.subr.bf16.mxu0 %v4724_v40 }
 0x786   :  { %2217 = vmatpush1.bf16.msra.mxu1 %v4721_v41  ;;  %4422 = vmatpush3.bf16.msra.mxu0 %v4724_v40  ;;  %v6897_v41 = vld [vmem:[#allocation41_spill] sm:$0xff] }
 0x787   :  { %2218 = vmatprep.subr.bf16.mxu1 %v4727_v15  ;;  %4423 = vmatprep.subr.bf16.mxu0 %v4728_v43 }
 0x78a   :  { %2219 = vmatpush1.bf16.msra.mxu1 %v4725_v44  ;;  %4424 = vmatpush3.bf16.msra.mxu0 %v4728_v43  ;;  %v6898_v44 = vld [vmem:[#allocation40_spill] sm:$0xff] }
 0x78b   :  { %2220 = vmatprep.subr.bf16.mxu1 %v4731_v45  ;;  %4425 = vmatprep.subr.bf16.mxu0 %v4732_v46 }
 0x78e   :  { %2221 = vmatpush1.bf16.msra.mxu1 %v4729_v48  ;;  %4426 = vmatpush3.bf16.msra.mxu0 %v4732_v46  ;;  %v6899_v48 = vld [vmem:[#allocation42_spill] sm:$0xff] }
 0x78f   :  { %2222 = vmatprep.subr.bf16.mxu1 %v4735_v49  ;;  %4427 = vmatprep.subr.bf16.mxu0 %v4736_v50 }
 0x792   :  { %2223 = vmatpush1.bf16.msra.mxu1 %v4733_v52  ;;  %4428 = vmatpush3.bf16.msra.mxu0 %v4736_v50 }
 0x793   :  { %2224 = vmatprep.subr.bf16.mxu1 %v4739_v53  ;;  %4429 = vmatprep.subr.bf16.mxu0 %v4740_v23 }
 0x796   :  { %2225 = vmatpush1.bf16.msra.mxu1 %v4737_v29  ;;  %4430 = vmatpush3.bf16.msra.mxu0 %v4740_v23 }
 0x797   :  { %4447 = vmatprep.subr.bf16.mxu1 %v6874_v62  ;;  %2602 = vmatprep.subr.bf16.mxu0 %v6075_v54 }
 0x799   :  { %2243 = vmatmul.mubr.bf16.vlgmr.msra.gmra.mxu1 %v4712_v34  ;;  %4432 = vmatmul.mubr.bf16.vlgmr.msra.gmra.mxu0 %v4741_v59 }
 0x79a   :  { %4435 = vmatprep.mubr.bf16.mxu0 %v4742_v12  ;;  %2252 = vmatprep.mubr.bf16.mxu1 %v6875_v11 }
 0x79b   :  { %2603 = vmatpush1.bf16.msra.mxu0 %v6077_v10  ;;  %4448 = vmatpush3.bf16.msra.mxu1 %v6098_v18 }
 0x79c   :  { %2604 = vmatprep.subr.bf16.mxu0 %v6081_v13  ;;  %4449 = vmatprep.subr.bf16.mxu1 %v6874_v62 }
 0x79f   :  { %2605 = vmatpush1.bf16.msra.mxu0 %v6083_v56  ;;  %4450 = vmatpush3.bf16.msra.mxu1 %v6104_v55 }
 0x7a0   :  { %2606 = vmatprep.subr.bf16.mxu0 %v6087_v16  ;;  %4451 = vmatprep.subr.bf16.mxu1 %v6874_v62 }
 0x7a1   :  { %2253 = vmatmul.mubr.bf16.gmra.mxu1 %v4741_v59  ;;  %4436 = vmatmul.mubr.bf16.gmra.mxu0 %v4743_v20 }
 0x7a2   :  { %4439 = vmatprep.mubr.bf16.mxu0 %v4744_v57  ;;  %2262 = vmatprep.mubr.bf16.mxu1 %v6875_v11 }
 0x7a3   :  { %2607 = vmatpush1.bf16.msra.mxu0 %v6089_v24  ;;  %4452 = vmatpush3.bf16.msra.mxu1 %v6114_v36 }
 0x7a4   :  { %2608 = vmatprep.subr.bf16.mxu0 %v6093_v7  ;;  %4453 = vmatprep.subr.bf16.mxu1 %v6874_v62 }
 0x7a7   :  { %2609 = vmatpush1.bf16.msra.mxu0 %v6095_v3  ;;  %4454 = vmatpush3.bf16.msra.mxu1 %v6131_v27 }
 0x7a8   :  { %2610 = vmatprep.subr.bf16.mxu0 %v6101_v25  ;;  %4455 = vmatprep.subr.bf16.mxu1 %v6874_v62 }
 0x7a9   :  { %2263 = vmatmul.mubr.bf16.gmra.mxu1 %v4742_v12  ;;  %4440 = vmatmul.mubr.bf16.gmra.mxu0 %v4745_v9 }
 0x7aa   :  { %4443 = vmatprep.mubr.bf16.mxu0 %v4746_v39  ;;  %2272 = vmatprep.mubr.bf16.mxu1 %v6875_v11 }
 0x7ab   :  { %2611 = vmatpush1.bf16.msra.mxu0 %v6106_v21  ;;  %4456 = vmatpush3.bf16.msra.mxu1 %v6140_v22 }
 0x7ac   :  { %2612 = vmatprep.subr.bf16.mxu0 %v6111_v32  ;;  %4457 = vmatprep.subr.bf16.mxu1 %v6874_v62 }
 0x7af   :  { %2613 = vmatpush1.bf16.msra.mxu0 %v6116_v51  ;;  %4458 = vmatpush3.bf16.msra.mxu1 %v6143_v60 }
 0x7b0   :  { %2614 = vmatprep.subr.bf16.mxu0 %v6121_v42  ;;  %4459 = vmatprep.subr.bf16.mxu1 %v6874_v62 }
 0x7b1   :  { %2273 = vmatmul.mubr.bf16.gmra.mxu1 %v4743_v20 }
 0x7b2   :  { %2282 = vmatprep.mubr.bf16.mxu1 %v6875_v11 }
 0x7b3   :  { %2615 = vmatpush1.bf16.msra.mxu0 %v6124_v1  ;;  %4460 = vmatpush3.bf16.msra.mxu1 %v6147_v30 }
 0x7b4   :  { %2616 = vmatprep.subr.bf16.mxu0 %v6129_v47  ;;  %4461 = vmatprep.subr.bf16.mxu1 %v6874_v62 }
 0x7b7   :  { %2617 = vmatpush1.bf16.msra.mxu0 %v6133_v4  ;;  %4462 = vmatpush3.bf16.msra.mxu1 %v6151_v26 }
 0x7b8   :  { %2735 = vmatprep.subr.bf16.mxu0 %v6075_v54  ;;  %4467 = vmatprep.subr.bf16.mxu1 %v6874_v62 }
 0x7b9   :  { %2283 = vmatmul.mubr.bf16.gmra.mxu1 %v4744_v57 }
 0x7ba   :  { %2292 = vmatprep.mubr.bf16.mxu1 %v6875_v11 }
 0x7c1   :  { %2293 = vmatmul.mubr.bf16.gmra.mxu1 %v4745_v9 }
 0x7c2   :  { %2302 = vmatprep.mubr.bf16.mxu1 %v6875_v11 }
 0x7c9   :  { %2303 = vmatmul.mubr.bf16.gmra.mxu1 %v4746_v39 }
 0x7ca   :  { %2312 = vmatprep.mubr.bf16.mxu1 %v6875_v11 }
 0x839   :  { %v1817_v8 = vpop.f32.mrf.mxu1  ;;  %v1860_v17 = vpop.f32.mrf.mxu0 }
 0x83a   :  { %v1818_v14 = vadd.f32 %v1817_v8, %v5598_v61  ;;  %v6900_v8 = vld [vmem:[#allocation23_spill] sm:$0xff] }
 0x83b   :  { %v1819_v63 = vpop.f32.mrf.mxu1  ;;  %v4413_v31 = vpop.f32.mrf.mxu0 }
 0x83c   :  { %v1867_v6 = vadd.f32 %v1818_v14, %v6896_v33  ;;  %v1820_v2 = vadd.f32 %v1819_v63, %v5617_v58 }
 0x83d   :  { %v1821_v34 = vpop.f32.mrf.mxu1  ;;  %v1863_v28 = vpop.f32.mrf.mxu0 }
 0x83e   :  { %v3879_v35 = vmul.f32 -1.442695, %v1867_v6  ;;  %v1822_v37 = vadd.f32 %v1821_v34, %v5598_v61  ;;  %v1881_v45 = vadd.f32 %v1820_v2, %v6898_v44  ;;  %v1864_v63 = vadd.f32 %v1863_v28, %v5669_v0  ;;  %v6901_v6 = vld [vmem:[#allocation27_spill] sm:$0xff] }
 0x83f   :  { %v1823_v38 = vpop.f32.mrf.mxu1  ;;  %v4414_v40 = vpop.f32.mrf.mxu0 }
 0x840   :  { %4928 = vpow2.f32 %v3879_v35  ;;  %v1868_v15 = vadd.f32 %v1822_v37, %v6897_v41  ;;  %v1824_v43 = vadd.f32 %v1823_v38, %v5617_v58  ;;  %v3881_v50 = vmul.f32 -1.442695, %v1881_v45 }
 0x841   :  { %v1861_v58 = vadd.f32 %v1860_v17, %v5669_v0 }
 0x842   :  { %v3880_v46 = vmul.f32 -1.442695, %v1868_v15  ;;  %v1882_v49 = vadd.f32 %v1824_v43, %v6899_v48 }
 0x844   :  { %4930 = vpow2.f32 %v3880_v46  ;;  %v3882_v52 = vmul.f32 -1.442695, %v1882_v49 }
 0x845   :  { %4932 = vpow2.f32 %v3881_v50 }
 0x846   :  { %4934 = vpow2.f32 %v3882_v52 }
 0x84d   :  { %v4929_v53 = vpop.eup %4928 }
 0x84e   :  { %v1875_v23 = vadd.f32 1.0, %v4929_v53 }
 0x850   :  { %4936 = vrcp.f32 %v1875_v23 }
 0x851   :  { %v4931_v61 = vpop.eup %4930 }
 0x852   :  { %v1876_v29 = vadd.f32 1.0, %v4931_v61  ;;  %v4933_v59 = vpop.eup %4932 }
 0x853   :  { %v4935_v12 = vpop.eup %4934  ;;  %v1889_v20 = vadd.f32 1.0, %v4933_v59 }
 0x854   :  { %4938 = vrcp.f32 %v1876_v29  ;;  %v1890_v9 = vadd.f32 1.0, %v4935_v12 }
 0x855   :  { %4940 = vrcp.f32 %v1889_v20 }
 0x856   :  { %4942 = vrcp.f32 %v1890_v9 }
 0x85d   :  { %v4937_v57 = vpop.eup %4936 }
 0x85e   :  { %v1895_v39 = vmul.f32 %v4937_v57, %v1861_v58 }
 0x860   :  { %v1897_v14 = vadd.f32 %v1895_v39, %v6900_v8  ;;  %v6238_v39 = vpop.f32.mrf.mxu0 }
 0x861   :  { %v4939_v31 = vpop.eup %4938 }
 0x862   :  { %4944 = vtanh.f32 %v1897_v14  ;;  %v1896_v33 = vmul.f32 %v4939_v31, %v1864_v63  ;;  %v4941_v35 = vpop.eup %4940  ;;  %v6242_v14 = vpop.f32.mrf.mxu0 }
 0x863   :  { %v4943_v2 = vpop.eup %4942  ;;  %v1901_v37 = vsub.f32 1.0, %v4941_v35  ;;  %v1905_v40 = vmul.f32 %v4941_v35, %v6058_v19  ;;  %v2244_v19 = vpop.f32.mrf.mxu1 }
 0x864   :  { %v1898_v34 = vadd.f32 %v1896_v33, %v6901_v6  ;;  %v1902_v15 = vsub.f32 1.0, %v4943_v2  ;;  %v1906_v0 = vmul.f32 %v4943_v2, %v6061_v5  ;;  %v6246_v31 = vpop.f32.mrf.mxu0 }
 0x865   :  { %v6210_v5 = vpop.f32.mrf.mxu1 }
 0x866   :  { %4946 = vtanh.f32 %v1898_v34  ;;  %v6250_v6 = vpop.f32.mrf.mxu0 }
 0x867   :  { %v2248_v48 = vpop.f32.mrf.mxu1 }
 0x868   :  { %v6254_v35 = vpop.f32.mrf.mxu0 }
 0x869   :  { %v6212_v49 = vpop.f32.mrf.mxu1  ;;  %6911 = vst [vmem:[#allocation22_spill] sm:$0xff] %v6254_v35 }
 0x86b   :  { %v6214_v50 = vpop.f32.mrf.mxu1 }
 0x86d   :  { %v6216_v52 = vpop.f32.mrf.mxu1 }
 0x86f   :  { %v4945_v38 = vpop.eup %4944  ;;  %v6218_v53 = vpop.f32.mrf.mxu1 }
 0x870   :  { %v1903_v17 = vmul.f32 %v4945_v38, %v1901_v37  ;;  %v6258_v37 = vpop.f32.mrf.mxu0 }
 0x871   :  { %v6220_v23 = vpop.f32.mrf.mxu1  ;;  %6913 = vst [vmem:[#allocation34_spill] sm:$0xff] %v6258_v37 }
 0x872   :  { %v1907_v41 = vadd.f32 %v1905_v40, %v1903_v17  ;;  %v6262_v17 = vpop.f32.mrf.mxu0 }
 0x873   :  { %v4947_v43 = vpop.eup %4946  ;;  %v6222_v61 = vpop.f32.mrf.mxu1  ;;  %6915 = vst [vmem:[#allocation21_spill] sm:$0xff] %v6262_v17 }
 0x874   :  { %v1904_v44 = vmul.f32 %v4947_v43, %v1902_v15 }
 0x875   :  { %v6224_v29 = vpop.f32.mrf.mxu1 }
 0x876   :  { %v1908_v28 = vadd.f32 %v1906_v0, %v1904_v44 }
 0x877   :  { %v6226_v59 = vpop.f32.mrf.mxu1 }
 0x878   :  { %v4036_v45 = vpack.c.bf16 %v1908_v28, %v1907_v41  ;;  %v6266_v41 = vpop.f32.mrf.mxu0 }
 0x879   :  { %v6228_v12 = vpop.f32.mrf.mxu1  ;;  %6917 = vst [vmem:[#allocation37_spill] sm:$0xff] %v6266_v41 }
 0x87a   :  { %4037 = vst [vmem:[#allocation3 + $0x38] sm:$0xff] %v4036_v45   ;;  %6902 = vst [vmem:[#allocation26_spill] sm:$0xff] %v6228_v12  ;;  %v6270_v43 = vpop.f32.mrf.mxu0 }
 0x87b   :  { %v6230_v20 = vpop.f32.mrf.mxu1  ;;  %6919 = vst [vmem:[#allocation38_spill] sm:$0xff] %v6270_v43 }
 0x87c   :  { %6903 = vst [vmem:[#allocation24_spill] sm:$0xff] %v6230_v20  ;;  %v6274_v0 = vpop.f32.mrf.mxu0 }
 0x87d   :  { %v6232_v58 = vpop.f32.mrf.mxu1  ;;  %6921 = vst [vmem:[#allocation29_spill] sm:$0xff] %v6274_v0 }
 0x87e   :  { %6904 = vst [vmem:[#allocation28_spill] sm:$0xff] %v6232_v58  ;;  %v6278_v45 = vpop.f32.mrf.mxu0 }
 0x87f   :  { %v6234_v57 = vpop.f32.mrf.mxu1  ;;  %6923 = vst [vmem:[#allocation41_spill] sm:$0xff] %v6278_v45 }
 0x880   :  { %6905 = vst [vmem:[#allocation17_spill] sm:$0xff] %v6234_v57 }
 0x881   :  { %v4768_v46 = vld [vmem:[#allocation3 + $0x38] sm:$0xff]   ;;  %v6236_v9 = vpop.f32.mrf.mxu1 }
 0x882   :  { %2313 = vmatmul.mubr.bf16.gmra.mxu1 %v4768_v46  ;;  %4444 = vmatmul.mubr.bf16.gmra.mxu0 %v4768_v46  ;;  %6906 = vst [vmem:[#allocation18_spill] sm:$0xff] %v6236_v9 }
 0x883   :  { %2634 = vmatprep.mubr.bf16.mxu0 %v6875_v11  ;;  %4463 = vmatprep.mubr.msk.bf16.mxu1 %vm5250_vm0, %v6874_v62  ;;  %v6240_v8 = vpop.f32.mrf.mxu1 }
 0x884   :  { %6907 = vst [vmem:[#allocation30_spill] sm:$0xff] %v6240_v8  ;;  %v6936_v8 = vld [vmem:[#allocation16_spill] sm:$0xff] }
 0x885   :  { %v6244_v63 = vpop.f32.mrf.mxu1 }
 0x886   :  { %6908 = vst [vmem:[#allocation32_spill] sm:$0xff] %v6244_v63 }
 0x887   :  { %v6248_v33 = vpop.f32.mrf.mxu1 }
 0x888   :  { %6909 = vst [vmem:[#allocation31_spill] sm:$0xff] %v6248_v33 }
 0x889   :  { %v6252_v34 = vpop.f32.mrf.mxu1 }
 0x88a   :  { %2635 = vmatmul.mubr.bf16.vlgmr.msra.gmra.mxu0 %v6875_v11  ;;  %4464 = vmatmul.mubr.bf16.vlgmr.msra.gmra.mxu1 %v6875_v11  ;;  %6910 = vst [vmem:[#allocation20_spill] sm:$0xff] %v6252_v34 }
 0x88b   :  { %2736 = vmatpush1.bf16.msra.mxu0 %v6077_v10  ;;  %4468 = vmatpush3.bf16.msra.mxu1 %v6098_v18  ;;  %v6256_v2 = vpop.f32.mrf.mxu1 }
 0x88c   :  { %2737 = vmatprep.subr.bf16.mxu0 %v6081_v13  ;;  %4469 = vmatprep.subr.bf16.mxu1 %v6874_v62  ;;  %6912 = vst [vmem:[#allocation33_spill] sm:$0xff] %v6256_v2 }
 0x88d   :  { %2767 = vmatprep.mubr.bf16.mxu0 %v6875_v11  ;;  %4483 = vmatprep.mubr.msk.bf16.mxu1 %vm5250_vm0, %v6874_v62  ;;  %v6260_v38 = vpop.f32.mrf.mxu1 }
 0x88e   :  { %6914 = vst [vmem:[#allocation19_spill] sm:$0xff] %v6260_v38  ;;  %v6282_v38 = vpop.f32.mrf.mxu0 }
 0x88f   :  { %2738 = vmatpush1.bf16.msra.mxu0 %v6083_v56  ;;  %4470 = vmatpush3.bf16.msra.mxu1 %v6104_v55  ;;  %v6264_v40 = vpop.f32.mrf.mxu1  ;;  %6925 = vst [vmem:[#allocation42_spill] sm:$0xff] %v6282_v38 }
 0x890   :  { %2739 = vmatprep.subr.bf16.mxu0 %v6087_v16  ;;  %4471 = vmatprep.subr.bf16.mxu1 %v6874_v62  ;;  %6916 = vst [vmem:[#allocation35_spill] sm:$0xff] %v6264_v40 }
 0x891   :  { %v6268_v15 = vpop.f32.mrf.mxu1 }
 0x892   :  { %6918 = vst [vmem:[#allocation36_spill] sm:$0xff] %v6268_v15 }
 0x893   :  { %2740 = vmatpush1.bf16.msra.mxu0 %v6089_v24  ;;  %4472 = vmatpush3.bf16.msra.mxu1 %v6114_v36  ;;  %v6272_v44 = vpop.f32.mrf.mxu1 }
 0x894   :  { %2741 = vmatprep.subr.bf16.mxu0 %v6093_v7  ;;  %4473 = vmatprep.subr.bf16.mxu1 %v6874_v62  ;;  %6920 = vst [vmem:[#allocation25_spill] sm:$0xff] %v6272_v44  ;;  %v1984_v44 = vld [vmem:[%s6830_s7] sm:$0x7] }
 0x895   :  { %v6276_v28 = vpop.f32.mrf.mxu1  ;;  %v6320_v35 = vrot.slane %v1984_v44, %v6936_v8 }
 0x896   :  { %6922 = vst [vmem:[#allocation39_spill] sm:$0xff] %v6276_v28  ;;  %v1985_v28 = vld [vmem:[%s6831_s8] sm:$0x7] }
 0x897   :  { %2742 = vmatpush1.bf16.msra.mxu0 %v6095_v3  ;;  %4474 = vmatpush3.bf16.msra.mxu1 %v6131_v27  ;;  %v6280_v46 = vpop.f32.mrf.mxu1  ;;  %v2247_v41 = vadd.f32 %v6210_v5, %v6320_v35 }
 0x898   :  { %2743 = vmatprep.subr.bf16.mxu0 %v6101_v25  ;;  %4475 = vmatprep.subr.bf16.mxu1 %v6874_v62  ;;  %6924 = vst [vmem:[#allocation40_spill] sm:$0xff] %v6280_v46 }
 0x899   :  { %v6284_v2 = vpop.f32.mrf.mxu1 }
 0x89a   :  { %6926 = vst [vmem:[#allocation23_spill] sm:$0xff] %v6284_v2  ;;  %v6933_v2 = vld [vmem:[#allocation15_spill] sm:$0xff] }
 0x89b   :  { %2744 = vmatpush1.bf16.msra.mxu0 %v6106_v21  ;;  %4476 = vmatpush3.bf16.msra.mxu1 %v6140_v22 }
 0x89c   :  { %2745 = vmatprep.subr.bf16.mxu0 %v6111_v32  ;;  %4477 = vmatprep.subr.bf16.mxu1 %v6874_v62 }
 0x89f   :  { %2746 = vmatpush1.bf16.msra.mxu0 %v6116_v51  ;;  %4478 = vmatpush3.bf16.msra.mxu1 %v6143_v60 }
 0x8a0   :  { %2747 = vmatprep.subr.bf16.mxu0 %v6121_v42  ;;  %4479 = vmatprep.subr.bf16.mxu1 %v6874_v62 }
 0x8a3   :  { %2748 = vmatpush1.bf16.msra.mxu0 %v6124_v1  ;;  %4480 = vmatpush3.bf16.msra.mxu1 %v6147_v30 }
 0x8a4   :  { %2749 = vmatprep.subr.bf16.mxu0 %v6129_v47  ;;  %4481 = vmatprep.subr.bf16.mxu1 %v6874_v62 }
 0x8a7   :  { %2750 = vmatpush1.bf16.msra.mxu0 %v6133_v4  ;;  %4482 = vmatpush3.bf16.msra.mxu1 %v6151_v26 }
 0x8a8   :  { %2868 = vmatprep.subr.bf16.mxu0 %v6075_v54  ;;  %4487 = vmatprep.subr.bf16.mxu1 %v6874_v62 }
 0x942   :  { %v6286_v40 = vpop.f32.mrf.mxu1  ;;  %v6288_v34 = vpop.f32.mrf.mxu0 }
 0x943   :  { %6927 = vst [vmem:[#allocation27_spill] sm:$0xff] %v6286_v40  ;;  %6928 = vst [vmem:[#allocation43_spill] sm:$0xff] %v6288_v34  ;;  %v6305_v40 = vrot.slane %v1984_v44, %v6933_v2  ;;  %v6308_v34 = vrot.slane %v1985_v28, %v6933_v2 }
 0x944   :  { %v6293_v43 = vpop.f32.mrf.mxu1  ;;  %v6295_v15 = vpop.f32.mrf.mxu0 }
 0x945   :  { %6929 = vst [vmem:[#allocation44_spill] sm:$0xff] %v6293_v43  ;;  %6930 = vst [vmem:[#allocation45_spill] sm:$0xff] %v6295_v15  ;;  %v2245_v63 = vadd.f32 %v2244_v19, %v6305_v40 }
 0x946   :  { %v6300_v46 = vpop.f32.mrf.mxu1  ;;  %v6302_v45 = vpop.f32.mrf.mxu0 }
 0x947   :  { %6931 = vst [vmem:[#allocation46_spill] sm:$0xff] %v6300_v46  ;;  %6932 = vst [vmem:[#allocation47_spill] sm:$0xff] %v6302_v45  ;;  %v6317_v46 = vrot.slane %v1985_v28, %v6936_v8 }
 0x948   :  { %v6310_v38 = vpop.f32.mrf.mxu1  ;;  %v6312_v0 = vpop.f32.mrf.mxu0 }
 0x949   :  { %6934 = vst [vmem:[#allocation15_spill] sm:$0xff] %v6310_v38  ;;  %6935 = vst [vmem:[#allocation48_spill] sm:$0xff] %v6312_v0  ;;  %v2249_v38 = vadd.f32 %v2248_v48, %v6305_v40 }
 0x94a   :  { %v2636_v43 = vpop.f32.mrf.mxu0  ;;  %v2679_v15 = vpop.f32.mrf.mxu1 }
 0x94b   :  { %v2637_v33 = vadd.f32 %v2636_v43, %v6308_v34 }
 0x94c   :  { %v2638_v45 = vpop.f32.mrf.mxu0  ;;  %v4465_v17 = vpop.f32.mrf.mxu1 }
 0x94d   :  { %v2686_v2 = vadd.f32 %v2637_v33, %v2245_v63  ;;  %v2639_v57 = vadd.f32 %v2638_v45, %v6317_v46  ;;  %v2251_v33 = vadd.f32 %v6212_v49, %v6320_v35 }
 0x94e   :  { %v2640_v9 = vpop.f32.mrf.mxu0  ;;  %v2682_v58 = vpop.f32.mrf.mxu1 }
 0x94f   :  { %v3941_v0 = vmul.f32 -1.442695, %v2686_v2  ;;  %v2641_v19 = vadd.f32 %v2640_v9, %v6308_v34  ;;  %v2700_v37 = vadd.f32 %v2639_v57, %v2247_v41 }
 0x950   :  { %v2642_v20 = vpop.f32.mrf.mxu0  ;;  %v4466_v43 = vpop.f32.mrf.mxu1 }
 0x951   :  { %4948 = vpow2.f32 %v3941_v0  ;;  %v2687_v17 = vadd.f32 %v2641_v19, %v2249_v38  ;;  %v2643_v8 = vadd.f32 %v2642_v20, %v6317_v46  ;;  %v3943_v2 = vmul.f32 -1.442695, %v2700_v37  ;;  %v6937_v38 = vld [vmem:[#allocation14_spill] sm:$0xff] }
 0x952   :  { %v6331_v0 = vrot.slane %v1985_v28, %v6937_v38  ;;  %v6335_v19 = vrot.slane %v1984_v44, %v6937_v38 }
 0x953   :  { %v3942_v63 = vmul.f32 -1.442695, %v2687_v17  ;;  %v2701_v48 = vadd.f32 %v2643_v8, %v2251_v33 }
 0x954   :  { %v2680_v49 = vadd.f32 %v2679_v15, %v6331_v0  ;;  %v2358_v8 = vadd.f32 %v6242_v14, %v6335_v19  ;;  %v2683_v33 = vadd.f32 %v2682_v58, %v6331_v0 }
 0x955   :  { %4950 = vpow2.f32 %v3942_v63  ;;  %v3944_v45 = vmul.f32 -1.442695, %v2701_v48  ;;  %v2361_v48 = vadd.f32 %v6250_v6, %v6335_v19 }
 0x956   :  { %4952 = vpow2.f32 %v3943_v2 }
 0x957   :  { %4954 = vpow2.f32 %v3944_v45 }
 0x95e   :  { %v4949_v9 = vpop.eup %4948 }
 0x95f   :  { %v2694_v43 = vadd.f32 1.0, %v4949_v9 }
 0x961   :  { %4956 = vrcp.f32 %v2694_v43 }
 0x962   :  { %v4951_v12 = vpop.eup %4950 }
 0x963   :  { %v2695_v5 = vadd.f32 1.0, %v4951_v12  ;;  %v4953_v20 = vpop.eup %4952 }
 0x964   :  { %v4955_v57 = vpop.eup %4954  ;;  %v2708_v41 = vadd.f32 1.0, %v4953_v20 }
 0x965   :  { %4958 = vrcp.f32 %v2695_v5  ;;  %v2709_v17 = vadd.f32 1.0, %v4955_v57 }
 0x966   :  { %4960 = vrcp.f32 %v2708_v41 }
 0x967   :  { %4962 = vrcp.f32 %v2709_v17 }
 0x96e   :  { %v4957_v37 = vpop.eup %4956 }
 0x96f   :  { %v2714_v63 = vmul.f32 %v4957_v37, %v2680_v49 }
 0x971   :  { %v2716_v12 = vadd.f32 %v2714_v63, %v2358_v8  ;;  %v2255_v8 = vadd.f32 %v6214_v50, %v6305_v40  ;;  %v2257_v50 = vadd.f32 %v6216_v52, %v6320_v35 }
 0x972   :  { %v4959_v28 = vpop.eup %4958 }
 0x973   :  { %4964 = vtanh.f32 %v2716_v12  ;;  %v2715_v15 = vmul.f32 %v4959_v28, %v2683_v33  ;;  %v4961_v44 = vpop.eup %4960 }
 0x974   :  { %v4963_v45 = vpop.eup %4962  ;;  %v2720_v9 = vsub.f32 1.0, %v4961_v44  ;;  %v2724_v14 = vmul.f32 0.0, %v4961_v44 }
 0x975   :  { %v2717_v2 = vadd.f32 %v2715_v15, %v2361_v48  ;;  %v2721_v38 = vsub.f32 1.0, %v4963_v45  ;;  %v2725_v41 = vmul.f32 0.0, %v4963_v45 }
 0x977   :  { %4966 = vtanh.f32 %v2717_v2  ;;  %v2259_v2 = vadd.f32 %v6218_v53, %v6305_v40 }
 0x980   :  { %v4965_v43 = vpop.eup %4964 }
 0x981   :  { %v2722_v5 = vmul.f32 %v4965_v43, %v2720_v9 }
 0x983   :  { %v6342_v20 = vadd.f32 %v2724_v14, %v2722_v5 }
 0x984   :  { %v4967_v57 = vpop.eup %4966 }
 0x985   :  { %v2723_v58 = vmul.f32 %v4967_v57, %v2721_v38 }
 0x987   :  { %v6344_v49 = vadd.f32 %v2725_v41, %v2723_v58  ;;  %v2261_v41 = vadd.f32 %v6220_v23, %v6320_v35  ;;  %v2366_v23 = vadd.f32 %v6238_v39, %v6335_v19 }
 0x989   :  { %v2734_v6 = vpack.c.bf16 %v6344_v49, %v6342_v20 }
 0x98b   :  { %2768 = vmatmul.mubr.bf16.vlgmr.msra.gmra.mxu0 %v2734_v6  ;;  %4484 = vmatmul.mubr.bf16.vlgmr.msra.gmra.mxu1 %v2734_v6 }
 0x98c   :  { %2869 = vmatpush1.bf16.msra.mxu0 %v6077_v10  ;;  %4488 = vmatpush3.bf16.msra.mxu1 %v6098_v18 }
 0x98d   :  { %2870 = vmatprep.subr.bf16.mxu0 %v6081_v13  ;;  %4489 = vmatprep.subr.bf16.mxu1 %v6874_v62 }
 0x98e   :  { %2900 = vmatprep.mubr.bf16.mxu0 %v6875_v11  ;;  %4503 = vmatprep.mubr.msk.bf16.mxu1 %vm5250_vm0, %v6874_v62 }
 0x990   :  { %2871 = vmatpush1.bf16.msra.mxu0 %v6083_v56  ;;  %4490 = vmatpush3.bf16.msra.mxu1 %v6104_v55 }
 0x991   :  { %2872 = vmatprep.subr.bf16.mxu0 %v6087_v16  ;;  %4491 = vmatprep.subr.bf16.mxu1 %v6874_v62 }
 0x994   :  { %2873 = vmatpush1.bf16.msra.mxu0 %v6089_v24  ;;  %4492 = vmatpush3.bf16.msra.mxu1 %v6114_v36 }
 0x995   :  { %2874 = vmatprep.subr.bf16.mxu0 %v6093_v7  ;;  %4493 = vmatprep.subr.bf16.mxu1 %v6874_v62 }
 0x998   :  { %2875 = vmatpush1.bf16.msra.mxu0 %v6095_v3  ;;  %4494 = vmatpush3.bf16.msra.mxu1 %v6131_v27 }
 0x999   :  { %2876 = vmatprep.subr.bf16.mxu0 %v6101_v25  ;;  %4495 = vmatprep.subr.bf16.mxu1 %v6874_v62 }
 0x99c   :  { %2877 = vmatpush1.bf16.msra.mxu0 %v6106_v21  ;;  %4496 = vmatpush3.bf16.msra.mxu1 %v6140_v22 }
 0x99d   :  { %2878 = vmatprep.subr.bf16.mxu0 %v6111_v32  ;;  %4497 = vmatprep.subr.bf16.mxu1 %v6874_v62 }
 0x9a0   :  { %2879 = vmatpush1.bf16.msra.mxu0 %v6116_v51  ;;  %4498 = vmatpush3.bf16.msra.mxu1 %v6143_v60 }
 0x9a1   :  { %2880 = vmatprep.subr.bf16.mxu0 %v6121_v42  ;;  %4499 = vmatprep.subr.bf16.mxu1 %v6874_v62 }
 0x9a4   :  { %2881 = vmatpush1.bf16.msra.mxu0 %v6124_v1  ;;  %4500 = vmatpush3.bf16.msra.mxu1 %v6147_v30 }
 0x9a5   :  { %2882 = vmatprep.subr.bf16.mxu0 %v6129_v47  ;;  %4501 = vmatprep.subr.bf16.mxu1 %v6874_v62 }
 0x9a8   :  { %2883 = vmatpush1.bf16.msra.mxu0 %v6133_v4  ;;  %4502 = vmatpush3.bf16.msra.mxu1 %v6151_v26 }
 0x9a9   :  { %3001 = vmatprep.subr.bf16.mxu0 %v6075_v54  ;;  %4507 = vmatprep.subr.bf16.mxu1 %v6874_v62 }
 0xa4b   :  { %v2769_v37 = vpop.f32.mrf.mxu0  ;;  %v2812_v17 = vpop.f32.mrf.mxu1 }
 0xa4c   :  { %v2770_v63 = vadd.f32 %v2769_v37, %v6308_v34 }
 0xa4d   :  { %v2771_v12 = vpop.f32.mrf.mxu0  ;;  %v4485_v33 = vpop.f32.mrf.mxu1 }
 0xa4e   :  { %v2819_v28 = vadd.f32 %v2770_v63, %v2255_v8  ;;  %v2772_v45 = vadd.f32 %v2771_v12, %v6317_v46 }
 0xa4f   :  { %v2773_v48 = vpop.f32.mrf.mxu0  ;;  %v2815_v15 = vpop.f32.mrf.mxu1 }
 0xa50   :  { %v3945_v44 = vmul.f32 -1.442695, %v2819_v28  ;;  %v2774_v9 = vadd.f32 %v2773_v48, %v6308_v34  ;;  %v2833_v57 = vadd.f32 %v2772_v45, %v2257_v50 }
 0xa51   :  { %v2775_v43 = vpop.f32.mrf.mxu0  ;;  %v4486_v5 = vpop.f32.mrf.mxu1 }
 0xa52   :  { %4968 = vpow2.f32 %v3945_v44  ;;  %v2820_v14 = vadd.f32 %v2774_v9, %v2259_v2  ;;  %v2776_v38 = vadd.f32 %v2775_v43, %v6317_v46  ;;  %v3947_v6 = vmul.f32 -1.442695, %v2833_v57 }
 0xa53   :  { %v2813_v2 = vadd.f32 %v2812_v17, %v6331_v0  ;;  %v2816_v5 = vadd.f32 %v2815_v15, %v6331_v0 }
 0xa54   :  { %v3946_v58 = vmul.f32 -1.442695, %v2820_v14  ;;  %v2834_v53 = vadd.f32 %v2776_v38, %v2261_v41  ;;  %v2369_v14 = vadd.f32 %v6246_v31, %v6335_v19 }
 0xa56   :  { %4970 = vpow2.f32 %v3946_v58  ;;  %v3948_v37 = vmul.f32 -1.442695, %v2834_v53 }
 0xa57   :  { %4972 = vpow2.f32 %v3947_v6 }
 0xa58   :  { %4974 = vpow2.f32 %v3948_v37 }
 0xa5f   :  { %v4969_v8 = vpop.eup %4968 }
 0xa60   :  { %v2827_v63 = vadd.f32 1.0, %v4969_v8 }
 0xa62   :  { %4976 = vrcp.f32 %v2827_v63 }
 0xa63   :  { %v4971_v12 = vpop.eup %4970 }
 0xa64   :  { %v2828_v52 = vadd.f32 1.0, %v4971_v12  ;;  %v4973_v33 = vpop.eup %4972 }
 0xa65   :  { %v4975_v28 = vpop.eup %4974  ;;  %v2841_v48 = vadd.f32 1.0, %v4973_v33  ;;  %v2265_v33 = vadd.f32 %v6222_v61, %v6305_v40  ;;  %v2267_v61 = vadd.f32 %v6224_v29, %v6320_v35 }
 0xa66   :  { %4978 = vrcp.f32 %v2828_v52  ;;  %v2842_v45 = vadd.f32 1.0, %v4975_v28 }
 0xa67   :  { %4980 = vrcp.f32 %v2841_v48 }
 0xa68   :  { %4982 = vrcp.f32 %v2842_v45 }
 0xa6f   :  { %v4977_v44 = vpop.eup %4976 }
 0xa70   :  { %v2847_v9 = vmul.f32 %v4977_v44, %v2813_v2 }
 0xa72   :  { %v2849_v43 = vadd.f32 %v2847_v9, %v2366_v23  ;;  %v2269_v9 = vadd.f32 %v6226_v59, %v6305_v40 }
 0xa73   :  { %v4979_v50 = vpop.eup %4978 }
 0xa74   :  { %4984 = vtanh.f32 %v2849_v43  ;;  %v2848_v38 = vmul.f32 %v4979_v50, %v2816_v5  ;;  %v4981_v17 = vpop.eup %4980 }
 0xa75   :  { %v4983_v58 = vpop.eup %4982  ;;  %v2853_v41 = vsub.f32 1.0, %v4981_v17  ;;  %v2857_v39 = vmul.f32 %v4981_v17, %v6342_v20 }
 0xa76   :  { %v2850_v57 = vadd.f32 %v2848_v38, %v2369_v14  ;;  %v2854_v37 = vsub.f32 1.0, %v4983_v58  ;;  %v2858_v12 = vmul.f32 %v4983_v58, %v6344_v49 }
 0xa78   :  { %4986 = vtanh.f32 %v2850_v57 }
 0xa81   :  { %v4985_v53 = vpop.eup %4984 }
 0xa82   :  { %v2855_v6 = vmul.f32 %v4985_v53, %v2853_v41  ;;  %v6938_v41 = vld [vmem:[#allocation26_spill] sm:$0xff] }
 0xa83   :  { %v2271_v53 = vadd.f32 %v6938_v41, %v6320_v35 }
 0xa84   :  { %v6402_v8 = vadd.f32 %v2857_v39, %v2855_v6 }
 0xa85   :  { %v4987_v15 = vpop.eup %4986 }
 0xa86   :  { %v2856_v63 = vmul.f32 %v4987_v15, %v2854_v37 }
 0xa88   :  { %v6405_v52 = vadd.f32 %v2858_v12, %v2856_v63 }
 0xa8a   :  { %v2867_v31 = vpack.c.bf16 %v6405_v52, %v6402_v8 }
 0xa8c   :  { %2901 = vmatmul.mubr.bf16.vlgmr.msra.gmra.mxu0 %v2867_v31  ;;  %4504 = vmatmul.mubr.bf16.vlgmr.msra.gmra.mxu1 %v2867_v31 }
 0xa8d   :  { %3002 = vmatpush1.bf16.msra.mxu0 %v6077_v10  ;;  %4508 = vmatpush3.bf16.msra.mxu1 %v6098_v18 }
 0xa8e   :  { %3003 = vmatprep.subr.bf16.mxu0 %v6081_v13  ;;  %4509 = vmatprep.subr.bf16.mxu1 %v6874_v62 }
 0xa8f   :  { %3033 = vmatprep.mubr.bf16.mxu0 %v6875_v11  ;;  %4523 = vmatprep.mubr.msk.bf16.mxu1 %vm5250_vm0, %v6874_v62 }
 0xa91   :  { %3004 = vmatpush1.bf16.msra.mxu0 %v6083_v56  ;;  %4510 = vmatpush3.bf16.msra.mxu1 %v6104_v55 }
 0xa92   :  { %3005 = vmatprep.subr.bf16.mxu0 %v6087_v16  ;;  %4511 = vmatprep.subr.bf16.mxu1 %v6874_v62 }
 0xa95   :  { %3006 = vmatpush1.bf16.msra.mxu0 %v6089_v24  ;;  %4512 = vmatpush3.bf16.msra.mxu1 %v6114_v36 }
 0xa96   :  { %3007 = vmatprep.subr.bf16.mxu0 %v6093_v7  ;;  %4513 = vmatprep.subr.bf16.mxu1 %v6874_v62 }
 0xa99   :  { %3008 = vmatpush1.bf16.msra.mxu0 %v6095_v3  ;;  %4514 = vmatpush3.bf16.msra.mxu1 %v6131_v27 }
 0xa9a   :  { %3009 = vmatprep.subr.bf16.mxu0 %v6101_v25  ;;  %4515 = vmatprep.subr.bf16.mxu1 %v6874_v62 }
 0xa9d   :  { %3010 = vmatpush1.bf16.msra.mxu0 %v6106_v21  ;;  %4516 = vmatpush3.bf16.msra.mxu1 %v6140_v22 }
 0xa9e   :  { %3011 = vmatprep.subr.bf16.mxu0 %v6111_v32  ;;  %4517 = vmatprep.subr.bf16.mxu1 %v6874_v62 }
 0xaa1   :  { %3012 = vmatpush1.bf16.msra.mxu0 %v6116_v51  ;;  %4518 = vmatpush3.bf16.msra.mxu1 %v6143_v60 }
 0xaa2   :  { %3013 = vmatprep.subr.bf16.mxu0 %v6121_v42  ;;  %4519 = vmatprep.subr.bf16.mxu1 %v6874_v62 }
 0xaa5   :  { %3014 = vmatpush1.bf16.msra.mxu0 %v6124_v1  ;;  %4520 = vmatpush3.bf16.msra.mxu1 %v6147_v30 }
 0xaa6   :  { %3015 = vmatprep.subr.bf16.mxu0 %v6129_v47  ;;  %4521 = vmatprep.subr.bf16.mxu1 %v6874_v62 }
 0xaa9   :  { %3016 = vmatpush1.bf16.msra.mxu0 %v6133_v4  ;;  %4522 = vmatpush3.bf16.msra.mxu1 %v6151_v26 }
 0xaaa   :  { %3134 = vmatprep.subr.bf16.mxu0 %v6075_v54  ;;  %4527 = vmatprep.subr.bf16.mxu1 %v6874_v62 }
 0xb4c   :  { %v2902_v20 = vpop.f32.mrf.mxu0  ;;  %v2945_v49 = vpop.f32.mrf.mxu1 }
 0xb4d   :  { %v2903_v28 = vadd.f32 %v2902_v20, %v6308_v34 }
 0xb4e   :  { %v2904_v48 = vpop.f32.mrf.mxu0  ;;  %v4505_v2 = vpop.f32.mrf.mxu1 }
 0xb4f   :  { %v2952_v44 = vadd.f32 %v2903_v28, %v2265_v33  ;;  %v2905_v54 = vadd.f32 %v2904_v48, %v6317_v46  ;;  %v2946_v33 = vadd.f32 %v2945_v49, %v6331_v0  ;;  %v6939_v2 = vld [vmem:[#allocation34_spill] sm:$0xff] }
 0xb50   :  { %v2906_v45 = vpop.f32.mrf.mxu0  ;;  %v2948_v23 = vpop.f32.mrf.mxu1 }
 0xb51   :  { %v3949_v43 = vmul.f32 -1.442695, %v2952_v44  ;;  %v2907_v5 = vadd.f32 %v2906_v45, %v6308_v34  ;;  %v2966_v17 = vadd.f32 %v2905_v54, %v2267_v61  ;;  %v2374_v44 = vadd.f32 %v6939_v2, %v6335_v19 }
 0xb52   :  { %v2908_v50 = vpop.f32.mrf.mxu0  ;;  %v4506_v14 = vpop.f32.mrf.mxu1 }
 0xb53   :  { %4988 = vpow2.f32 %v3949_v43  ;;  %v2953_v38 = vadd.f32 %v2907_v5, %v2269_v9  ;;  %v2909_v57 = vadd.f32 %v2908_v50, %v6317_v46  ;;  %v3951_v6 = vmul.f32 -1.442695, %v2966_v17  ;;  %v6940_v5 = vld [vmem:[#allocation37_spill] sm:$0xff] }
 0xb54   :  { %v2949_v43 = vadd.f32 %v2948_v23, %v6331_v0  ;;  %v2377_v50 = vadd.f32 %v6940_v5, %v6335_v19  ;;  %v6945_v5 = vld [vmem:[#allocation22_spill] sm:$0xff] }
 0xb55   :  { %v3950_v58 = vmul.f32 -1.442695, %v2953_v38  ;;  %v2967_v59 = vadd.f32 %v2909_v57, %v2271_v53 }
 0xb57   :  { %4990 = vpow2.f32 %v3950_v58  ;;  %v3952_v39 = vmul.f32 -1.442695, %v2967_v59 }
 0xb58   :  { %4992 = vpow2.f32 %v3951_v6 }
 0xb59   :  { %4994 = vpow2.f32 %v3952_v39 }
 0xb60   :  { %v4989_v37 = vpop.eup %4988 }
 0xb61   :  { %v2960_v15 = vadd.f32 1.0, %v4989_v37 }
 0xb63   :  { %4996 = vrcp.f32 %v2960_v15 }
 0xb64   :  { %v4991_v63 = vpop.eup %4990 }
 0xb65   :  { %v2961_v29 = vadd.f32 1.0, %v4991_v63  ;;  %v4993_v12 = vpop.eup %4992 }
 0xb66   :  { %v4995_v31 = vpop.eup %4994  ;;  %v2974_v20 = vadd.f32 1.0, %v4993_v12 }
 0xb67   :  { %4998 = vrcp.f32 %v2961_v29  ;;  %v2975_v48 = vadd.f32 1.0, %v4995_v31 }
 0xb68   :  { %5000 = vrcp.f32 %v2974_v20 }
 0xb69   :  { %5002 = vrcp.f32 %v2975_v48 }
 0xb70   :  { %v4997_v28 = vpop.eup %4996 }
 0xb71   :  { %v2980_v45 = vmul.f32 %v4997_v28, %v2946_v33 }
 0xb73   :  { %v2982_v9 = vadd.f32 %v2980_v45, %v2374_v44 }
 0xb74   :  { %v4999_v54 = vpop.eup %4998 }
 0xb75   :  { %5004 = vtanh.f32 %v2982_v9  ;;  %v2981_v14 = vmul.f32 %v4999_v54, %v2949_v43  ;;  %v5001_v49 = vpop.eup %5000 }
 0xb76   :  { %v5003_v38 = vpop.eup %5002  ;;  %v2986_v57 = vsub.f32 1.0, %v5001_v49  ;;  %v2990_v41 = vmul.f32 %v5001_v49, %v6402_v8 }
 0xb77   :  { %v2983_v61 = vadd.f32 %v2981_v14, %v2377_v50  ;;  %v2987_v53 = vsub.f32 1.0, %v5003_v38  ;;  %v2991_v39 = vmul.f32 %v5003_v38, %v6405_v52  ;;  %v6944_v52 = vld [vmem:[#allocation18_spill] sm:$0xff]  ;;  %v2382_v50 = vadd.f32 %v6945_v5, %v6335_v19 }
 0xb78   :  { %v2281_v63 = vadd.f32 %v6944_v52, %v6320_v35  ;;  %v6592_v52 = vld [vmem:[#allocation9 + $0x1c] ss:$12 sps:$4 sm:$0xff]  }
 0xb79   :  { %5006 = vtanh.f32 %v2983_v61 }
 0xb82   :  { %v5005_v17 = vpop.eup %5004 }
 0xb83   :  { %v2988_v58 = vmul.f32 %v5005_v17, %v2986_v57  ;;  %v6946_v57 = vld [vmem:[#allocation21_spill] sm:$0xff] }
 0xb84   :  { %v2385_v17 = vadd.f32 %v6946_v57, %v6335_v19 }
 0xb85   :  { %v6463_v59 = vadd.f32 %v2990_v41, %v2988_v58 }
 0xb86   :  { %v5007_v23 = vpop.eup %5006 }
 0xb87   :  { %v2989_v6 = vmul.f32 %v5007_v23, %v2987_v53 }
 0xb89   :  { %v6466_v37 = vadd.f32 %v2991_v39, %v2989_v6 }
 0xb8b   :  { %v3000_v15 = vpack.c.bf16 %v6466_v37, %v6463_v59 }
 0xb8d   :  { %3034 = vmatmul.mubr.bf16.vlgmr.msra.gmra.mxu0 %v3000_v15  ;;  %4524 = vmatmul.mubr.bf16.vlgmr.msra.gmra.mxu1 %v3000_v15 }
 0xb8e   :  { %3135 = vmatpush1.bf16.msra.mxu0 %v6077_v10  ;;  %4528 = vmatpush3.bf16.msra.mxu1 %v6098_v18  ;;  %v6503_v10 = vld [vmem:[#allocation9 + $0xac] ss:$12 sps:$4 sm:$0xff]  }
 0xb8f   :  { %3136 = vmatprep.subr.bf16.mxu0 %v6081_v13  ;;  %4529 = vmatprep.subr.bf16.mxu1 %v6874_v62 }
 0xb90   :  { %3166 = vmatprep.mubr.bf16.mxu0 %v6875_v11  ;;  %4543 = vmatprep.mubr.msk.bf16.mxu1 %vm5250_vm0, %v6874_v62 }
 0xb92   :  { %3137 = vmatpush1.bf16.msra.mxu0 %v6083_v56  ;;  %4530 = vmatpush3.bf16.msra.mxu1 %v6104_v55 }
 0xb93   :  { %3138 = vmatprep.subr.bf16.mxu0 %v6087_v16  ;;  %4531 = vmatprep.subr.bf16.mxu1 %v6874_v62  ;;  %v6941_v16 = vld [vmem:[#allocation24_spill] sm:$0xff] }
 0xb96   :  { %3139 = vmatpush1.bf16.msra.mxu0 %v6089_v24  ;;  %4532 = vmatpush3.bf16.msra.mxu1 %v6114_v36  ;;  %v2275_v24 = vadd.f32 %v6941_v16, %v6305_v40 }
 0xb97   :  { %3140 = vmatprep.subr.bf16.mxu0 %v6093_v7  ;;  %4533 = vmatprep.subr.bf16.mxu1 %v6874_v62 }
 0xb9a   :  { %3141 = vmatpush1.bf16.msra.mxu0 %v6095_v3  ;;  %4534 = vmatpush3.bf16.msra.mxu1 %v6131_v27 }
 0xb9b   :  { %3142 = vmatprep.subr.bf16.mxu0 %v6101_v25  ;;  %4535 = vmatprep.subr.bf16.mxu1 %v6874_v62 }
 0xb9e   :  { %3143 = vmatpush1.bf16.msra.mxu0 %v6106_v21  ;;  %4536 = vmatpush3.bf16.msra.mxu1 %v6140_v22 }
 0xb9f   :  { %3144 = vmatprep.subr.bf16.mxu0 %v6111_v32  ;;  %4537 = vmatprep.subr.bf16.mxu1 %v6874_v62  ;;  %v6942_v32 = vld [vmem:[#allocation17_spill] sm:$0xff] }
 0xba0   :  { %v2279_v36 = vadd.f32 %v6942_v32, %v6305_v40  ;;  %v6549_v32 = vld [vmem:[#allocation9 + $0x98] ss:$12 sps:$4 sm:$0xff]  }
 0xba2   :  { %3145 = vmatpush1.bf16.msra.mxu0 %v6116_v51  ;;  %4538 = vmatpush3.bf16.msra.mxu1 %v6143_v60 }
 0xba3   :  { %3146 = vmatprep.subr.bf16.mxu0 %v6121_v42  ;;  %4539 = vmatprep.subr.bf16.mxu1 %v6874_v62 }
 0xba6   :  { %3147 = vmatpush1.bf16.msra.mxu0 %v6124_v1  ;;  %4540 = vmatpush3.bf16.msra.mxu1 %v6147_v30 }
 0xba7   :  { %3148 = vmatprep.subr.bf16.mxu0 %v6129_v47  ;;  %4541 = vmatprep.subr.bf16.mxu1 %v6874_v62 }
 0xbaa   :  { %3149 = vmatpush1.bf16.msra.mxu0 %v6133_v4  ;;  %4542 = vmatpush3.bf16.msra.mxu1 %v6151_v26  ;;  %v6943_v4 = vld [vmem:[#allocation28_spill] sm:$0xff] }
 0xbab   :  { %3267 = vmatprep.subr.bf16.mxu0 %v6503_v10  ;;  %4547 = vmatprep.subr.bf16.mxu1 %v6874_v62  ;;  %v2277_v22 = vadd.f32 %v6943_v4, %v6320_v35  ;;  %v6572_v4 = vld [vmem:[#allocation9 + $0x4c] ss:$12 sps:$4 sm:$0xff]  }
 0xc4d   :  { %v3035_v13 = vpop.f32.mrf.mxu0  ;;  %v3078_v56 = vpop.f32.mrf.mxu1 }
 0xc4e   :  { %v3036_v7 = vadd.f32 %v3035_v13, %v6308_v34  ;;  %v3079_v9 = vadd.f32 %v3078_v56, %v6331_v0 }
 0xc4f   :  { %v3037_v3 = vpop.f32.mrf.mxu0  ;;  %v4525_v18 = vpop.f32.mrf.mxu1 }
 0xc50   :  { %v3085_v25 = vadd.f32 %v3036_v7, %v2275_v24  ;;  %v3038_v42 = vadd.f32 %v3037_v3, %v6317_v46 }
 0xc51   :  { %v3039_v55 = vpop.f32.mrf.mxu0  ;;  %v3081_v21 = vpop.f32.mrf.mxu1 }
 0xc52   :  { %v3953_v51 = vmul.f32 -1.442695, %v3085_v25  ;;  %v3040_v1 = vadd.f32 %v3039_v55, %v6308_v34  ;;  %v3099_v26 = vadd.f32 %v3038_v42, %v2277_v22  ;;  %v3082_v49 = vadd.f32 %v3081_v21, %v6331_v0  ;;  %v6533_v55 = vld [vmem:[#allocation9 + $0xa8] ss:$12 sps:$4 sm:$0xff]   ;;  %v6536_v21 = vld [vmem:[#allocation9 + $0xb0] ss:$12 sps:$4 sm:$0xff]  }
 0xc53   :  { %v3041_v47 = vpop.f32.mrf.mxu0  ;;  %v4526_v27 = vpop.f32.mrf.mxu1  ;;  %v6559_v42 = vld [vmem:[#allocation9 + $0x80] ss:$12 sps:$4 sm:$0xff]   ;;  %v6576_v22 = vld [vmem:[#allocation9 + $0x48] ss:$12 sps:$4 sm:$0xff]  }
 0xc54   :  { %5008 = vpow2.f32 %v3953_v51  ;;  %v3086_v60 = vadd.f32 %v3040_v1, %v2279_v36  ;;  %v3042_v30 = vadd.f32 %v3041_v47, %v6317_v46  ;;  %v3955_v12 = vmul.f32 -1.442695, %v3099_v26  ;;  %v6552_v36 = vld [vmem:[#allocation9 + $0x7c] ss:$12 sps:$4 sm:$0xff]   ;;  %v6556_v51 = vld [vmem:[#allocation9 + $0x78] ss:$12 sps:$4 sm:$0xff]  }
 0xc55   :  { %v6562_v1 = vld [vmem:[#allocation9 + $0x64] ss:$12 sps:$4 sm:$0xff]   ;;  %v6566_v47 = vld [vmem:[#allocation9 + $0x60] ss:$12 sps:$4 sm:$0xff]   ;;  %v6569_v27 = vld [vmem:[#allocation9 + $0x68] ss:$12 sps:$4 sm:$0xff]  }
 0xc56   :  { %v3954_v8 = vmul.f32 -1.442695, %v3086_v60  ;;  %v3100_v29 = vadd.f32 %v3042_v30, %v2281_v63  ;;  %v6579_v60 = vld [vmem:[#allocation9 + $0x50] ss:$12 sps:$4 sm:$0xff]   ;;  %v6582_v30 = vld [vmem:[#allocation9 + $0x34] ss:$12 sps:$4 sm:$0xff]  }
 0xc57   :  { %v6586_v26 = vld [vmem:[#allocation9 + $0x30] ss:$12 sps:$4 sm:$0xff]   ;;  %v6596_v63 = vld [vmem:[#allocation9 + $0x18] ss:$12 sps:$4 sm:$0xff]  }
 0xc58   :  { %5010 = vpow2.f32 %v3954_v8  ;;  %v3956_v31 = vmul.f32 -1.442695, %v3100_v29  ;;  %v6589_v8 = vld [vmem:[#allocation9 + $0x38] ss:$12 sps:$4 sm:$0xff]   ;;  %v6599_v29 = vld [vmem:[#allocation9 + $0x20] ss:$12 sps:$4 sm:$0xff]  }
 0xc59   :  { %5012 = vpow2.f32 %v3955_v12  ;;  %v6602_v12 = vld [vmem:[#allocation9 + $0x4] ss:$12 sps:$4 sm:$0xff]  }
 0xc5a   :  { %5014 = vpow2.f32 %v3956_v31  ;;  %v6606_v31 = vld [vmem:[#allocation9] ss:$12 sps:$4 sm:$0xff]  }
 0xc61   :  { %v5009_v20 = vpop.eup %5008 }
 0xc62   :  { %v3093_v33 = vadd.f32 1.0, %v5009_v20  ;;  %v6609_v20 = vld [vmem:[#allocation9 + $0x8] ss:$12 sps:$4 sm:$0xff]  }
 0xc64   :  { %5016 = vrcp.f32 %v3093_v33 }
 0xc65   :  { %v5011_v28 = vpop.eup %5010 }
 0xc66   :  { %v3094_v48 = vadd.f32 1.0, %v5011_v28  ;;  %v5013_v2 = vpop.eup %5012 }
 0xc67   :  { %v5015_v44 = vpop.eup %5014  ;;  %v3107_v45 = vadd.f32 1.0, %v5013_v2 }
 0xc68   :  { %5018 = vrcp.f32 %v3094_v48  ;;  %v3108_v54 = vadd.f32 1.0, %v5015_v44  ;;  %v6947_v48 = vld [vmem:[#allocation30_spill] sm:$0xff] }
 0xc69   :  { %5020 = vrcp.f32 %v3107_v45  ;;  %v2285_v2 = vadd.f32 %v6947_v48, %v6305_v40 }
 0xc6a   :  { %5022 = vrcp.f32 %v3108_v54 }
 0xc71   :  { %v5017_v43 = vpop.eup %5016 }
 0xc72   :  { %v3113_v14 = vmul.f32 %v5017_v43, %v3079_v9 }
 0xc74   :  { %v3115_v61 = vadd.f32 %v3113_v14, %v2382_v50  ;;  %v6948_v50 = vld [vmem:[#allocation31_spill] sm:$0xff] }
 0xc75   :  { %v5019_v38 = vpop.eup %5018  ;;  %v2289_v14 = vadd.f32 %v6948_v50, %v6305_v40  ;;  %v6951_v50 = vld [vmem:[#allocation29_spill] sm:$0xff] }
 0xc76   :  { %5024 = vtanh.f32 %v3115_v61  ;;  %v3114_v58 = vmul.f32 %v5019_v38, %v3082_v49  ;;  %v5021_v53 = vpop.eup %5020 }
 0xc77   :  { %v5023_v23 = vpop.eup %5022  ;;  %v3119_v6 = vsub.f32 1.0, %v5021_v53  ;;  %v3123_v13 = vmul.f32 %v5021_v53, %v6463_v59  ;;  %v6539_v59 = vld [vmem:[#allocation9 + $0x94] ss:$12 sps:$4 sm:$0xff]  }
 0xc78   :  { %v3116_v41 = vadd.f32 %v3114_v58, %v2385_v17  ;;  %v3120_v56 = vsub.f32 1.0, %v5023_v23  ;;  %v3124_v3 = vmul.f32 %v5023_v23, %v6466_v37  ;;  %v6546_v37 = vld [vmem:[#allocation9 + $0x90] ss:$12 sps:$4 sm:$0xff]  }
 0xc79   :  { %v6949_v58 = vld [vmem:[#allocation32_spill] sm:$0xff] }
 0xc7a   :  { %5026 = vtanh.f32 %v3116_v41  ;;  %v2287_v41 = vadd.f32 %v6949_v58, %v6320_v35 }
 0xc83   :  { %v5025_v39 = vpop.eup %5024 }
 0xc84   :  { %v3121_v15 = vmul.f32 %v5025_v39, %v3119_v6 }
 0xc86   :  { %v6526_v16 = vadd.f32 %v3123_v13, %v3121_v15  ;;  %v6950_v15 = vld [vmem:[#allocation20_spill] sm:$0xff] }
 0xc87   :  { %v5027_v24 = vpop.eup %5026  ;;  %v2291_v13 = vadd.f32 %v6950_v15, %v6320_v35 }
 0xc88   :  { %v3122_v7 = vmul.f32 %v5027_v24, %v3120_v56 }
 0xc8a   :  { %v6529_v18 = vadd.f32 %v3124_v3, %v3122_v7 }
 0xc8c   :  { %v3133_v25 = vpack.c.bf16 %v6529_v18, %v6526_v16 }
 0xc8e   :  { %3167 = vmatmul.mubr.bf16.vlgmr.msra.gmra.mxu0 %v3133_v25  ;;  %4544 = vmatmul.mubr.bf16.vlgmr.msra.gmra.mxu1 %v3133_v25 }
 0xc8f   :  { %3268 = vmatpush1.bf16.msra.mxu0 %v6533_v55  ;;  %4548 = vmatpush3.bf16.msra.mxu1 %v6536_v21 }
 0xc90   :  { %3269 = vmatprep.subr.bf16.mxu0 %v6539_v59  ;;  %4549 = vmatprep.subr.bf16.mxu1 %v6874_v62 }
 0xc91   :  { %3299 = vmatprep.mubr.bf16.mxu0 %v6875_v11  ;;  %4563 = vmatprep.mubr.msk.bf16.mxu1 %vm5250_vm0, %v6874_v62 }
 0xc93   :  { %3270 = vmatpush1.bf16.msra.mxu0 %v6546_v37  ;;  %4550 = vmatpush3.bf16.msra.mxu1 %v6549_v32 }
 0xc94   :  { %3271 = vmatprep.subr.bf16.mxu0 %v6552_v36  ;;  %4551 = vmatprep.subr.bf16.mxu1 %v6874_v62 }
 0xc97   :  { %3272 = vmatpush1.bf16.msra.mxu0 %v6556_v51  ;;  %4552 = vmatpush3.bf16.msra.mxu1 %v6559_v42 }
 0xc98   :  { %3273 = vmatprep.subr.bf16.mxu0 %v6562_v1  ;;  %4553 = vmatprep.subr.bf16.mxu1 %v6874_v62 }
 0xc9b   :  { %3274 = vmatpush1.bf16.msra.mxu0 %v6566_v47  ;;  %4554 = vmatpush3.bf16.msra.mxu1 %v6569_v27 }
 0xc9c   :  { %3275 = vmatprep.subr.bf16.mxu0 %v6572_v4  ;;  %4555 = vmatprep.subr.bf16.mxu1 %v6874_v62 }
 0xc9f   :  { %3276 = vmatpush1.bf16.msra.mxu0 %v6576_v22  ;;  %4556 = vmatpush3.bf16.msra.mxu1 %v6579_v60 }
 0xca0   :  { %3277 = vmatprep.subr.bf16.mxu0 %v6582_v30  ;;  %4557 = vmatprep.subr.bf16.mxu1 %v6874_v62 }
 0xca3   :  { %3278 = vmatpush1.bf16.msra.mxu0 %v6586_v26  ;;  %4558 = vmatpush3.bf16.msra.mxu1 %v6589_v8 }
 0xca4   :  { %3279 = vmatprep.subr.bf16.mxu0 %v6592_v52  ;;  %4559 = vmatprep.subr.bf16.mxu1 %v6874_v62 }
 0xca7   :  { %3280 = vmatpush1.bf16.msra.mxu0 %v6596_v63  ;;  %4560 = vmatpush3.bf16.msra.mxu1 %v6599_v29 }
 0xca8   :  { %3281 = vmatprep.subr.bf16.mxu0 %v6602_v12  ;;  %4561 = vmatprep.subr.bf16.mxu1 %v6874_v62 }
 0xcab   :  { %3282 = vmatpush1.bf16.msra.mxu0 %v6606_v31  ;;  %4562 = vmatpush3.bf16.msra.mxu1 %v6609_v20 }
 0xcac   :  { %3400 = vmatprep.subr.bf16.mxu0 %v6503_v10  ;;  %4567 = vmatprep.subr.bf16.mxu1 %v6874_v62 }
 0xd4e   :  { %v3168_v33 = vpop.f32.mrf.mxu0  ;;  %v3211_v28 = vpop.f32.mrf.mxu1 }
 0xd4f   :  { %v3169_v44 = vadd.f32 %v3168_v33, %v6308_v34 }
 0xd50   :  { %v3170_v45 = vpop.f32.mrf.mxu0  ;;  %v4545_v9 = vpop.f32.mrf.mxu1 }
 0xd51   :  { %v3218_v43 = vadd.f32 %v3169_v44, %v2285_v2  ;;  %v3171_v49 = vadd.f32 %v3170_v45, %v6317_v46  ;;  %v3212_v9 = vadd.f32 %v3211_v28, %v6331_v0 }
 0xd52   :  { %v3172_v54 = vpop.f32.mrf.mxu0  ;;  %v3214_v5 = vpop.f32.mrf.mxu1 }
 0xd53   :  { %v3957_v61 = vmul.f32 -1.442695, %v3218_v43  ;;  %v3173_v38 = vadd.f32 %v3172_v54, %v6308_v34  ;;  %v3232_v6 = vadd.f32 %v3171_v49, %v2287_v41 }
 0xd54   :  { %v3174_v57 = vpop.f32.mrf.mxu0  ;;  %v4546_v17 = vpop.f32.mrf.mxu1 }
 0xd55   :  { %5028 = vpow2.f32 %v3957_v61  ;;  %v3219_v53 = vadd.f32 %v3173_v38, %v2289_v14  ;;  %v3175_v23 = vadd.f32 %v3174_v57, %v6317_v46  ;;  %v3959_v24 = vmul.f32 -1.442695, %v3232_v6  ;;  %v6952_v17 = vld [vmem:[#allocation42_spill] sm:$0xff] }
 0xd56   :  { %v2390_v14 = vadd.f32 %v6951_v50, %v6335_v19  ;;  %v3215_v38 = vadd.f32 %v3214_v5, %v6331_v0  ;;  %v2393_v58 = vadd.f32 %v6952_v17, %v6335_v19 }
 0xd57   :  { %v3958_v39 = vmul.f32 -1.442695, %v3219_v53  ;;  %v3233_v56 = vadd.f32 %v3175_v23, %v2291_v13 }
 0xd59   :  { %5030 = vpow2.f32 %v3958_v39  ;;  %v3960_v7 = vmul.f32 -1.442695, %v3233_v56 }
 0xd5a   :  { %5032 = vpow2.f32 %v3959_v24 }
 0xd5b   :  { %5034 = vpow2.f32 %v3960_v7 }
 0xd62   :  { %v5029_v3 = vpop.eup %5028 }
 0xd63   :  { %v3226_v25 = vadd.f32 1.0, %v5029_v3 }
 0xd65   :  { %5036 = vrcp.f32 %v3226_v25 }
 0xd66   :  { %v5031_v33 = vpop.eup %5030 }
 0xd67   :  { %v3227_v48 = vadd.f32 1.0, %v5031_v33  ;;  %v5033_v2 = vpop.eup %5032 }
 0xd68   :  { %v5035_v44 = vpop.eup %5034  ;;  %v3240_v45 = vadd.f32 1.0, %v5033_v2 }
 0xd69   :  { %5038 = vrcp.f32 %v3227_v48  ;;  %v3241_v54 = vadd.f32 1.0, %v5035_v44  ;;  %v6953_v48 = vld [vmem:[#allocation33_spill] sm:$0xff] }
 0xd6a   :  { %5040 = vrcp.f32 %v3240_v45  ;;  %v2295_v2 = vadd.f32 %v6953_v48, %v6305_v40 }
 0xd6b   :  { %5042 = vrcp.f32 %v3241_v54 }
 0xd72   :  { %v5037_v43 = vpop.eup %5036 }
 0xd73   :  { %v3246_v61 = vmul.f32 %v5037_v43, %v3212_v9 }
 0xd75   :  { %v3248_v49 = vadd.f32 %v3246_v61, %v2390_v14  ;;  %v6954_v14 = vld [vmem:[#allocation35_spill] sm:$0xff] }
 0xd76   :  { %v5039_v57 = vpop.eup %5038  ;;  %v2299_v61 = vadd.f32 %v6954_v14, %v6305_v40 }
 0xd77   :  { %5044 = vtanh.f32 %v3248_v49  ;;  %v3247_v41 = vmul.f32 %v5039_v57, %v3215_v38  ;;  %v5041_v28 = vpop.eup %5040 }
 0xd78   :  { %v5043_v23 = vpop.eup %5042  ;;  %v3252_v6 = vsub.f32 1.0, %v5041_v28  ;;  %v3256_v13 = vmul.f32 %v5041_v28, %v6526_v16 }
 0xd79   :  { %v3249_v53 = vadd.f32 %v3247_v41, %v2393_v58  ;;  %v3253_v56 = vsub.f32 1.0, %v5043_v23  ;;  %v3257_v3 = vmul.f32 %v5043_v23, %v6529_v18  ;;  %v6955_v58 = vld [vmem:[#allocation19_spill] sm:$0xff] }
 0xd7a   :  { %v2297_v41 = vadd.f32 %v6955_v58, %v6320_v35 }
 0xd7b   :  { %5046 = vtanh.f32 %v3249_v53 }
 0xd84   :  { %v5045_v39 = vpop.eup %5044 }
 0xd85   :  { %v3254_v15 = vmul.f32 %v5045_v39, %v3252_v6  ;;  %v6956_v39 = vld [vmem:[#allocation36_spill] sm:$0xff] }
 0xd87   :  { %v6633_v24 = vadd.f32 %v3256_v13, %v3254_v15  ;;  %v2301_v15 = vadd.f32 %v6956_v39, %v6320_v35 }
 0xd88   :  { %v5047_v5 = vpop.eup %5046 }
 0xd89   :  { %v3255_v7 = vmul.f32 %v5047_v5, %v3253_v56 }
 0xd8b   :  { %v6636_v25 = vadd.f32 %v3257_v3, %v3255_v7 }
 0xd8d   :  { %v3266_v33 = vpack.c.bf16 %v6636_v25, %v6633_v24 }
 0xd8f   :  { %3300 = vmatmul.mubr.bf16.vlgmr.msra.gmra.mxu0 %v3266_v33  ;;  %4564 = vmatmul.mubr.bf16.vlgmr.msra.gmra.mxu1 %v3266_v33 }
 0xd90   :  { %3401 = vmatpush1.bf16.msra.mxu0 %v6533_v55  ;;  %4568 = vmatpush3.bf16.msra.mxu1 %v6536_v21 }
 0xd91   :  { %3402 = vmatprep.subr.bf16.mxu0 %v6539_v59  ;;  %4569 = vmatprep.subr.bf16.mxu1 %v6874_v62 }
 0xd92   :  { %3432 = vmatprep.mubr.bf16.mxu0 %v6875_v11  ;;  %4583 = vmatprep.mubr.msk.bf16.mxu1 %vm5250_vm0, %v6874_v62 }
 0xd94   :  { %3403 = vmatpush1.bf16.msra.mxu0 %v6546_v37  ;;  %4570 = vmatpush3.bf16.msra.mxu1 %v6549_v32 }
 0xd95   :  { %3404 = vmatprep.subr.bf16.mxu0 %v6552_v36  ;;  %4571 = vmatprep.subr.bf16.mxu1 %v6874_v62 }
 0xd98   :  { %3405 = vmatpush1.bf16.msra.mxu0 %v6556_v51  ;;  %4572 = vmatpush3.bf16.msra.mxu1 %v6559_v42 }
 0xd99   :  { %3406 = vmatprep.subr.bf16.mxu0 %v6562_v1  ;;  %4573 = vmatprep.subr.bf16.mxu1 %v6874_v62 }
 0xd9c   :  { %3407 = vmatpush1.bf16.msra.mxu0 %v6566_v47  ;;  %4574 = vmatpush3.bf16.msra.mxu1 %v6569_v27 }
 0xd9d   :  { %3408 = vmatprep.subr.bf16.mxu0 %v6572_v4  ;;  %4575 = vmatprep.subr.bf16.mxu1 %v6874_v62 }
 0xda0   :  { %3409 = vmatpush1.bf16.msra.mxu0 %v6576_v22  ;;  %4576 = vmatpush3.bf16.msra.mxu1 %v6579_v60 }
 0xda1   :  { %3410 = vmatprep.subr.bf16.mxu0 %v6582_v30  ;;  %4577 = vmatprep.subr.bf16.mxu1 %v6874_v62 }
 0xda4   :  { %3411 = vmatpush1.bf16.msra.mxu0 %v6586_v26  ;;  %4578 = vmatpush3.bf16.msra.mxu1 %v6589_v8 }
 0xda5   :  { %3412 = vmatprep.subr.bf16.mxu0 %v6592_v52  ;;  %4579 = vmatprep.subr.bf16.mxu1 %v6874_v62 }
 0xda8   :  { %3413 = vmatpush1.bf16.msra.mxu0 %v6596_v63  ;;  %4580 = vmatpush3.bf16.msra.mxu1 %v6599_v29 }
 0xda9   :  { %3414 = vmatprep.subr.bf16.mxu0 %v6602_v12  ;;  %4581 = vmatprep.subr.bf16.mxu1 %v6874_v62 }
 0xdac   :  { %3415 = vmatpush1.bf16.msra.mxu0 %v6606_v31  ;;  %4582 = vmatpush3.bf16.msra.mxu1 %v6609_v20 }
 0xdad   :  { %3533 = vmatprep.subr.bf16.mxu0 %v6503_v10  ;;  %4587 = vmatprep.subr.bf16.mxu1 %v6874_v62 }
 0xe4f   :  { %v3301_v16 = vpop.f32.mrf.mxu0  ;;  %v3344_v18 = vpop.f32.mrf.mxu1 }
 0xe50   :  { %v3302_v44 = vadd.f32 %v3301_v16, %v6308_v34 }
 0xe51   :  { %v3303_v45 = vpop.f32.mrf.mxu0  ;;  %v4565_v9 = vpop.f32.mrf.mxu1 }
 0xe52   :  { %v3351_v43 = vadd.f32 %v3302_v44, %v2295_v2  ;;  %v3304_v10 = vadd.f32 %v3303_v45, %v6317_v46  ;;  %v3345_v45 = vadd.f32 %v3344_v18, %v6331_v0 }
 0xe53   :  { %v3305_v54 = vpop.f32.mrf.mxu0  ;;  %v3347_v50 = vpop.f32.mrf.mxu1 }
 0xe54   :  { %v3961_v49 = vmul.f32 -1.442695, %v3351_v43  ;;  %v3306_v38 = vadd.f32 %v3305_v54, %v6308_v34  ;;  %v3365_v23 = vadd.f32 %v3304_v10, %v2297_v41  ;;  %v6957_v54 = vld [vmem:[#allocation38_spill] sm:$0xff]  ;;  %v3348_v10 = vadd.f32 %v3347_v50, %v6331_v0 }
 0xe55   :  { %v3307_v57 = vpop.f32.mrf.mxu0  ;;  %v4566_v17 = vpop.f32.mrf.mxu1  ;;  %v2398_v14 = vadd.f32 %v6957_v54, %v6335_v19 }
 0xe56   :  { %5048 = vpow2.f32 %v3961_v49  ;;  %v3352_v53 = vadd.f32 %v3306_v38, %v2299_v61  ;;  %v3308_v28 = vadd.f32 %v3307_v57, %v6317_v46  ;;  %v3963_v56 = vmul.f32 -1.442695, %v3365_v23  ;;  %v6958_v57 = vld [vmem:[#allocation41_spill] sm:$0xff] }
 0xe57   :  { %v2401_v17 = vadd.f32 %v6958_v57, %v6335_v19 }
 0xe58   :  { %v3962_v6 = vmul.f32 -1.442695, %v3352_v53  ;;  %v3366_v13 = vadd.f32 %v3308_v28, %v2301_v15 }
 0xe5a   :  { %5050 = vpow2.f32 %v3962_v6  ;;  %v3964_v5 = vmul.f32 -1.442695, %v3366_v13 }
 0xe5b   :  { %5052 = vpow2.f32 %v3963_v56 }
 0xe5c   :  { %5054 = vpow2.f32 %v3964_v5 }
 0xe63   :  { %v5049_v7 = vpop.eup %5048 }
 0xe64   :  { %v3359_v3 = vadd.f32 1.0, %v5049_v7 }
 0xe66   :  { %5056 = vrcp.f32 %v3359_v3 }
 0xe67   :  { %v5051_v33 = vpop.eup %5050 }
 0xe68   :  { %v3360_v16 = vadd.f32 1.0, %v5051_v33  ;;  %v5053_v48 = vpop.eup %5052 }
 0xe69   :  { %v5055_v2 = vpop.eup %5054  ;;  %v3373_v44 = vadd.f32 1.0, %v5053_v48 }
 0xe6a   :  { %5058 = vrcp.f32 %v3360_v16  ;;  %v3374_v43 = vadd.f32 1.0, %v5055_v2 }
 0xe6b   :  { %5060 = vrcp.f32 %v3373_v44 }
 0xe6c   :  { %5062 = vrcp.f32 %v3374_v43 }
 0xe73   :  { %v5057_v9 = vpop.eup %5056 }
 0xe74   :  { %v3379_v61 = vmul.f32 %v5057_v9, %v3345_v45 }
 0xe76   :  { %v3381_v49 = vadd.f32 %v3379_v61, %v2398_v14 }
 0xe77   :  { %v5059_v38 = vpop.eup %5058 }
 0xe78   :  { %5064 = vtanh.f32 %v3381_v49  ;;  %v3380_v58 = vmul.f32 %v5059_v38, %v3348_v10  ;;  %v5061_v18 = vpop.eup %5060  ;;  %v6963_v10 = vld [vmem:[#allocation45_spill] sm:$0xff] }
 0xe79   :  { %v5063_v53 = vpop.eup %5062  ;;  %v3385_v28 = vsub.f32 1.0, %v5061_v18  ;;  %v3389_v39 = vmul.f32 %v5061_v18, %v6633_v24  ;;  %v2406_v38 = vadd.f32 %v6963_v10, %v6335_v19  ;;  %v6964_v18 = vld [vmem:[#allocation48_spill] sm:$0xff] }
 0xe7a   :  { %v3382_v41 = vadd.f32 %v3380_v58, %v2401_v17  ;;  %v3386_v15 = vsub.f32 1.0, %v5063_v53  ;;  %v3390_v5 = vmul.f32 %v5063_v53, %v6636_v25  ;;  %v2409_v53 = vadd.f32 %v6964_v18, %v6335_v19 }
 0xe7c   :  { %5066 = vtanh.f32 %v3382_v41 }
 0xe85   :  { %v5065_v23 = vpop.eup %5064 }
 0xe86   :  { %v3387_v6 = vmul.f32 %v5065_v23, %v3385_v28 }
 0xe88   :  { %v6694_v13 = vadd.f32 %v3389_v39, %v3387_v6 }
 0xe89   :  { %v5067_v50 = vpop.eup %5066 }
 0xe8a   :  { %v3388_v56 = vmul.f32 %v5067_v50, %v3386_v15 }
 0xe8c   :  { %v6697_v7 = vadd.f32 %v3390_v5, %v3388_v56 }
 0xe8e   :  { %v3399_v3 = vpack.c.bf16 %v6697_v7, %v6694_v13 }
 0xe90   :  { %3433 = vmatmul.mubr.bf16.vlgmr.msra.gmra.mxu0 %v3399_v3  ;;  %4584 = vmatmul.mubr.bf16.vlgmr.msra.gmra.mxu1 %v3399_v3 }
 0xe91   :  { %3534 = vmatpush1.bf16.msra.mxu0 %v6533_v55  ;;  %4588 = vmatpush3.bf16.msra.mxu1 %v6536_v21  ;;  %v6959_v21 = vld [vmem:[#allocation25_spill] sm:$0xff] }
 0xe92   :  { %3535 = vmatprep.subr.bf16.mxu0 %v6539_v59  ;;  %4589 = vmatprep.subr.bf16.mxu1 %v6874_v62  ;;  %v2305_v59 = vadd.f32 %v6959_v21, %v6305_v40 }
 0xe93   :  { %3565 = vmatprep.mubr.bf16.mxu0 %v6875_v11  ;;  %4603 = vmatprep.mubr.msk.bf16.mxu1 %vm5250_vm0, %v6874_v62 }
 0xe95   :  { %3536 = vmatpush1.bf16.msra.mxu0 %v6546_v37  ;;  %4590 = vmatpush3.bf16.msra.mxu1 %v6549_v32 }
 0xe96   :  { %3537 = vmatprep.subr.bf16.mxu0 %v6552_v36  ;;  %4591 = vmatprep.subr.bf16.mxu1 %v6874_v62 }
 0xe99   :  { %3538 = vmatpush1.bf16.msra.mxu0 %v6556_v51  ;;  %4592 = vmatpush3.bf16.msra.mxu1 %v6559_v42 }
 0xe9a   :  { %3539 = vmatprep.subr.bf16.mxu0 %v6562_v1  ;;  %4593 = vmatprep.subr.bf16.mxu1 %v6874_v62 }
 0xe9d   :  { %3540 = vmatpush1.bf16.msra.mxu0 %v6566_v47  ;;  %4594 = vmatpush3.bf16.msra.mxu1 %v6569_v27  ;;  %v6960_v47 = vld [vmem:[#allocation40_spill] sm:$0xff] }
 0xe9e   :  { %3541 = vmatprep.subr.bf16.mxu0 %v6572_v4  ;;  %4595 = vmatprep.subr.bf16.mxu1 %v6874_v62  ;;  %v2309_v27 = vadd.f32 %v6960_v47, %v6305_v40  ;;  %v4786_v47 = vld [vmem:[%s6832_s9 + $0x8] sm:$0xff]  }
 0xea1   :  { %3542 = vmatpush1.bf16.msra.mxu0 %v6576_v22  ;;  %4596 = vmatpush3.bf16.msra.mxu1 %v6579_v60 }
 0xea2   :  { %3543 = vmatprep.subr.bf16.mxu0 %v6582_v30  ;;  %4597 = vmatprep.subr.bf16.mxu1 %v6874_v62 }
 0xea5   :  { %3544 = vmatpush1.bf16.msra.mxu0 %v6586_v26  ;;  %4598 = vmatpush3.bf16.msra.mxu1 %v6589_v8  ;;  %v6961_v8 = vld [vmem:[#allocation39_spill] sm:$0xff] }
 0xea6   :  { %3545 = vmatprep.subr.bf16.mxu0 %v6592_v52  ;;  %4599 = vmatprep.subr.bf16.mxu1 %v6874_v62  ;;  %v2307_v52 = vadd.f32 %v6961_v8, %v6320_v35 }
 0xea9   :  { %3546 = vmatpush1.bf16.msra.mxu0 %v6596_v63  ;;  %4600 = vmatpush3.bf16.msra.mxu1 %v6599_v29 }
 0xeaa   :  { %3547 = vmatprep.subr.bf16.mxu0 %v6602_v12  ;;  %4601 = vmatprep.subr.bf16.mxu1 %v6874_v62 }
 0xead   :  { %3548 = vmatpush1.bf16.msra.mxu0 %v6606_v31  ;;  %4602 = vmatpush3.bf16.msra.mxu1 %v6609_v20  ;;  %v6962_v20 = vld [vmem:[#allocation23_spill] sm:$0xff] }
 0xeae   :  { %4607 = vmatprep.subr.bf16.mxu0 %v6874_v62  ;;  %v2311_v24 = vadd.f32 %v6962_v20, %v6320_v35 }
 0xf50   :  { %v3434_v11 = vpop.f32.mrf.mxu0  ;;  %v3477_v55 = vpop.f32.mrf.mxu1 }
 0xf51   :  { %v3435_v37 = vadd.f32 %v3434_v11, %v6308_v34  ;;  %v3478_v14 = vadd.f32 %v3477_v55, %v6331_v0 }
 0xf52   :  { %v3436_v32 = vpop.f32.mrf.mxu0  ;;  %v4585_v36 = vpop.f32.mrf.mxu1 }
 0xf53   :  { %v3484_v51 = vadd.f32 %v3435_v37, %v2305_v59  ;;  %v3437_v22 = vadd.f32 %v3436_v32, %v6317_v46  ;;  %v4782_v36 = vld [vmem:[%s6832_s9 + $0x28] sm:$0xff]  }
 0xf54   :  { %v3438_v42 = vpop.f32.mrf.mxu0  ;;  %v3480_v1 = vpop.f32.mrf.mxu1 }
 0xf55   :  { %v3965_v4 = vmul.f32 -1.442695, %v3484_v51  ;;  %v3439_v60 = vadd.f32 %v3438_v42, %v6308_v34  ;;  %v3498_v12 = vadd.f32 %v3437_v22, %v2307_v52  ;;  %v3481_v58 = vadd.f32 %v3480_v1, %v6331_v0  ;;  %v4783_v51 = vld [vmem:[%s6832_s9 + $0x20] sm:$0xff]   ;;  %v4784_v42 = vld [vmem:[%s6832_s9 + $0x18] sm:$0xff]   ;;  %v4785_v1 = vld [vmem:[%s6832_s9 + $0x10] sm:$0xff]  }
 0xf56   :  { %v3440_v30 = vpop.f32.mrf.mxu0  ;;  %v4586_v26 = vpop.f32.mrf.mxu1 }
 0xf57   :  { %5068 = vpow2.f32 %v3965_v4  ;;  %v3485_v63 = vadd.f32 %v3439_v60, %v2309_v27  ;;  %v3441_v29 = vadd.f32 %v3440_v30, %v6317_v46  ;;  %v3967_v33 = vmul.f32 -1.442695, %v3498_v12  ;;  %v4787_v27 = vld [vmem:[%s6832_s9] sm:$0xff]   ;;  %v6965_v60 = vld [vmem:[#allocation27_spill] sm:$0xff] }
 0xf58   :  { %v2315_v30 = vadd.f32 %v6965_v60, %v6305_v40 }
 0xf59   :  { %v3966_v31 = vmul.f32 -1.442695, %v3485_v63  ;;  %v3499_v25 = vadd.f32 %v3441_v29, %v2311_v24 }
 0xf5b   :  { %5070 = vpow2.f32 %v3966_v31  ;;  %v3968_v16 = vmul.f32 -1.442695, %v3499_v25  ;;  %v6966_v31 = vld [vmem:[#allocation46_spill] sm:$0xff] }
 0xf5c   :  { %5072 = vpow2.f32 %v3967_v33  ;;  %v2319_v20 = vadd.f32 %v6966_v31, %v6305_v40 }
 0xf5d   :  { %5074 = vpow2.f32 %v3968_v16 }
 0xf64   :  { %v5069_v48 = vpop.eup %5068 }
 0xf65   :  { %v3492_v2 = vadd.f32 1.0, %v5069_v48  ;;  %v6967_v48 = vld [vmem:[#allocation44_spill] sm:$0xff] }
 0xf67   :  { %5076 = vrcp.f32 %v3492_v2  ;;  %v2317_v2 = vadd.f32 %v6967_v48, %v6320_v35 }
 0xf68   :  { %v5071_v44 = vpop.eup %5070 }
 0xf69   :  { %v3493_v45 = vadd.f32 1.0, %v5071_v44  ;;  %v5073_v9 = vpop.eup %5072 }
 0xf6a   :  { %v5075_v43 = vpop.eup %5074  ;;  %v3506_v54 = vadd.f32 1.0, %v5073_v9 }
 0xf6b   :  { %5078 = vrcp.f32 %v3493_v45  ;;  %v3507_v49 = vadd.f32 1.0, %v5075_v43 }
 0xf6c   :  { %5080 = vrcp.f32 %v3506_v54  ;;  %v6968_v54 = vld [vmem:[#allocation15_spill] sm:$0xff] }
 0xf6d   :  { %5082 = vrcp.f32 %v3507_v49 }
 0xf74   :  { %v5077_v61 = vpop.eup %5076 }
 0xf75   :  { %v3512_v57 = vmul.f32 %v5077_v61, %v3478_v14  ;;  %v2321_v14 = vadd.f32 %v6968_v54, %v6320_v35  ;;  %v6969_v35 = vld [vmem:[#allocation43_spill] sm:$0xff] }
 0xf77   :  { %v3514_v17 = vadd.f32 %v3512_v57, %v2406_v38 }
 0xf78   :  { %v5079_v41 = vpop.eup %5078 }
 0xf79   :  { %5084 = vtanh.f32 %v3514_v17  ;;  %v3513_v28 = vmul.f32 %v5079_v41, %v3481_v58  ;;  %v5081_v6 = vpop.eup %5080 }
 0xf7a   :  { %v5083_v39 = vpop.eup %5082  ;;  %v3518_v15 = vsub.f32 1.0, %v5081_v6  ;;  %v3522_v5 = vmul.f32 %v5081_v6, %v6694_v13  ;;  %v4780_v13 = vld [vmem:[%s6832_s9 + $0x38] sm:$0xff]  }
 0xf7b   :  { %v3515_v23 = vadd.f32 %v3513_v28, %v2409_v53  ;;  %v3519_v3 = vsub.f32 1.0, %v5083_v39  ;;  %v3523_v59 = vmul.f32 %v5083_v39, %v6697_v7  ;;  %v4781_v7 = vld [vmem:[%s6832_s9 + $0x30] sm:$0xff]   ;;  %v2414_v28 = vadd.f32 %v6969_v35, %v6335_v19 }
 0xf7d   :  { %5086 = vtanh.f32 %v3515_v23 }
 0xf86   :  { %v5085_v50 = vpop.eup %5084 }
 0xf87   :  { %v3520_v56 = vmul.f32 %v5085_v50, %v3518_v15  ;;  %v6970_v50 = vld [vmem:[#allocation47_spill] sm:$0xff] }
 0xf89   :  { %v6754_v11 = vadd.f32 %v3522_v5, %v3520_v56  ;;  %v2417_v56 = vadd.f32 %v6970_v50, %v6335_v19  ;;  %v3973_v19 = vld [vmem:[%s6833_s10] ss:$0 sm:$0xff] }
 0xf8a   :  { %v5087_v55 = vpop.eup %5086 }
 0xf8b   :  { %v3521_v21 = vmul.f32 %v5087_v55, %v3519_v3 }
 0xf8d   :  { %v6757_v37 = vadd.f32 %v3523_v59, %v3521_v21 }
 0xf8f   :  { %v3532_v32 = vpack.c.bf16 %v6757_v37, %v6754_v11 }
 0xf91   :  { %3566 = vmatmul.mubr.bf16.vlgmr.msra.gmra.mxu0 %v3532_v32  ;;  %4604 = vmatmul.mubr.bf16.vlgmr.msra.gmra.mxu1 %v3532_v32 }
 0xf92   :  { %4623 = vmatprep.mubr.msk.bf16.mxu0 %vm5250_vm0, %v6874_v62  ;;  %4608 = vmatpush3.bf16.msra.mxu0 %v4780_v13 }
 0xf93   :  { %4609 = vmatprep.subr.bf16.mxu0 %v6874_v62 }
 0xf96   :  { %4610 = vmatpush3.bf16.msra.mxu0 %v4781_v7 }
 0xf97   :  { %4611 = vmatprep.subr.bf16.mxu0 %v6874_v62 }
 0xf9a   :  { %4612 = vmatpush3.bf16.msra.mxu0 %v4782_v36 }
 0xf9b   :  { %4613 = vmatprep.subr.bf16.mxu0 %v6874_v62 }
 0xf9e   :  { %4614 = vmatpush3.bf16.msra.mxu0 %v4783_v51 }
 0xf9f   :  { %4615 = vmatprep.subr.bf16.mxu0 %v6874_v62 }
 0xfa2   :  { %4616 = vmatpush3.bf16.msra.mxu0 %v4784_v42 }
 0xfa3   :  { %4617 = vmatprep.subr.bf16.mxu0 %v6874_v62 }
 0xfa6   :  { %4618 = vmatpush3.bf16.msra.mxu0 %v4785_v1 }
 0xfa7   :  { %4619 = vmatprep.subr.bf16.mxu0 %v6874_v62 }
 0xfaa   :  { %4620 = vmatpush3.bf16.msra.mxu0 %v4786_v47 }
 0xfab   :  { %4621 = vmatprep.subr.bf16.mxu0 %v6874_v62 }
 0xfae   :  { %4622 = vmatpush3.bf16.msra.mxu0 %v4787_v27 }
0x1051   :  { %v3567_v4 = vpop.f32.mrf.mxu0  ;;  %v3610_v22 = vpop.f32.mrf.mxu1 }
0x1052   :  { %v3568_v26 = vadd.f32 %v3567_v4, %v6308_v34  ;;  %v3611_v41 = vadd.f32 %v3610_v22, %v6331_v0 }
0x1053   :  { %v3569_v8 = vpop.f32.mrf.mxu0  ;;  %v4605_v52 = vpop.f32.mrf.mxu1 }
0x1054   :  { %v3617_v63 = vadd.f32 %v3568_v26, %v2315_v30  ;;  %v3570_v25 = vadd.f32 %v3569_v8, %v6317_v46 }
0x1055   :  { %v3571_v29 = vpop.f32.mrf.mxu0  ;;  %v3613_v12 = vpop.f32.mrf.mxu1 }
0x1056   :  { %v3969_v24 = vmul.f32 -1.442695, %v3617_v63  ;;  %v3572_v62 = vadd.f32 %v3571_v29, %v6308_v34  ;;  %v3631_v9 = vadd.f32 %v3570_v25, %v2317_v2  ;;  %v3614_v39 = vadd.f32 %v3613_v12, %v6331_v0 }
0x1057   :  { %v3573_v33 = vpop.f32.mrf.mxu0  ;;  %v4606_v16 = vpop.f32.mrf.mxu1 }
0x1058   :  { %5088 = vpow2.f32 %v3969_v24  ;;  %v3618_v44 = vadd.f32 %v3572_v62, %v2319_v20  ;;  %v3574_v45 = vadd.f32 %v3573_v33, %v6317_v46  ;;  %v3971_v61 = vmul.f32 -1.442695, %v3631_v9 }
0x105a   :  { %v3970_v43 = vmul.f32 -1.442695, %v3618_v44  ;;  %v3632_v40 = vadd.f32 %v3574_v45, %v2321_v14 }
0x105c   :  { %5090 = vpow2.f32 %v3970_v43  ;;  %v3972_v49 = vmul.f32 -1.442695, %v3632_v40 }
0x105d   :  { %5092 = vpow2.f32 %v3971_v61 }
0x105e   :  { %5094 = vpow2.f32 %v3972_v49 }
0x1065   :  { %v5089_v34 = vpop.eup %5088 }
0x1066   :  { %v3625_v10 = vadd.f32 1.0, %v5089_v34 }
0x1068   :  { %5096 = vrcp.f32 %v3625_v10 }
0x1069   :  { %v5091_v38 = vpop.eup %5090 }
0x106a   :  { %v3626_v57 = vadd.f32 1.0, %v5091_v38  ;;  %v5093_v17 = vpop.eup %5092 }
0x106b   :  { %v5095_v58 = vpop.eup %5094  ;;  %v3639_v46 = vadd.f32 1.0, %v5093_v17 }
0x106c   :  { %5098 = vrcp.f32 %v3626_v57  ;;  %v3640_v53 = vadd.f32 1.0, %v5095_v58 }
0x106d   :  { %5100 = vrcp.f32 %v3639_v46 }
0x106e   :  { %5102 = vrcp.f32 %v3640_v53 }
0x1075   :  { %v5097_v18 = vpop.eup %5096 }
0x1076   :  { %v3645_v23 = vmul.f32 %v5097_v18, %v3611_v41 }
0x1078   :  { %v3647_v6 = vadd.f32 %v3645_v23, %v2414_v28 }
0x1079   :  { %v5099_v15 = vpop.eup %5098 }
0x107a   :  { %5104 = vtanh.f32 %v3647_v6  ;;  %v3646_v5 = vmul.f32 %v5099_v15, %v3614_v39  ;;  %v5101_v55 = vpop.eup %5100 }
0x107b   :  { %v5103_v21 = vpop.eup %5102  ;;  %v3651_v59 = vsub.f32 1.0, %v5101_v55  ;;  %v3655_v7 = vmul.f32 %v5101_v55, %v6754_v11 }
0x107c   :  { %v3648_v3 = vadd.f32 %v3646_v5, %v2417_v56  ;;  %v3652_v36 = vsub.f32 1.0, %v5103_v21  ;;  %v3656_v1 = vmul.f32 %v5103_v21, %v6757_v37 }
0x107e   :  { %5106 = vtanh.f32 %v3648_v3 }
0x1087   :  { %v5105_v32 = vpop.eup %5104 }
0x1088   :  { %v3653_v13 = vmul.f32 %v5105_v32, %v3651_v59 }
0x108a   :  { %v3657_v51 = vadd.f32 %v3655_v7, %v3653_v13 }
0x108b   :  { %v5107_v42 = vpop.eup %5106 }
0x108c   :  { %v3654_v0 = vmul.f32 %v5107_v42, %v3652_v36 }
0x108e   :  { %v3658_v47 = vadd.f32 %v3656_v1, %v3654_v0 }
0x1090   :  { %v3659_v27 = vpack.c.bf16 %v3658_v47, %v3657_v51 }
0x1092   :  { %4624 = vmatmul.mubr.bf16.vlgmr.msra.gmra.mxu0 %v3659_v27 }
0x1152   :  { %v3765_v4 = vpop.f32.mrf.mxu0 }
0x1153   :  { %v3766_v22 = vadd.f32 %v3973_v19, %v3765_v4 }
0x1154   :  { %v4625_v60 = vpop.f32.mrf.mxu0 }
0x1155   :  { %3772 = vst [vmem:[%s6834_s11] sm:$0xff] %v3766_v22 }
0x1156   :  { %v3768_v11 = vpop.f32.mrf.mxu0 }
0x1157   :  { %v3769_v30 = vadd.f32 %v3973_v19, %v3768_v11 }
0x1158   :  { %v4626_v26 = vpop.f32.mrf.mxu0 }
0x1159   :  { %3773 = vst [vmem:[%s6834_s11 + $0x8] sm:$0xff] %v3769_v30 }
0x115a   :  { %3778 = vsyncpa [#allocation5], 1 }
0x115b   :  { %3779 = vsyncpa [#allocation7], 1 }
0x115c   :  { %3780 = vsyncpa [#allocation10], 1 }

</bundles_post_ra>
